<compile_context>
chip_gen: v5e
topology: v5e:2x2
jax: 0.10.0
libtpu: 0.0.40
codegen_flags: <defaults>
</compile_context>

<pallas_src>
import jax
import jax.numpy as jnp
from jax.experimental import pallas as pl
from jax.experimental.pallas import tpu as pltpu

HIDDEN = 256          # per-head hidden width (matches nn.Linear(…, 256))
OUT_LANES = 128       # lane-dense output slab width; q1 = col 0, q2 = col 1
MAX_BATCH_BLOCK = 512 # tile the batch beyond this (keeps v7x VMEM bounded)


def _round_up(x, m):
    return ((x + m - 1) // m) * m


# --------------------------------------------------------------------------- #
# Kernel
# --------------------------------------------------------------------------- #
def _critic_kernel(sa_ref, w1_ref, b1_ref, w2_ref, b2_ref, w3_ref, b3_ref,
                   out_ref):
    f32 = jnp.float32
    bf16 = jnp.bfloat16
    H = HIDDEN

    # Layer 1, both heads fused along columns: (TB, 2H), f32 MXU accumulation.
    sa = sa_ref[...].astype(bf16)
    h = jnp.dot(sa, w1_ref[...], preferred_element_type=f32) + b1_ref[...]
    h = jnp.maximum(h, 0.0).astype(bf16)          # single cast, hoisted out of loop

    # Layer 2, one (TB,256)@(256,256) MXU matmul per head (static unroll).
    b2 = b2_ref[...]                               # (2, H) f32
    gs = []
    for head in range(2):
        hh = h[:, head * H:(head + 1) * H]         # 256-lane-aligned bf16 view
        g = (jnp.dot(hh, w2_ref[head], preferred_element_type=f32)
             + b2[head:head + 1, :])
        gs.append(jnp.maximum(g, 0.0).astype(bf16))
    g_all = jnp.concatenate(gs, axis=-1)           # (TB, 2H) bf16, 256-aligned halves

    # Layer 3 as a single lane-dense MXU matmul against block-sparse (2H, 128) w3:
    # rows 0..H-1 feed column 0 (q1), rows H..2H-1 feed column 1 (q2).
    out_ref[...] = (jnp.dot(g_all, w3_ref[...], preferred_element_type=f32)
                    + b3_ref[...])                 # (TB, 128) unmasked store


# --------------------------------------------------------------------------- #
# Wrapper
# --------------------------------------------------------------------------- #
def critic_forward(state, action, params):
    """Pallas implementation of Critic.forward -> (q1, q2), each (B, 1) float32."""
    B = state.shape[0]
    d_in = state.shape[1] + action.shape[1]
    d_pad, _ = params["w1"].shape

    # Pad batch to a bf16-sublane-friendly multiple of 16; tile over batch only
    # once a block would get large (keeps residency within v7x's 64 MiB VMEM).
    B_pad = _round_up(max(B, 16), 16)
    if B_pad > MAX_BATCH_BLOCK:
        tb = MAX_BATCH_BLOCK
        B_pad = _round_up(B_pad, tb)
    else:
        tb = B_pad
    grid = (B_pad // tb,)

    # Host-side concat + zero-pad (XLA fuses this into input prep; no HBM round-trip
    # of consequence at these sizes).
    sa = jnp.concatenate([state, action], axis=-1).astype(jnp.float32)
    sa = jnp.pad(sa, ((0, B_pad - B), (0, d_pad - d_in)))

    args = (sa, params["w1"], params["b1"], params["w2"], params["b2"],
            params["w3p"], params["b3p"])

    in_specs = [
        pl.BlockSpec((tb, d_pad), lambda i: (i, 0)),                 # sa (batch-tiled)
        pl.BlockSpec(params["w1"].shape, lambda i: (0, 0)),          # w1
        pl.BlockSpec(params["b1"].shape, lambda i: (0, 0)),          # b1
        pl.BlockSpec(params["w2"].shape, lambda i: (0, 0, 0)),       # w2
        pl.BlockSpec(params["b2"].shape, lambda i: (0, 0)),          # b2
        pl.BlockSpec(params["w3p"].shape, lambda i: (0, 0)),         # w3 (block-sparse)
        pl.BlockSpec(params["b3p"].shape, lambda i: (0, 0)),         # b3 (padded)
    ]

    out = pl.pallas_call(
        _critic_kernel,
        out_shape=jax.ShapeDtypeStruct((B_pad, OUT_LANES), jnp.float32),
        grid=grid,
        in_specs=in_specs,
        out_specs=pl.BlockSpec((tb, OUT_LANES), lambda i: (i, 0)),
        compiler_params=pltpu.CompilerParams(
            dimension_semantics=("parallel",)),
    )(*args)

    return out[:B, 0:1], out[:B, 1:2]


def critic_q1_only(state, action, params):
    """Mirror of Critic.q1_only (reuses the fused kernel)."""
    q1, _ = critic_forward(state, action, params)
    return q1


# --------------------------------------------------------------------------- #
# Parameter init (PyTorch nn.Linear-style), packed into the kernel layout
# --------------------------------------------------------------------------- #
def init_critic_params(key, state_dim, action_dim, hidden=HIDDEN,
                       weight_dtype=jnp.bfloat16):
    d_in = state_dim + action_dim
    d_pad = _round_up(d_in, 16)

    def linear(k, fan_in, fan_out):
        kw, kb = jax.random.split(k)
        bound = 1.0 / jnp.sqrt(jnp.float32(fan_in))
        w = jax.random.uniform(kw, (fan_in, fan_out), jnp.float32, -bound, bound)
        b = jax.random.uniform(kb, (1, fan_out), jnp.float32, -bound, bound)
        return w, b

    keys = jax.random.split(key, 6)
    w1_1, b1_1 = linear(keys[0], d_in, hidden)
    w2_1, b2_1 = linear(keys[1], hidden, hidden)
    w3_1, b3_1 = linear(keys[2], hidden, 1)
    w1_2, b1_2 = linear(keys[3], d_in, hidden)
    w2_2, b2_2 = linear(keys[4], hidden, hidden)
    w3_2, b3_2 = linear(keys[5], hidden, 1)

    # Layer 1: both heads fused along columns; rows zero-padded to d_pad.
    w1p = jnp.zeros((d_pad, 2 * hidden), jnp.float32)
    w1p = w1p.at[:d_in, :hidden].set(w1_1).at[:d_in, hidden:].set(w1_2)

    # Layer 3: block-sparse lane-dense (2H, 128): head-1 -> col 0, head-2 -> col 1.
    w3p = jnp.zeros((2 * hidden, OUT_LANES), jnp.float32)
    w3p = w3p.at[:hidden, 0].set(w3_1[:, 0]).at[hidden:, 1].set(w3_2[:, 0])
    b3p = jnp.zeros((1, OUT_LANES), jnp.float32)
    b3p = b3p.at[0, 0].set(b3_1[0, 0]).at[0, 1].set(b3_2[0, 0])

    kernel_params = {
        "w1":  w1p.astype(weight_dtype),                              # (Dp, 2H) bf16
        "b1":  jnp.concatenate([b1_1, b1_2], axis=1),                 # (1, 2H) f32
        "w2":  jnp.stack([w2_1, w2_2], axis=0).astype(weight_dtype),  # (2, H, H) bf16
        "b2":  jnp.concatenate([b2_1, b2_2], axis=0),                 # (2, H) f32
        "w3p": w3p.astype(weight_dtype),                              # (2H, 128) bf16
        "b3p": b3p,                                                   # (1, 128) f32
    }
    # Full-precision masters for end-to-end parity checks vs an f32 PyTorch Critic.
    ref_params = {
        "w1": [w1_1, w1_2], "b1": [b1_1, b1_2],
        "w2": [w2_1, w2_2], "b2": [b2_1, b2_2],
        "w3": [w3_1, w3_2], "b3": [b3_1, b3_2],
    }
    return kernel_params, ref_params


# --------------------------------------------------------------------------- #
# References
# --------------------------------------------------------------------------- #
def _reference_forward_quant(state, action, params):
    """Plain JAX reference using the same bf16-quantized weights (f32 activations)."""
    H = HIDDEN
    f32 = jnp.float32
    d_pad = params["w1"].shape[0]
    d_in = state.shape[1] + action.shape[1]
    sa = jnp.concatenate([state, action], axis=-1)
    sa = jnp.pad(sa, ((0, 0), (0, d_pad - d_in)))
    h = jnp.maximum(sa @ params["w1"].astype(f32) + params["b1"], 0.0)
    w3 = params["w3p"].astype(f32)
    outs = []
    for hd in range(2):
        x = jnp.maximum(h[:, hd * H:(hd + 1) * H] @ params["w2"][hd].astype(f32)
                        + params["b2"][hd:hd + 1, :], 0.0)
        q = x @ w3[hd * H:(hd + 1) * H, hd:hd + 1] + params["b3p"][0, hd]
        outs.append(q)
    return outs[0], outs[1]


def _reference_forward_f32(state, action, ref):
    """Full-f32 reference (matches the original PyTorch Critic semantics exactly)."""
    sa = jnp.concatenate([state, action], axis=-1)
    outs = []
    for hd in range(2):
        x = jnp.maximum(sa @ ref["w1"][hd] + ref["b1"][hd], 0.0)
        x = jnp.maximum(x @ ref["w2"][hd] + ref["b2"][hd], 0.0)
        outs.append(x @ ref["w3"][hd] + ref["b3"][hd])
    return outs[0], outs[1]


# --------------------------------------------------------------------------- #
if __name__ == "__main__":
    key = jax.random.PRNGKey(0)
    k_params, k_data = jax.random.split(key)

    state_dim, action_dim = 17, 6
    params, ref_params = init_critic_params(k_params, state_dim, action_dim)

    # B=256: the real TD3 minibatch (amortizes launch + weight DMA, fills MXU M).
    # B=8: exercises the batch/feature padding path.
    for batch in (256, 8):
        ks, ka = jax.random.split(jax.random.fold_in(k_data, batch))
        state = jax.random.normal(ks, (batch, state_dim), jnp.float32)
        action = jax.random.normal(ka, (batch, action_dim), jnp.float32)

        q1, q2 = critic_forward(state, action, params)
        q1 = jax.block_until_ready(q1)
        q2 = jax.block_until_ready(q2)
        assert q1.shape == (batch, 1) and q2.shape == (batch, 1)

        # Tight check vs the same bf16-quantized weights (f32-activation reference).
        q1_q, q2_q = _reference_forward_quant(state, action, params)
        assert jnp.allclose(q1, q1_q, atol=2e-2, rtol=2e-2)
        assert jnp.allclose(q2, q2_q, atol=2e-2, rtol=2e-2)

        # Looser end-to-end parity check vs the full-f32 (PyTorch-equivalent) model,
        # covering bf16 weight + activation quantization.
        q1_f, q2_f = _reference_forward_f32(state, action, ref_params)
        assert jnp.allclose(q1, q1_f, atol=5e-2, rtol=5e-2)
        assert jnp.allclose(q2, q2_f, atol=5e-2, rtol=5e-2)

        # q1_only path shares the same kernel.
        q1_only = jax.block_until_ready(critic_q1_only(state, action, params))
        assert jnp.allclose(q1_only, q1)

    print("KERNEL_OK")
</pallas_src>

<mosaic_0001>
module attributes {stable_mosaic.version = 11 : i64} {
  func.func @_critic_kernel(%arg0: i32, %arg1: memref<256x32xf32, #tpu.memory_space<vmem>>, %arg2: memref<32x512xbf16, #tpu.memory_space<vmem>>, %arg3: memref<1x512xf32, #tpu.memory_space<vmem>>, %arg4: memref<2x256x256xbf16, #tpu.memory_space<vmem>>, %arg5: memref<2x256xf32, #tpu.memory_space<vmem>>, %arg6: memref<512x128xbf16, #tpu.memory_space<vmem>>, %arg7: memref<1x128xf32, #tpu.memory_space<vmem>>, %arg8: memref<256x128xf32, #tpu.memory_space<vmem>>) attributes {dimension_semantics = [#tpu.dimension_semantics<parallel>], iteration_bounds = array<i64: 1>, scalar_prefetch = 0 : i64, scratch_operands = 0 : i64, tpu.core_type = #tpu.core_type<tc>, window_params = [{transform_indices = @transform_0, window_bounds = array<i64: 256, 32>}, {pipeline_mode = #tpu.pipeline_mode<synchronous>, transform_indices = @transform_1, window_bounds = array<i64: 32, 512>}, {pipeline_mode = #tpu.pipeline_mode<synchronous>, transform_indices = @transform_2, window_bounds = array<i64: 1, 512>}, {pipeline_mode = #tpu.pipeline_mode<synchronous>, transform_indices = @transform_3, window_bounds = array<i64: 2, 256, 256>}, {pipeline_mode = #tpu.pipeline_mode<synchronous>, transform_indices = @transform_4, window_bounds = array<i64: 2, 256>}, {pipeline_mode = #tpu.pipeline_mode<synchronous>, transform_indices = @transform_5, window_bounds = array<i64: 512, 128>}, {pipeline_mode = #tpu.pipeline_mode<synchronous>, transform_indices = @transform_6, window_bounds = array<i64: 1, 128>}, {transform_indices = @transform_7, window_bounds = array<i64: 256, 128>}]} {
    %c0 = arith.constant 0 : index
    %c0_0 = arith.constant 0 : index
    %0 = vector.load %arg1[%c0, %c0_0] : memref<256x32xf32, #tpu.memory_space<vmem>>, vector<256x32xf32>
    %1 = arith.truncf %0 : vector<256x32xf32> to vector<256x32xbf16>
    %c0_1 = arith.constant 0 : index
    %c0_2 = arith.constant 0 : index
    %2 = vector.load %arg2[%c0_1, %c0_2] : memref<32x512xbf16, #tpu.memory_space<vmem>>, vector<32x512xbf16>
    %cst = arith.constant dense<0.000000e+00> : vector<256x512xf32>
    %3 = tpu.matmul %1, %2, %cst {dimension_numbers = #tpu.dot_dimension_numbers<[1], [0], [0], [1], [0, 0, 1, 1], [], []>} : vector<256x32xbf16>, vector<32x512xbf16>, vector<256x512xf32> -> vector<256x512xf32>
    %c0_3 = arith.constant 0 : index
    %c0_4 = arith.constant 0 : index
    %4 = vector.load %arg3[%c0_3, %c0_4] : memref<1x512xf32, #tpu.memory_space<vmem>>, vector<1x512xf32>
    %5 = vector.broadcast %4 : vector<1x512xf32> to vector<256x512xf32>
    %6 = arith.addf %3, %5 : vector<256x512xf32>
    %cst_5 = arith.constant 0.000000e+00 : f32
    %7 = vector.broadcast %cst_5 : f32 to vector<256x512xf32>
    %8 = arith.maximumf %6, %7 : vector<256x512xf32>
    %9 = arith.truncf %8 : vector<256x512xf32> to vector<256x512xbf16>
    %c0_6 = arith.constant 0 : index
    %c0_7 = arith.constant 0 : index
    %10 = vector.load %arg5[%c0_6, %c0_7] : memref<2x256xf32, #tpu.memory_space<vmem>>, vector<2x256xf32>
    %11 = vector.extract_strided_slice %9 {offsets = [0, 0], sizes = [256, 256], strides = [1, 1]} : vector<256x512xbf16> to vector<256x256xbf16>
    %c0_8 = arith.constant 0 : index
    %c0_9 = arith.constant 0 : index
    %c0_10 = arith.constant 0 : index
    %12 = vector.load %arg4[%c0_8, %c0_9, %c0_10] : memref<2x256x256xbf16, #tpu.memory_space<vmem>>, vector<1x256x256xbf16>
    %13 = vector.shape_cast %12 : vector<1x256x256xbf16> to vector<256x256xbf16>
    %cst_11 = arith.constant dense<0.000000e+00> : vector<256x256xf32>
    %14 = tpu.matmul %11, %13, %cst_11 {dimension_numbers = #tpu.dot_dimension_numbers<[1], [0], [0], [1], [0, 0, 1, 1], [], []>} : vector<256x256xbf16>, vector<256x256xbf16>, vector<256x256xf32> -> vector<256x256xf32>
    %15 = vector.extract_strided_slice %10 {offsets = [0, 0], sizes = [1, 256], strides = [1, 1]} : vector<2x256xf32> to vector<1x256xf32>
    %16 = vector.broadcast %15 : vector<1x256xf32> to vector<256x256xf32>
    %17 = arith.addf %14, %16 : vector<256x256xf32>
    %cst_12 = arith.constant 0.000000e+00 : f32
    %18 = vector.broadcast %cst_12 : f32 to vector<256x256xf32>
    %19 = arith.maximumf %17, %18 : vector<256x256xf32>
    %20 = arith.truncf %19 : vector<256x256xf32> to vector<256x256xbf16>
    %21 = vector.extract_strided_slice %9 {offsets = [0, 256], sizes = [256, 256], strides = [1, 1]} : vector<256x512xbf16> to vector<256x256xbf16>
    %c1 = arith.constant 1 : index
    %c0_13 = arith.constant 0 : index
    %c0_14 = arith.constant 0 : index
    %22 = vector.load %arg4[%c1, %c0_13, %c0_14] : memref<2x256x256xbf16, #tpu.memory_space<vmem>>, vector<1x256x256xbf16>
    %23 = vector.shape_cast %22 : vector<1x256x256xbf16> to vector<256x256xbf16>
    %cst_15 = arith.constant dense<0.000000e+00> : vector<256x256xf32>
    %24 = tpu.matmul %21, %23, %cst_15 {dimension_numbers = #tpu.dot_dimension_numbers<[1], [0], [0], [1], [0, 0, 1, 1], [], []>} : vector<256x256xbf16>, vector<256x256xbf16>, vector<256x256xf32> -> vector<256x256xf32>
    %25 = vector.extract_strided_slice %10 {offsets = [1, 0], sizes = [1, 256], strides = [1, 1]} : vector<2x256xf32> to vector<1x256xf32>
    %26 = vector.broadcast %25 : vector<1x256xf32> to vector<256x256xf32>
    %27 = arith.addf %24, %26 : vector<256x256xf32>
    %cst_16 = arith.constant 0.000000e+00 : f32
    %28 = vector.broadcast %cst_16 : f32 to vector<256x256xf32>
    %29 = arith.maximumf %27, %28 : vector<256x256xf32>
    %30 = arith.truncf %29 : vector<256x256xf32> to vector<256x256xbf16>
    %31 = tpu.concatenate %20, %30 in 1 : vector<256x256xbf16>, vector<256x256xbf16> -> vector<256x512xbf16>
    %c0_17 = arith.constant 0 : index
    %c0_18 = arith.constant 0 : index
    %32 = vector.load %arg6[%c0_17, %c0_18] : memref<512x128xbf16, #tpu.memory_space<vmem>>, vector<512x128xbf16>
    %cst_19 = arith.constant dense<0.000000e+00> : vector<256x128xf32>
    %33 = tpu.matmul %31, %32, %cst_19 {dimension_numbers = #tpu.dot_dimension_numbers<[1], [0], [0], [1], [0, 0, 1, 1], [], []>} : vector<256x512xbf16>, vector<512x128xbf16>, vector<256x128xf32> -> vector<256x128xf32>
    %c0_20 = arith.constant 0 : index
    %c0_21 = arith.constant 0 : index
    %34 = vector.load %arg7[%c0_20, %c0_21] : memref<1x128xf32, #tpu.memory_space<vmem>>, vector<1x128xf32>
    %35 = vector.broadcast %34 : vector<1x128xf32> to vector<256x128xf32>
    %36 = arith.addf %33, %35 : vector<256x128xf32>
    %c0_22 = arith.constant 0 : index
    %c0_23 = arith.constant 0 : index
    %37 = vector.load %arg8[%c0_22, %c0_23] : memref<256x128xf32, #tpu.memory_space<vmem>>, vector<256x128xf32>
    tpu.vector_store %arg8[%c0_22, %c0_23], %36 {strides = array<i32>} : memref<256x128xf32, #tpu.memory_space<vmem>>, vector<256x128xf32>,
    return
  }
  func.func @transform_0(%arg0: i32) -> (i32, i32) {
    %c0_i32 = arith.constant 0 : i32
    %c0_i32_0 = arith.constant 0 : i32
    return %arg0, %c0_i32 : i32, i32
  }
  func.func @transform_1(%arg0: i32) -> (i32, i32) {
    %c0_i32 = arith.constant 0 : i32
    %c0_i32_0 = arith.constant 0 : i32
    %c0_i32_1 = arith.constant 0 : i32
    return %c0_i32, %c0_i32_0 : i32, i32
  }
  func.func @transform_2(%arg0: i32) -> (i32, i32) {
    %c0_i32 = arith.constant 0 : i32
    %c0_i32_0 = arith.constant 0 : i32
    %c0_i32_1 = arith.constant 0 : i32
    return %c0_i32, %c0_i32_0 : i32, i32
  }
  func.func @transform_3(%arg0: i32) -> (i32, i32, i32) {
    %c0_i32 = arith.constant 0 : i32
    %c0_i32_0 = arith.constant 0 : i32
    %c0_i32_1 = arith.constant 0 : i32
    %c0_i32_2 = arith.constant 0 : i32
    return %c0_i32, %c0_i32_0, %c0_i32_1 : i32, i32, i32
  }
  func.func @transform_4(%arg0: i32) -> (i32, i32) {
    %c0_i32 = arith.constant 0 : i32
    %c0_i32_0 = arith.constant 0 : i32
    %c0_i32_1 = arith.constant 0 : i32
    return %c0_i32, %c0_i32_0 : i32, i32
  }
  func.func @transform_5(%arg0: i32) -> (i32, i32) {
    %c0_i32 = arith.constant 0 : i32
    %c0_i32_0 = arith.constant 0 : i32
    %c0_i32_1 = arith.constant 0 : i32
    return %c0_i32, %c0_i32_0 : i32, i32
  }
  func.func @transform_6(%arg0: i32) -> (i32, i32) {
    %c0_i32 = arith.constant 0 : i32
    %c0_i32_0 = arith.constant 0 : i32
    %c0_i32_1 = arith.constant 0 : i32
    return %c0_i32, %c0_i32_0 : i32, i32
  }
  func.func @transform_7(%arg0: i32) -> (i32, i32) {
    %c0_i32 = arith.constant 0 : i32
    %c0_i32_0 = arith.constant 0 : i32
    return %arg0, %c0_i32 : i32, i32
  }
}

</mosaic_0001>

<bundles_post_ra>
// kernel: tpu_custom_call.1
= control target key start
LH: loop header
LB: loop body
LE: loop exit
PB: predicated region body
PF: predicated region fallthrough
CT: control target
= control target key end

     0   :  { %12 = vsyncpa [#allocation3], 0  ;;  %s5204_s0 = inlined_call_operand.vmem [shape: f32[256,32], index: 0, kind: input, shape index: {}]   ;;  %s5205_s1 = inlined_call_operand.vmem [shape: bf16[32,512], index: 1, kind: input, shape index: {}]   ;;  %s5206_s2 = inlined_call_operand.vmem [shape: f32[1,512], index: 2, kind: input, shape index: {}]   ;;  %s5207_s3 = inlined_call_operand.hbm [shape: bf16[2,256,256], index: 3, kind: input, shape index: {}]   ;;  %s5208_s4 = inlined_call_operand.hbm [shape: f32[2,256], index: 4, kind: input, shape index: {}]   ;;  %s5209_s5 = inlined_call_operand.vmem [shape: bf16[512,128], index: 5, kind: input, shape index: {}]   ;;  %s5210_s6 = inlined_call_operand.hbm [shape: f32[1,128], index: 6, kind: input, shape index: {}]   ;;  %s5211_s7 = inlined_call_operand.hbm [shape: f32[256,128], index: 7, kind: output, shape index: {}]  }
   0x1   :  { %13 = vsyncpa [#allocation6], 0  ;;  %s39_s26 = sshll.u32 %s5208_s4, 4  ;;  %s40_s26 = int_to_ptr.hbm [resolvable:$true] %s39_s26 }
   0x2   :  { %14 = vsyncpa [#allocation4], 0  ;;  %s4079_s27 = smov [#allocation5]   ;;  %s25_s8 = sshll.u32 %s5207_s3, 4  ;;  %s26_s8 = int_to_ptr.hbm [resolvable:$true] %s25_s8 }
   0x3   :  { %s41_s28 = sshll.u32 %s4079_s27, 4  ;;  %s4080_s9 = smov [#allocation2]   ;;  %s42_s28 = int_to_ptr.vmem [resolvable:$true] %s41_s28 }
   0x4   :  { %44 = dma.hbm_to_vmem [thread:$0]  %s40_s26, 64, %s42_s28, [#allocation6]  }
   0x5   :  { %s27_s10 = sshll.u32 %s4080_s9, 4  ;;  %s4081_s11 = smov 128   ;;  %s28_s10 = int_to_ptr.vmem [resolvable:$true] %s27_s10 }
   0x6   :  { %s4082_s12 = smov 8   ;;  %s52_s14 = sshll.u32 %s5210_s6, 4  ;;  %s53_s14 = int_to_ptr.hbm [resolvable:$true] %s52_s14 }
   0x7   :  { %33 = dma.hbm_to_vmem [thread:$0]  %s26_s8, 8192, %s28_s10, [#allocation3], %s4081_s11, %s4081_s11, %s4082_s12  }
   0x8   :  { %s4083_s15 = smov [#allocation7]  }
   0x9   :  { %s54_s16 = sshll.u32 %s4083_s15, 4  ;;  %s55_s16 = int_to_ptr.vmem [resolvable:$true] %s54_s16 }
   0xa   :  { %57 = dma.hbm_to_vmem [thread:$0]  %s53_s14, 16, %s55_s16, [#allocation6]  }
   0xb   :  { %4073 = dma.done.wait [#allocation3], 8192  }
   0xc   :  { %4074 = vsyncadd [#allocation3], 4294959104 }
   0xd   :  { %4075 = dma.done.wait [#allocation6], 80  }
   0xe   :  { %4076 = vsyncadd [#allocation6], 4294967216  ;;  %v3403_v0 = vld [vmem:[%s5205_s1 + $0x20] sm:$0xf]  ;;  %v3871_v1 = vld [vmem:[%s5205_s1 + $0x2c] sm:$0xf0] }
   0xf   :  { %v3869_v2 = vld [vmem:[%s5205_s1 + $0x24] sm:$0xf]  ;;  %v3404_v3 = vor.u32 %v3871_v1, %v3403_v0  ;;  %v3405_v4 = vld [vmem:[%s5205_s1 + $0x30] sm:$0xf0]  ;;  %v3411_v5 = vld [vmem:[%s5205_s1 + $0x28] sm:$0xf] }
  0x10   :  { %v3872_v6 = vld [vmem:[%s5205_s1 + $0x34] sm:$0xf0]  ;;  %v3408_v7 = vor.u32 %v3869_v2, %v3405_v4  ;;  %v3870_v9 = vld [vmem:[%s5205_s1 + $0x2c] sm:$0xf]  ;;  %v3413_v10 = vld [vmem:[%s5205_s1 + $0x38] sm:$0xf0] }
  0x11   :  { %v3412_v8 = vor.u32 %v3872_v6, %v3411_v5  ;;  %v3387_v11 = vld [vmem:[%s5205_s1] sm:$0xf]  ;;  %232 = vmatpush.bf16.msra.mxu0 %v3404_v3  ;;  %v3416_v12 = vor.u32 %v3870_v9, %v3413_v10  ;;  %v3867_v13 = vld [vmem:[%s5205_s1 + $0xc] sm:$0xf0]  ;;  %v3865_v14 = vld [vmem:[%s5205_s1 + $0x4] sm:$0xf] }
  0x12   :  { %v3389_v15 = vld [vmem:[%s5205_s1 + $0x10] sm:$0xf0]  ;;  %321 = vmatpush.bf16.msra.mxu1 %v3408_v7  ;;  %v3388_v16 = vor.u32 %v3867_v13, %v3387_v11  ;;  %v3395_v18 = vld [vmem:[%s5205_s1 + $0x8] sm:$0xf]  ;;  %v3868_v19 = vld [vmem:[%s5205_s1 + $0x14] sm:$0xf0] }
  0x13   :  { %410 = vmatpush.bf16.msra.mxu2 %v3412_v8  ;;  %v3392_v17 = vor.u32 %v3865_v14, %v3389_v15  ;;  %v3866_v20 = vld [vmem:[%s5205_s1 + $0xc] sm:$0xf]  ;;  %499 = vmatpush.bf16.msra.mxu3 %v3416_v12  ;;  %v3396_v21 = vor.u32 %v3868_v19, %v3395_v18  ;;  %v3397_v22 = vld [vmem:[%s5205_s1 + $0x18] sm:$0xf0]  ;;  %v71_v23 = vld [vmem:[%s5204_s0] sm:$0xff]  ;;  %vm177_vm0 = vcmask 261120  }
  0x14   :  { %v72_v24 = vld [vmem:[%s5204_s0 + $0x8] sm:$0xff]  ;;  %v3400_v25 = vor.u32 %v3866_v20, %v3397_v22  ;;  %v3887_v27 = vld [vmem:[#allocation2 + $0x74] sm:$0xf]  ;;  %v3541_v28 = vld [vmem:[#allocation2 + $0x78] sm:$0xf0]  ;;  %s3371_s24 = sshll.u32 %s5211_s7, 4  ;;  %s3372_s24 = int_to_ptr.hbm [resolvable:$true] %s3371_s24 }
  0x15   :  { %v103_v26 = vpack.c.bf16 %v72_v24, %v71_v23  ;;  %v3539_v29 = vld [vmem:[#allocation2 + $0x70] sm:$0xf]  ;;  %233 = vmatpush.bf16.msra.mxu0 %v3388_v16  ;;  %v3544_v30 = vor.u32 %v3887_v27, %v3541_v28  ;;  %v3888_v31 = vld [vmem:[#allocation2 + $0x74] sm:$0xf0]  ;;  %v3903_v32 = vld [vmem:[#allocation2 + $0xf4] sm:$0xf] }
  0x16   :  { %v3605_v33 = vld [vmem:[#allocation2 + $0xf8] sm:$0xf0]  ;;  %322 = vmatpush.bf16.msra.mxu1 %v3392_v17  ;;  %v3540_v34 = vor.u32 %v3888_v31, %v3539_v29  ;;  %v3603_v36 = vld [vmem:[#allocation2 + $0xf0] sm:$0xf]  ;;  %v3904_v37 = vld [vmem:[#allocation2 + $0xf4] sm:$0xf0] }
  0x17   :  { %411 = vmatpush.bf16.msra.mxu2 %v3396_v21  ;;  %v3608_v35 = vor.u32 %v3903_v32, %v3605_v33  ;;  %500 = vmatpush.bf16.msra.mxu3 %v3400_v25  ;;  %v3604_v38 = vor.u32 %v3904_v37, %v3603_v36  ;;  %v3885_v39 = vld [vmem:[#allocation2 + $0x64] sm:$0xf]  ;;  %v3533_v40 = vld [vmem:[#allocation2 + $0x68] sm:$0xf0]  ;;  %v3531_v41 = vld [vmem:[#allocation2 + $0x60] sm:$0xf] }
  0x18   :  { %3417 = vmatmul.msk.bf16.vlgmr.msra.gmra.mxu0 %vm177_vm0, %v103_v26  ;;  %v3536_v42 = vor.u32 %v3885_v39, %v3533_v40  ;;  %v3886_v43 = vld [vmem:[#allocation2 + $0x64] sm:$0xf0]  ;;  %v3901_v44 = vld [vmem:[#allocation2 + $0xe4] sm:$0xf]  ;;  %v3597_v45 = vld [vmem:[#allocation2 + $0xe8] sm:$0xf0] }
  0x19   :  { %3433 = vmatmul.msk.bf16.vlgmr.msra.gmra.mxu1 %vm177_vm0, %v103_v26  ;;  %1134 = vmatpush.bf16.msrb.mxu0 %v3540_v34  ;;  %v3532_v46 = vor.u32 %v3886_v43, %v3531_v41  ;;  %v3600_v47 = vor.u32 %v3901_v44, %v3597_v45  ;;  %v3595_v48 = vld [vmem:[#allocation2 + $0xe0] sm:$0xf]  ;;  %v3902_v49 = vld [vmem:[#allocation2 + $0xe4] sm:$0xf0]  ;;  %v73_v51 = vld [vmem:[%s5204_s0 + $0x10] sm:$0xff] }
  0x1a   :  { %3449 = vmatmul.msk.bf16.vlgmr.msra.gmra.mxu2 %vm177_vm0, %v103_v26  ;;  %3465 = vmatmul.msk.bf16.vlgmr.msra.gmra.mxu3 %vm177_vm0, %v103_v26  ;;  %v3596_v50 = vor.u32 %v3902_v49, %v3595_v48  ;;  %v74_v52 = vld [vmem:[%s5204_s0 + $0x18] sm:$0xff]  ;;  %v75_v54 = vld [vmem:[%s5204_s0 + $0x20] sm:$0xff]  ;;  %v76_v55 = vld [vmem:[%s5204_s0 + $0x28] sm:$0xff] }
  0x1b   :  { %1312 = vmatpush.bf16.msrb.mxu2 %v3544_v30  ;;  %1401 = vmatpush.bf16.msrb.mxu3 %v3608_v35  ;;  %v104_v53 = vpack.c.bf16 %v74_v52, %v73_v51  ;;  %v105_v56 = vpack.c.bf16 %v76_v55, %v75_v54  ;;  %v3883_v57 = vld [vmem:[#allocation2 + $0x54] sm:$0xf]  ;;  %v3525_v58 = vld [vmem:[#allocation2 + $0x58] sm:$0xf0]  ;;  %v3523_v59 = vld [vmem:[#allocation2 + $0x50] sm:$0xf] }
  0x1c   :  { %1223 = vmatpush.bf16.msrb.mxu1 %v3604_v38  ;;  %v3528_v60 = vor.u32 %v3883_v57, %v3525_v58  ;;  %v3884_v61 = vld [vmem:[#allocation2 + $0x54] sm:$0xf0]  ;;  %v3899_v62 = vld [vmem:[#allocation2 + $0xd4] sm:$0xf]  ;;  %v3589_v63 = vld [vmem:[#allocation2 + $0xd8] sm:$0xf0] }
  0x1d   :  { %1135 = vmatpush.bf16.msrb.mxu0 %v3532_v46  ;;  %v3524_v0 = vor.u32 %v3884_v61, %v3523_v59  ;;  %v3592_v1 = vor.u32 %v3899_v62, %v3589_v63  ;;  %v3587_v2 = vld [vmem:[#allocation2 + $0xd0] sm:$0xf]  ;;  %v3900_v3 = vld [vmem:[#allocation2 + $0xd4] sm:$0xf0]  ;;  %v79_v8 = vld [vmem:[%s5204_s0 + $0x40] sm:$0xff] }
  0x1e   :  { %v3588_v4 = vor.u32 %v3900_v3, %v3587_v2  ;;  %v77_v5 = vld [vmem:[%s5204_s0 + $0x30] sm:$0xff]  ;;  %v78_v6 = vld [vmem:[%s5204_s0 + $0x38] sm:$0xff]  ;;  %v80_v9 = vld [vmem:[%s5204_s0 + $0x48] sm:$0xff] }
  0x1f   :  { %1313 = vmatpush.bf16.msrb.mxu2 %v3536_v42  ;;  %1402 = vmatpush.bf16.msrb.mxu3 %v3600_v47  ;;  %v106_v7 = vpack.c.bf16 %v78_v6, %v77_v5  ;;  %v107_v10 = vpack.c.bf16 %v80_v9, %v79_v8  ;;  %v3881_v11 = vld [vmem:[#allocation2 + $0x44] sm:$0xf]  ;;  %v3517_v12 = vld [vmem:[#allocation2 + $0x48] sm:$0xf0]  ;;  %v3515_v13 = vld [vmem:[#allocation2 + $0x40] sm:$0xf] }
  0x20   :  { %1224 = vmatpush.bf16.msrb.mxu1 %v3596_v50  ;;  %v3520_v14 = vor.u32 %v3881_v11, %v3517_v12  ;;  %v3882_v15 = vld [vmem:[#allocation2 + $0x44] sm:$0xf0]  ;;  %v3897_v16 = vld [vmem:[#allocation2 + $0xc4] sm:$0xf]  ;;  %v3581_v17 = vld [vmem:[#allocation2 + $0xc8] sm:$0xf0] }
  0x21   :  { %1136 = vmatpush.bf16.msrb.mxu0 %v3524_v0  ;;  %v3516_v18 = vor.u32 %v3882_v15, %v3515_v13  ;;  %v3584_v19 = vor.u32 %v3897_v16, %v3581_v17  ;;  %v3579_v20 = vld [vmem:[#allocation2 + $0xc0] sm:$0xf]  ;;  %v3898_v21 = vld [vmem:[#allocation2 + $0xc4] sm:$0xf0]  ;;  %v81_v23 = vld [vmem:[%s5204_s0 + $0x50] sm:$0xff] }
  0x22   :  { %v3580_v22 = vor.u32 %v3898_v21, %v3579_v20  ;;  %v82_v24 = vld [vmem:[%s5204_s0 + $0x58] sm:$0xff]  ;;  %v83_v26 = vld [vmem:[%s5204_s0 + $0x60] sm:$0xff]  ;;  %v84_v27 = vld [vmem:[%s5204_s0 + $0x68] sm:$0xff] }
  0x23   :  { %1314 = vmatpush.bf16.msrb.mxu2 %v3528_v60  ;;  %1403 = vmatpush.bf16.msrb.mxu3 %v3592_v1  ;;  %v108_v25 = vpack.c.bf16 %v82_v24, %v81_v23  ;;  %v109_v28 = vpack.c.bf16 %v84_v27, %v83_v26  ;;  %v3879_v29 = vld [vmem:[#allocation2 + $0x34] sm:$0xf]  ;;  %v3509_v30 = vld [vmem:[#allocation2 + $0x38] sm:$0xf0]  ;;  %v3507_v31 = vld [vmem:[#allocation2 + $0x30] sm:$0xf] }
  0x24   :  { %1225 = vmatpush.bf16.msrb.mxu1 %v3588_v4  ;;  %v3512_v32 = vor.u32 %v3879_v29, %v3509_v30  ;;  %v3880_v33 = vld [vmem:[#allocation2 + $0x34] sm:$0xf0]  ;;  %v3895_v34 = vld [vmem:[#allocation2 + $0xb4] sm:$0xf]  ;;  %v3573_v35 = vld [vmem:[#allocation2 + $0xb8] sm:$0xf0] }
  0x25   :  { %1137 = vmatpush.bf16.msrb.mxu0 %v3516_v18  ;;  %v3508_v36 = vor.u32 %v3880_v33, %v3507_v31  ;;  %v3576_v37 = vor.u32 %v3895_v34, %v3573_v35  ;;  %v85_v38 = vld [vmem:[%s5204_s0 + $0x70] sm:$0xff]  ;;  %v86_v39 = vld [vmem:[%s5204_s0 + $0x78] sm:$0xff]  ;;  %v127_v44 = vld [vmem:[%s5206_s2] sm:$0xf] }
  0x26   :  { %v110_v40 = vpack.c.bf16 %v86_v39, %v85_v38  ;;  %v3571_v41 = vld [vmem:[#allocation2 + $0xb0] sm:$0xf]  ;;  %v3896_v42 = vld [vmem:[#allocation2 + $0xb4] sm:$0xf0]  ;;  %v87_v45 = vld [vmem:[%s5204_s0 + $0x80] sm:$0xff]  ;;  %v4274_v47 = vperm.slane %v127_v44, 0 }
  0x27   :  { %1315 = vmatpush.bf16.msrb.mxu2 %v3520_v14  ;;  %1404 = vmatpush.bf16.msrb.mxu3 %v3584_v19  ;;  %v3572_v43 = vor.u32 %v3896_v42, %v3571_v41  ;;  %v88_v46 = vld [vmem:[%s5204_s0 + $0x88] sm:$0xff]  ;;  %v4276_v48 = vperm.slane %v127_v44, 1  ;;  %v4286_v57 = vperm.slane %v127_v44, 3  ;;  %v3877_v63 = vld [vmem:[#allocation2 + $0x24] sm:$0xf]  ;;  %v89_v16 = vld [vmem:[%s5204_s0 + $0x90] sm:$0xff] }
  0x28   :  { %3418 = vmatmul.msk.bf16.gmra.mxu0 %vm177_vm0, %v104_v53  ;;  %1226 = vmatpush.bf16.msrb.mxu1 %v3580_v22  ;;  %v111_v49 = vpack.c.bf16 %v88_v46, %v87_v45  ;;  %v3501_v0 = vld [vmem:[#allocation2 + $0x28] sm:$0xf0]  ;;  %v3499_v1 = vld [vmem:[#allocation2 + $0x20] sm:$0xf]  ;;  %v3878_v6 = vld [vmem:[#allocation2 + $0x24] sm:$0xf0] }
  0x29   :  { %3434 = vmatmul.msk.bf16.gmra.mxu1 %vm177_vm0, %v104_v53  ;;  %1138 = vmatpush.bf16.msrb.mxu0 %v3508_v36  ;;  %v3504_v5 = vor.u32 %v3877_v63, %v3501_v0  ;;  %v3565_v8 = vld [vmem:[#allocation2 + $0xa8] sm:$0xf0]  ;;  %v3500_v11 = vor.u32 %v3878_v6, %v3499_v1  ;;  %v90_v17 = vld [vmem:[%s5204_s0 + $0x98] sm:$0xff]  ;;  %v3563_v24 = vld [vmem:[#allocation2 + $0xa0] sm:$0xf] }
  0x2a   :  { %3450 = vmatmul.msk.bf16.gmra.mxu2 %vm177_vm0, %v104_v53  ;;  %3466 = vmatmul.msk.bf16.gmra.mxu3 %vm177_vm0, %v104_v53  ;;  %v112_v23 = vpack.c.bf16 %v90_v17, %v89_v16 }
  0x2b   :  { %1316 = vmatpush.bf16.msrb.mxu2 %v3512_v32  ;;  %1405 = vmatpush.bf16.msrb.mxu3 %v3576_v37 }
  0x2c   :  { %1227 = vmatpush.bf16.msrb.mxu1 %v3572_v43 }
  0x2d   :  { %1139 = vmatpush.bf16.msrb.mxu0 %v3500_v11 }
  0x2f   :  { %1317 = vmatpush.bf16.msrb.mxu2 %v3504_v5 }
  0x38   :  { %3419 = vmatmul.msk.bf16.gmra.mxu0 %vm177_vm0, %v105_v56 }
  0x39   :  { %3435 = vmatmul.msk.bf16.gmra.mxu1 %vm177_vm0, %v105_v56 }
  0x3a   :  { %3451 = vmatmul.msk.bf16.gmra.mxu2 %vm177_vm0, %v105_v56  ;;  %3467 = vmatmul.msk.bf16.gmra.mxu3 %vm177_vm0, %v105_v56  ;;  %v4283_v56 = vperm.slane %v127_v44, 2 }
  0x48   :  { %3420 = vmatmul.msk.bf16.gmra.mxu0 %vm177_vm0, %v106_v7 }
  0x49   :  { %3436 = vmatmul.msk.bf16.gmra.mxu1 %vm177_vm0, %v106_v7 }
  0x4a   :  { %3452 = vmatmul.msk.bf16.gmra.mxu2 %vm177_vm0, %v106_v7  ;;  %3468 = vmatmul.msk.bf16.gmra.mxu3 %vm177_vm0, %v106_v7  ;;  %v3893_v7 = vld [vmem:[#allocation2 + $0xa4] sm:$0xf] }
  0x4b   :  { %v3568_v12 = vor.u32 %v3893_v7, %v3565_v8 }
  0x4d   :  { %1406 = vmatpush.bf16.msrb.mxu3 %v3568_v12 }
  0x58   :  { %3421 = vmatmul.msk.bf16.gmra.mxu0 %vm177_vm0, %v107_v10 }
  0x59   :  { %3437 = vmatmul.msk.bf16.gmra.mxu1 %vm177_vm0, %v107_v10 }
  0x5a   :  { %3453 = vmatmul.msk.bf16.gmra.mxu2 %vm177_vm0, %v107_v10  ;;  %3469 = vmatmul.msk.bf16.gmra.mxu3 %vm177_vm0, %v107_v10 }
  0x68   :  { %3422 = vmatmul.msk.bf16.gmra.mxu0 %vm177_vm0, %v108_v25 }
  0x69   :  { %3438 = vmatmul.msk.bf16.gmra.mxu1 %vm177_vm0, %v108_v25 }
  0x6a   :  { %3454 = vmatmul.msk.bf16.gmra.mxu2 %vm177_vm0, %v108_v25  ;;  %3470 = vmatmul.msk.bf16.gmra.mxu3 %vm177_vm0, %v108_v25  ;;  %v3894_v25 = vld [vmem:[#allocation2 + $0xa4] sm:$0xf0] }
  0x6b   :  { %v3564_v31 = vor.u32 %v3894_v25, %v3563_v24 }
  0x6d   :  { %1228 = vmatpush.bf16.msrb.mxu1 %v3564_v31 }
  0x78   :  { %3423 = vmatmul.msk.bf16.gmra.mxu0 %vm177_vm0, %v109_v28 }
  0x79   :  { %3439 = vmatmul.msk.bf16.gmra.mxu1 %vm177_vm0, %v109_v28 }
  0x7a   :  { %3455 = vmatmul.msk.bf16.gmra.mxu2 %vm177_vm0, %v109_v28  ;;  %3471 = vmatmul.msk.bf16.gmra.mxu3 %vm177_vm0, %v109_v28 }
  0x88   :  { %3424 = vmatmul.msk.bf16.gmra.mxu0 %vm177_vm0, %v110_v40 }
  0x89   :  { %3440 = vmatmul.msk.bf16.gmra.mxu1 %vm177_vm0, %v110_v40 }
  0x8a   :  { %3456 = vmatmul.msk.bf16.gmra.mxu2 %vm177_vm0, %v110_v40  ;;  %3472 = vmatmul.msk.bf16.gmra.mxu3 %vm177_vm0, %v110_v40 }
  0x95   :  { %v235_v50 = vpop.f32.mrf.mxu0 }
  0x96   :  { %v236_v51 = vadd.f32 %v235_v50, %v4274_v47  ;;  %v324_v52 = vpop.f32.mrf.mxu1 }
  0x97   :  { %v325_v53 = vadd.f32 %v324_v52, %v4276_v48 }
  0x98   :  { %v582_v54 = vmax.f32 %v236_v51, 0.0  ;;  %3425 = vmatmul.msk.bf16.gmra.mxu0 %vm177_vm0, %v111_v49 }
  0x99   :  { %v583_v55 = vmax.f32 %v325_v53, 0.0  ;;  %3441 = vmatmul.msk.bf16.gmra.mxu1 %vm177_vm0, %v111_v49 }
  0x9a   :  { %3457 = vmatmul.msk.bf16.gmra.mxu2 %vm177_vm0, %v111_v49  ;;  %3473 = vmatmul.msk.bf16.gmra.mxu3 %vm177_vm0, %v111_v49 }
  0x9b   :  { %v710_v58 = vpack.c.bf16 %v583_v55, %v582_v54 }
  0x9d   :  { %v413_v59 = vpop.f32.mrf.mxu2  ;;  %v502_v61 = vpop.f32.mrf.mxu3  ;;  %v846_v20 = vunpack.c.l.b16 %v710_v58  ;;  %v847_v21 = vunpack.c.h.b16 %v710_v58 }
  0x9e   :  { %v414_v60 = vadd.f32 %v413_v59, %v4283_v56  ;;  %v237_v62 = vpop.f32.mrf.mxu0  ;;  %v503_v2 = vadd.f32 %v502_v61, %v4286_v57  ;;  %v326_v4 = vpop.f32.mrf.mxu1 }
  0x9f   :  { %v238_v3 = vadd.f32 %v237_v62, %v4274_v47  ;;  %v327_v10 = vadd.f32 %v326_v4, %v4276_v48 }
  0xa0   :  { %v584_v9 = vmax.f32 %v414_v60, 0.0  ;;  %v585_v13 = vmax.f32 %v503_v2, 0.0  ;;  %v91_v2 = vld [vmem:[%s5204_s0 + $0xa0] sm:$0xff] }
  0xa1   :  { %v586_v14 = vmax.f32 %v238_v3, 0.0  ;;  %v587_v15 = vmax.f32 %v327_v10, 0.0  ;;  %v92_v3 = vld [vmem:[%s5204_s0 + $0xa8] sm:$0xff] }
  0xa2   :  { %v711_v18 = vpack.c.bf16 %v585_v13, %v584_v9  ;;  %v113_v8 = vpack.c.bf16 %v92_v3, %v91_v2 }
  0xa3   :  { %v712_v19 = vpack.c.bf16 %v587_v15, %v586_v14 }
  0xa4   :  { %v1657_v44 = vunpack.c.l.b16 %v711_v18  ;;  %v1658_v45 = vunpack.c.h.b16 %v711_v18 }
  0xa5   :  { %v415_v22 = vpop.f32.mrf.mxu2  ;;  %v848_v26 = vunpack.c.l.b16 %v712_v19  ;;  %v849_v27 = vunpack.c.h.b16 %v712_v19  ;;  %v504_v29 = vpop.f32.mrf.mxu3 }
  0xa6   :  { %v416_v28 = vadd.f32 %v415_v22, %v4283_v56  ;;  %v240_v30 = vpop.f32.mrf.mxu0  ;;  %v505_v32 = vadd.f32 %v504_v29, %v4286_v57  ;;  %v329_v34 = vpop.f32.mrf.mxu1 }
  0xa7   :  { %v241_v33 = vadd.f32 %v240_v30, %v4274_v47  ;;  %v330_v36 = vadd.f32 %v329_v34, %v4276_v48  ;;  %v4302_v37 = vpack.c.b16 %v848_v26, %v846_v20  ;;  %v4304_v38 = vpack.c.b16 %v849_v27, %v847_v21 }
  0xa8   :  { %v588_v35 = vmax.f32 %v416_v28, 0.0  ;;  %v589_v39 = vmax.f32 %v505_v32, 0.0  ;;  %3426 = vmatmul.msk.bf16.gmra.mxu0 %vm177_vm0, %v112_v23 }
  0xa9   :  { %v590_v40 = vmax.f32 %v241_v33, 0.0  ;;  %v591_v41 = vmax.f32 %v330_v36, 0.0  ;;  %3442 = vmatmul.msk.bf16.gmra.mxu1 %vm177_vm0, %v112_v23  ;;  %v3493_v36 = vld [vmem:[#allocation2 + $0x18] sm:$0xf0] }
  0xaa   :  { %3458 = vmatmul.msk.bf16.gmra.mxu2 %vm177_vm0, %v112_v23  ;;  %v713_v42 = vpack.c.bf16 %v589_v39, %v588_v35  ;;  %3474 = vmatmul.msk.bf16.gmra.mxu3 %vm177_vm0, %v112_v23  ;;  %v3875_v35 = vld [vmem:[#allocation2 + $0x14] sm:$0xf]  ;;  %v3491_v39 = vld [vmem:[#allocation2 + $0x10] sm:$0xf] }
  0xab   :  { %v714_v43 = vpack.c.bf16 %v591_v41, %v590_v40 }
  0xac   :  { %v1659_v46 = vunpack.c.l.b16 %v713_v42  ;;  %v1660_v49 = vunpack.c.h.b16 %v713_v42 }
  0xad   :  { %v418_v50 = vpop.f32.mrf.mxu2  ;;  %v507_v52 = vpop.f32.mrf.mxu3  ;;  %v850_v6 = vunpack.c.l.b16 %v714_v43  ;;  %v851_v9 = vunpack.c.h.b16 %v714_v43  ;;  %v3496_v43 = vor.u32 %v3875_v35, %v3493_v36 }
  0xae   :  { %v419_v51 = vadd.f32 %v418_v50, %v4283_v56  ;;  %v242_v53 = vpop.f32.mrf.mxu0  ;;  %v4311_v54 = vpack.c.b16 %v1659_v46, %v1657_v44  ;;  %v4313_v55 = vpack.c.b16 %v1660_v49, %v1658_v45  ;;  %v508_v58 = vadd.f32 %v507_v52, %v4286_v57  ;;  %v331_v60 = vpop.f32.mrf.mxu1  ;;  %v3876_v44 = vld [vmem:[#allocation2 + $0x14] sm:$0xf0]  ;;  %v3891_v45 = vld [vmem:[#allocation2 + $0x94] sm:$0xf]  ;;  %v3557_v46 = vld [vmem:[#allocation2 + $0x98] sm:$0xf0] }
  0xaf   :  { %v243_v59 = vadd.f32 %v242_v53, %v4274_v47  ;;  %v332_v62 = vadd.f32 %v331_v60, %v4276_v48  ;;  %v3492_v52 = vor.u32 %v3876_v44, %v3491_v39  ;;  %v3560_v53 = vor.u32 %v3891_v45, %v3557_v46  ;;  %1318 = vmatpush.bf16.msrb.mxu2 %v3496_v43 }
  0xb0   :  { %v592_v61 = vmax.f32 %v419_v51, 0.0  ;;  %v593_v63 = vmax.f32 %v508_v58, 0.0 }
  0xb1   :  { %v594_v0 = vmax.f32 %v243_v59, 0.0  ;;  %v595_v1 = vmax.f32 %v332_v62, 0.0  ;;  %v93_v62 = vld [vmem:[%s5204_s0 + $0xb0] sm:$0xff]  ;;  %1140 = vmatpush.bf16.msrb.mxu0 %v3492_v52  ;;  %1407 = vmatpush.bf16.msrb.mxu3 %v3560_v53  ;;  %v96_v52 = vld [vmem:[%s5204_s0 + $0xc8] sm:$0xff] }
  0xb2   :  { %v715_v4 = vpack.c.bf16 %v593_v63, %v592_v61  ;;  %v94_v63 = vld [vmem:[%s5204_s0 + $0xb8] sm:$0xff] }
  0xb3   :  { %v716_v5 = vpack.c.bf16 %v595_v1, %v594_v0 }
  0xb4   :  { %v1661_v27 = vunpack.c.l.b16 %v715_v4  ;;  %v1662_v31 = vunpack.c.h.b16 %v715_v4 }
  0xb5   :  { %v420_v7 = vpop.f32.mrf.mxu2  ;;  %v509_v11 = vpop.f32.mrf.mxu3  ;;  %v852_v13 = vunpack.c.l.b16 %v716_v5  ;;  %v853_v14 = vunpack.c.h.b16 %v716_v5  ;;  %v114_v5 = vpack.c.bf16 %v94_v63, %v93_v62 }
  0xb6   :  { %v421_v10 = vadd.f32 %v420_v7, %v4283_v56  ;;  %v245_v12 = vpop.f32.mrf.mxu0  ;;  %v510_v15 = vadd.f32 %v509_v11, %v4286_v57  ;;  %v334_v17 = vpop.f32.mrf.mxu1  ;;  %v3892_v7 = vld [vmem:[#allocation2 + $0x94] sm:$0xf0] }
  0xb7   :  { %v246_v16 = vadd.f32 %v245_v12, %v4274_v47  ;;  %v335_v19 = vadd.f32 %v334_v17, %v4276_v48  ;;  %v4328_v20 = vpack.c.b16 %v852_v13, %v850_v6  ;;  %v4330_v21 = vpack.c.b16 %v853_v14, %v851_v9  ;;  %v3555_v6 = vld [vmem:[#allocation2 + $0x90] sm:$0xf] }
  0xb8   :  { %v596_v18 = vmax.f32 %v421_v10, 0.0  ;;  %v597_v22 = vmax.f32 %v510_v15, 0.0  ;;  %3427 = vmatmul.msk.bf16.gmra.mxu0 %vm177_vm0, %v113_v8  ;;  %v3556_v11 = vor.u32 %v3892_v7, %v3555_v6 }
  0xb9   :  { %v598_v23 = vmax.f32 %v246_v16, 0.0  ;;  %v599_v24 = vmax.f32 %v335_v19, 0.0  ;;  %3443 = vmatmul.msk.bf16.gmra.mxu1 %vm177_vm0, %v113_v8 }
  0xba   :  { %3459 = vmatmul.msk.bf16.gmra.mxu2 %vm177_vm0, %v113_v8  ;;  %v717_v25 = vpack.c.bf16 %v597_v22, %v596_v18  ;;  %3475 = vmatmul.msk.bf16.gmra.mxu3 %vm177_vm0, %v113_v8 }
  0xbb   :  { %v718_v26 = vpack.c.bf16 %v599_v24, %v598_v23  ;;  %1229 = vmatpush.bf16.msrb.mxu1 %v3556_v11 }
  0xbc   :  { %v1663_v29 = vunpack.c.l.b16 %v717_v25  ;;  %v1664_v30 = vunpack.c.h.b16 %v717_v25 }
  0xbd   :  { %v423_v28 = vpop.f32.mrf.mxu2  ;;  %v512_v33 = vpop.f32.mrf.mxu3  ;;  %v854_v2 = vunpack.c.l.b16 %v718_v26  ;;  %v855_v3 = vunpack.c.h.b16 %v718_v26 }
  0xbe   :  { %v424_v32 = vadd.f32 %v423_v28, %v4283_v56  ;;  %v247_v34 = vpop.f32.mrf.mxu0  ;;  %v513_v40 = vadd.f32 %v512_v33, %v4286_v57  ;;  %v336_v42 = vpop.f32.mrf.mxu1  ;;  %v4339_v49 = vpack.c.b16 %v1663_v29, %v1661_v27  ;;  %v4342_v60 = vpack.c.b16 %v1664_v30, %v1662_v31 }
  0xbf   :  { %v248_v41 = vadd.f32 %v247_v34, %v4274_v47  ;;  %v337_v51 = vadd.f32 %v336_v42, %v4276_v48 }
  0xc0   :  { %v600_v50 = vmax.f32 %v424_v32, 0.0  ;;  %v601_v58 = vmax.f32 %v513_v40, 0.0 }
  0xc1   :  { %v602_v59 = vmax.f32 %v248_v41, 0.0  ;;  %v603_v61 = vmax.f32 %v337_v51, 0.0  ;;  %v95_v51 = vld [vmem:[%s5204_s0 + $0xc0] sm:$0xff] }
  0xc2   :  { %v719_v0 = vpack.c.bf16 %v601_v58, %v600_v50  ;;  %v115_v62 = vpack.c.bf16 %v96_v52, %v95_v51 }
  0xc3   :  { %v720_v1 = vpack.c.bf16 %v603_v61, %v602_v59 }
  0xc4   :  { %v1665_v28 = vunpack.c.l.b16 %v719_v0  ;;  %v1666_v29 = vunpack.c.h.b16 %v719_v0 }
  0xc5   :  { %v425_v4 = vpop.f32.mrf.mxu2  ;;  %v514_v9 = vpop.f32.mrf.mxu3  ;;  %v856_v12 = vunpack.c.l.b16 %v720_v1  ;;  %v857_v13 = vunpack.c.h.b16 %v720_v1 }
  0xc6   :  { %v426_v8 = vadd.f32 %v425_v4, %v4283_v56  ;;  %v250_v10 = vpop.f32.mrf.mxu0  ;;  %v515_v14 = vadd.f32 %v514_v9, %v4286_v57  ;;  %v339_v16 = vpop.f32.mrf.mxu1 }
  0xc7   :  { %v251_v15 = vadd.f32 %v250_v10, %v4274_v47  ;;  %v340_v18 = vadd.f32 %v339_v16, %v4276_v48  ;;  %v4354_v19 = vpack.c.b16 %v856_v12, %v854_v2  ;;  %v4356_v22 = vpack.c.b16 %v857_v13, %v855_v3 }
  0xc8   :  { %v604_v17 = vmax.f32 %v426_v8, 0.0  ;;  %v605_v23 = vmax.f32 %v515_v14, 0.0  ;;  %3428 = vmatmul.msk.bf16.gmra.mxu0 %vm177_vm0, %v114_v5 }
  0xc9   :  { %v606_v24 = vmax.f32 %v251_v15, 0.0  ;;  %v607_v25 = vmax.f32 %v340_v18, 0.0  ;;  %3444 = vmatmul.msk.bf16.gmra.mxu1 %vm177_vm0, %v114_v5 }
  0xca   :  { %3460 = vmatmul.msk.bf16.gmra.mxu2 %vm177_vm0, %v114_v5  ;;  %v721_v26 = vpack.c.bf16 %v605_v23, %v604_v17  ;;  %3476 = vmatmul.msk.bf16.gmra.mxu3 %vm177_vm0, %v114_v5 }
  0xcb   :  { %v722_v27 = vpack.c.bf16 %v607_v25, %v606_v24 }
  0xcc   :  { %v1667_v31 = vunpack.c.l.b16 %v721_v26  ;;  %v1668_v32 = vunpack.c.h.b16 %v721_v26 }
  0xcd   :  { %v428_v30 = vpop.f32.mrf.mxu2  ;;  %v517_v34 = vpop.f32.mrf.mxu3  ;;  %v858_v59 = vunpack.c.l.b16 %v722_v27  ;;  %v859_v63 = vunpack.c.h.b16 %v722_v27 }
  0xce   :  { %v429_v33 = vadd.f32 %v428_v30, %v4283_v56  ;;  %v252_v35 = vpop.f32.mrf.mxu0  ;;  %v518_v36 = vadd.f32 %v517_v34, %v4286_v57  ;;  %v341_v40 = vpop.f32.mrf.mxu1  ;;  %v4365_v41 = vpack.c.b16 %v1667_v31, %v1665_v28  ;;  %v4367_v42 = vpack.c.b16 %v1668_v32, %v1666_v29  ;;  %v3873_v29 = vld [vmem:[#allocation2 + $0x4] sm:$0xf]  ;;  %v3485_v30 = vld [vmem:[#allocation2 + $0x8] sm:$0xf0]  ;;  %v3483_v31 = vld [vmem:[#allocation2] sm:$0xf] }
  0xcf   :  { %v253_v39 = vadd.f32 %v252_v35, %v4274_v47  ;;  %v342_v44 = vadd.f32 %v341_v40, %v4276_v48  ;;  %v3488_v35 = vor.u32 %v3873_v29, %v3485_v30  ;;  %v3549_v40 = vld [vmem:[#allocation2 + $0x88] sm:$0xf0] }
  0xd0   :  { %v608_v43 = vmax.f32 %v429_v33, 0.0  ;;  %v609_v45 = vmax.f32 %v518_v36, 0.0  ;;  %v3874_v36 = vld [vmem:[#allocation2 + $0x4] sm:$0xf0] }
  0xd1   :  { %v610_v46 = vmax.f32 %v253_v39, 0.0  ;;  %v611_v50 = vmax.f32 %v342_v44, 0.0  ;;  %v3889_v39 = vld [vmem:[#allocation2 + $0x84] sm:$0xf]  ;;  %1319 = vmatpush.bf16.msrb.mxu2 %v3488_v35 }
  0xd2   :  { %v723_v53 = vpack.c.bf16 %v609_v45, %v608_v43 }
  0xd3   :  { %v724_v58 = vpack.c.bf16 %v611_v50, %v610_v46  ;;  %v3484_v46 = vor.u32 %v3874_v36, %v3483_v31  ;;  %v3552_v50 = vor.u32 %v3889_v39, %v3549_v40 }
  0xd4   :  { %v1669_v17 = vunpack.c.l.b16 %v723_v53  ;;  %v1670_v25 = vunpack.c.h.b16 %v723_v53 }
  0xd5   :  { %v430_v61 = vpop.f32.mrf.mxu2  ;;  %v519_v1 = vpop.f32.mrf.mxu3  ;;  %v860_v3 = vunpack.c.l.b16 %v724_v58  ;;  %v861_v4 = vunpack.c.h.b16 %v724_v58  ;;  %1141 = vmatpush.bf16.msrb.mxu0 %v3484_v46  ;;  %1408 = vmatpush.bf16.msrb.mxu3 %v3552_v50 }
  0xd6   :  { %v431_v0 = vadd.f32 %v430_v61, %v4283_v56  ;;  %v255_v2 = vpop.f32.mrf.mxu0  ;;  %v520_v5 = vadd.f32 %v519_v1, %v4286_v57  ;;  %v344_v7 = vpop.f32.mrf.mxu1  ;;  %v98_v61 = vld [vmem:[%s5204_s0 + $0xd8] sm:$0xff] }
  0xd7   :  { %v256_v6 = vadd.f32 %v255_v2, %v4274_v47  ;;  %v345_v9 = vadd.f32 %v344_v7, %v4276_v48  ;;  %v4380_v10 = vpack.c.b16 %v860_v3, %v858_v59  ;;  %v4382_v11 = vpack.c.b16 %v861_v4, %v859_v63  ;;  %v97_v59 = vld [vmem:[%s5204_s0 + $0xd0] sm:$0xff]  ;;  %v3547_v4 = vld [vmem:[#allocation2 + $0x80] sm:$0xf] }
  0xd8   :  { %v612_v8 = vmax.f32 %v431_v0, 0.0  ;;  %v613_v12 = vmax.f32 %v520_v5, 0.0  ;;  %3429 = vmatmul.msk.bf16.gmra.mxu0 %vm177_vm0, %v115_v62  ;;  %v116_v3 = vpack.c.bf16 %v98_v61, %v97_v59  ;;  %v3890_v5 = vld [vmem:[#allocation2 + $0x84] sm:$0xf0] }
  0xd9   :  { %v614_v13 = vmax.f32 %v256_v6, 0.0  ;;  %v615_v14 = vmax.f32 %v345_v9, 0.0  ;;  %3445 = vmatmul.msk.bf16.gmra.mxu1 %vm177_vm0, %v115_v62  ;;  %v3548_v9 = vor.u32 %v3890_v5, %v3547_v4 }
  0xda   :  { %3461 = vmatmul.msk.bf16.gmra.mxu2 %vm177_vm0, %v115_v62  ;;  %v725_v15 = vpack.c.bf16 %v613_v12, %v612_v8  ;;  %3477 = vmatmul.msk.bf16.gmra.mxu3 %vm177_vm0, %v115_v62 }
  0xdb   :  { %v726_v16 = vpack.c.bf16 %v615_v14, %v614_v13  ;;  %1230 = vmatpush.bf16.msrb.mxu1 %v3548_v9 }
  0xdc   :  { %v1671_v23 = vunpack.c.l.b16 %v725_v15  ;;  %v1672_v24 = vunpack.c.h.b16 %v725_v15 }
  0xdd   :  { %v433_v18 = vpop.f32.mrf.mxu2  ;;  %v522_v27 = vpop.f32.mrf.mxu3  ;;  %v862_v0 = vunpack.c.l.b16 %v726_v16  ;;  %v863_v1 = vunpack.c.h.b16 %v726_v16 }
  0xde   :  { %v434_v26 = vadd.f32 %v433_v18, %v4283_v56  ;;  %v257_v28 = vpop.f32.mrf.mxu0  ;;  %v523_v32 = vadd.f32 %v522_v27, %v4286_v57  ;;  %v346_v34 = vpop.f32.mrf.mxu1  ;;  %v4391_v43 = vpack.c.b16 %v1671_v23, %v1669_v17  ;;  %v4394_v53 = vpack.c.b16 %v1672_v24, %v1670_v25 }
  0xdf   :  { %v258_v33 = vadd.f32 %v257_v28, %v4274_v47  ;;  %v347_v45 = vadd.f32 %v346_v34, %v4276_v48 }
  0xe0   :  { %v616_v44 = vmax.f32 %v434_v26, 0.0  ;;  %v617_v51 = vmax.f32 %v523_v32, 0.0 }
  0xe1   :  { %v618_v52 = vmax.f32 %v258_v33, 0.0  ;;  %v619_v58 = vmax.f32 %v347_v45, 0.0 }
  0xe2   :  { %v727_v62 = vpack.c.bf16 %v617_v51, %v616_v44 }
  0xe3   :  { %v728_v63 = vpack.c.bf16 %v619_v58, %v618_v52 }
  0xe4   :  { %v1673_v30 = vunpack.c.l.b16 %v727_v62  ;;  %v1674_v31 = vunpack.c.h.b16 %v727_v62  ;;  %v99_v62 = vld [vmem:[%s5204_s0 + $0xe0] sm:$0xff] }
  0xe5   :  { %v435_v2 = vpop.f32.mrf.mxu2  ;;  %v524_v7 = vpop.f32.mrf.mxu3  ;;  %v864_v12 = vunpack.c.l.b16 %v728_v63  ;;  %v865_v13 = vunpack.c.h.b16 %v728_v63  ;;  %v100_v63 = vld [vmem:[%s5204_s0 + $0xe8] sm:$0xff] }
  0xe6   :  { %v436_v6 = vadd.f32 %v435_v2, %v4283_v56  ;;  %v260_v8 = vpop.f32.mrf.mxu0  ;;  %v525_v14 = vadd.f32 %v524_v7, %v4286_v57  ;;  %v349_v17 = vpop.f32.mrf.mxu1  ;;  %v117_v4 = vpack.c.bf16 %v100_v63, %v99_v62  ;;  %v3920_v62 = vld [vmem:[#allocation2 + $0x174] sm:$0xf0]  ;;  %v3935_v63 = vld [vmem:[#allocation2 + $0x1f4] sm:$0xf] }
  0xe7   :  { %v261_v15 = vadd.f32 %v260_v8, %v4274_v47  ;;  %v350_v23 = vadd.f32 %v349_v17, %v4276_v48  ;;  %v4406_v16 = vpack.c.b16 %v864_v12, %v862_v0  ;;  %v4408_v24 = vpack.c.b16 %v865_v13, %v863_v1 }
  0xe8   :  { %v620_v18 = vmax.f32 %v436_v6, 0.0  ;;  %v621_v25 = vmax.f32 %v525_v14, 0.0  ;;  %3430 = vmatmul.msk.bf16.gmra.mxu0 %vm177_vm0, %v116_v3 }
  0xe9   :  { %v622_v26 = vmax.f32 %v261_v15, 0.0  ;;  %v623_v27 = vmax.f32 %v350_v23, 0.0  ;;  %3446 = vmatmul.msk.bf16.gmra.mxu1 %vm177_vm0, %v116_v3 }
  0xea   :  { %3462 = vmatmul.msk.bf16.gmra.mxu2 %vm177_vm0, %v116_v3  ;;  %v729_v28 = vpack.c.bf16 %v621_v25, %v620_v18  ;;  %3478 = vmatmul.msk.bf16.gmra.mxu3 %vm177_vm0, %v116_v3 }
  0xeb   :  { %v730_v29 = vpack.c.bf16 %v623_v27, %v622_v26 }
  0xec   :  { %v1675_v33 = vunpack.c.l.b16 %v729_v28  ;;  %v1676_v34 = vunpack.c.h.b16 %v729_v28 }
  0xed   :  { %v438_v32 = vpop.f32.mrf.mxu2  ;;  %v527_v36 = vpop.f32.mrf.mxu3  ;;  %v866_v2 = vunpack.c.l.b16 %v730_v29  ;;  %v867_v5 = vunpack.c.h.b16 %v730_v29 }
  0xee   :  { %v439_v35 = vadd.f32 %v438_v32, %v4283_v56  ;;  %v262_v39 = vpop.f32.mrf.mxu0  ;;  %v528_v40 = vadd.f32 %v527_v36, %v4286_v57  ;;  %v351_v45 = vpop.f32.mrf.mxu1  ;;  %v4417_v46 = vpack.c.b16 %v1675_v33, %v1673_v30  ;;  %v4419_v50 = vpack.c.b16 %v1676_v34, %v1674_v31 }
  0xef   :  { %v263_v44 = vadd.f32 %v262_v39, %v4274_v47  ;;  %v352_v52 = vadd.f32 %v351_v45, %v4276_v48  ;;  %v3669_v45 = vld [vmem:[#allocation2 + $0x178] sm:$0xf0] }
  0xf0   :  { %v624_v51 = vmax.f32 %v439_v35, 0.0  ;;  %v625_v58 = vmax.f32 %v528_v40, 0.0 }
  0xf1   :  { %v626_v59 = vmax.f32 %v263_v44, 0.0  ;;  %v627_v61 = vmax.f32 %v352_v52, 0.0  ;;  %v3919_v44 = vld [vmem:[#allocation2 + $0x174] sm:$0xf] }
  0xf2   :  { %v731_v0 = vpack.c.bf16 %v625_v58, %v624_v51  ;;  %v3667_v51 = vld [vmem:[#allocation2 + $0x170] sm:$0xf] }
  0xf3   :  { %v732_v1 = vpack.c.bf16 %v627_v61, %v626_v59  ;;  %v3672_v61 = vor.u32 %v3919_v44, %v3669_v45 }
  0xf4   :  { %v1677_v31 = vunpack.c.l.b16 %v731_v0  ;;  %v1678_v35 = vunpack.c.h.b16 %v731_v0 }
  0xf5   :  { %v440_v3 = vpop.f32.mrf.mxu2  ;;  %v529_v7 = vpop.f32.mrf.mxu3  ;;  %v868_v9 = vunpack.c.l.b16 %v732_v1  ;;  %v869_v12 = vunpack.c.h.b16 %v732_v1  ;;  %v3733_v1 = vld [vmem:[#allocation2 + $0x1f8] sm:$0xf0]  ;;  %2123 = vmatpush.bf16.msra.mxu2 %v3672_v61 }
  0xf6   :  { %v441_v6 = vadd.f32 %v440_v3, %v4283_v56  ;;  %v265_v8 = vpop.f32.mrf.mxu0  ;;  %v530_v13 = vadd.f32 %v529_v7, %v4286_v57  ;;  %v354_v15 = vpop.f32.mrf.mxu1 }
  0xf7   :  { %v266_v14 = vadd.f32 %v265_v8, %v4274_v47  ;;  %v355_v18 = vadd.f32 %v354_v15, %v4276_v48  ;;  %v4432_v23 = vpack.c.b16 %v868_v9, %v866_v2  ;;  %v4434_v25 = vpack.c.b16 %v869_v12, %v867_v5  ;;  %v101_v12 = vld [vmem:[%s5204_s0 + $0xf0] sm:$0xff] }
  0xf8   :  { %v628_v17 = vmax.f32 %v441_v6, 0.0  ;;  %v629_v26 = vmax.f32 %v530_v13, 0.0  ;;  %3431 = vmatmul.msk.bf16.gmra.mxu0 %vm177_vm0, %v117_v4  ;;  %v3736_v5 = vor.u32 %v3935_v63, %v3733_v1  ;;  %v102_v13 = vld [vmem:[%s5204_s0 + $0xf8] sm:$0xff] }
  0xf9   :  { %v630_v27 = vmax.f32 %v266_v14, 0.0  ;;  %v631_v28 = vmax.f32 %v355_v18, 0.0  ;;  %3447 = vmatmul.msk.bf16.gmra.mxu1 %vm177_vm0, %v117_v4 }
  0xfa   :  { %3463 = vmatmul.msk.bf16.gmra.mxu2 %vm177_vm0, %v117_v4  ;;  %v733_v29 = vpack.c.bf16 %v629_v26, %v628_v17  ;;  %3479 = vmatmul.msk.bf16.gmra.mxu3 %vm177_vm0, %v117_v4  ;;  %v3668_v4 = vor.u32 %v3920_v62, %v3667_v51 }
  0xfb   :  { %v734_v30 = vpack.c.bf16 %v631_v28, %v630_v27  ;;  %2212 = vmatpush.bf16.msra.mxu3 %v3736_v5  ;;  %v118_v27 = vpack.c.bf16 %v102_v13, %v101_v12  ;;  %v3731_v28 = vld [vmem:[#allocation2 + $0x1f0] sm:$0xf] }
  0xfc   :  { %v1679_v33 = vunpack.c.l.b16 %v733_v29  ;;  %v1680_v34 = vunpack.c.h.b16 %v733_v29  ;;  %1945 = vmatpush.bf16.msra.mxu0 %v3668_v4  ;;  %v3936_v29 = vld [vmem:[#allocation2 + $0x1f4] sm:$0xf0] }
  0xfd   :  { %v443_v32 = vpop.f32.mrf.mxu2  ;;  %v532_v39 = vpop.f32.mrf.mxu3  ;;  %v870_v17 = vunpack.c.l.b16 %v734_v30  ;;  %v871_v18 = vunpack.c.h.b16 %v734_v30 }
  0xfe   :  { %v444_v36 = vadd.f32 %v443_v32, %v4283_v56  ;;  %v267_v40 = vpop.f32.mrf.mxu0  ;;  %v533_v52 = vadd.f32 %v532_v39, %v4286_v57  ;;  %v356_v59 = vpop.f32.mrf.mxu1  ;;  %v4443_v2 = vpack.c.b16 %v1679_v33, %v1677_v31  ;;  %v4446_v8 = vpack.c.b16 %v1680_v34, %v1678_v35 }
  0xff   :  { %v268_v58 = vadd.f32 %v267_v40, %v4274_v47  ;;  %v357_v0 = vadd.f32 %v356_v59, %v4276_v48  ;;  %v3732_v34 = vor.u32 %v3936_v29, %v3731_v28 }
 0x100   :  { %v632_v3 = vmax.f32 %v444_v36, 0.0  ;;  %v633_v6 = vmax.f32 %v533_v52, 0.0 }
 0x101   :  { %v634_v7 = vmax.f32 %v268_v58, 0.0  ;;  %v635_v9 = vmax.f32 %v357_v0, 0.0  ;;  %2034 = vmatpush.bf16.msra.mxu1 %v3732_v34 }
 0x102   :  { %v735_v14 = vpack.c.bf16 %v633_v6, %v632_v3 }
 0x103   :  { %v736_v15 = vpack.c.bf16 %v635_v9, %v634_v7 }
 0x104   :  { %v1681_v1 = vunpack.c.l.b16 %v735_v14  ;;  %v1682_v3 = vunpack.c.h.b16 %v735_v14 }
 0x105   :  { %v445_v26 = vpop.f32.mrf.mxu2  ;;  %v534_v32 = vpop.f32.mrf.mxu3  ;;  %v872_v35 = vunpack.c.l.b16 %v736_v15  ;;  %v873_v36 = vunpack.c.h.b16 %v736_v15 }
 0x106   :  { %v446_v31 = vadd.f32 %v445_v26, %v4283_v56  ;;  %v270_v33 = vpop.f32.mrf.mxu0  ;;  %v535_v39 = vadd.f32 %v534_v32, %v4286_v57  ;;  %v359_v44 = vpop.f32.mrf.mxu1 }
 0x107   :  { %v271_v40 = vadd.f32 %v270_v33, %v4274_v47  ;;  %v360_v51 = vadd.f32 %v359_v44, %v4276_v48  ;;  %v4458_v30 = vpack.c.b16 %v872_v35, %v870_v17  ;;  %v4460_v52 = vpack.c.b16 %v873_v36, %v871_v18 }
 0x108   :  { %v636_v45 = vmax.f32 %v446_v31, 0.0  ;;  %v637_v58 = vmax.f32 %v535_v39, 0.0  ;;  %3432 = vmatmul.msk.bf16.gmra.mxu0 %vm177_vm0, %v118_v27 }
 0x109   :  { %v638_v59 = vmax.f32 %v271_v40, 0.0  ;;  %v639_v61 = vmax.f32 %v360_v51, 0.0  ;;  %3448 = vmatmul.msk.bf16.gmra.mxu1 %vm177_vm0, %v118_v27 }
 0x10a   :  { %3464 = vmatmul.msk.bf16.gmra.mxu2 %vm177_vm0, %v118_v27  ;;  %v737_v62 = vpack.c.bf16 %v637_v58, %v636_v45  ;;  %3480 = vmatmul.msk.bf16.gmra.mxu3 %vm177_vm0, %v118_v27 }
 0x10b   :  { %v738_v63 = vpack.c.bf16 %v639_v61, %v638_v59 }
 0x10c   :  { %v1683_v4 = vunpack.c.l.b16 %v737_v62  ;;  %v1684_v5 = vunpack.c.h.b16 %v737_v62 }
 0x10d   :  { %v448_v0 = vpop.f32.mrf.mxu2  ;;  %v537_v7 = vpop.f32.mrf.mxu3  ;;  %v874_v33 = vunpack.c.l.b16 %v738_v63  ;;  %v875_v35 = vunpack.c.h.b16 %v738_v63 }
 0x10e   :  { %v449_v6 = vadd.f32 %v448_v0, %v4283_v56  ;;  %v272_v9 = vpop.f32.mrf.mxu0  ;;  %v538_v12 = vadd.f32 %v537_v7, %v4286_v57  ;;  %v361_v15 = vpop.f32.mrf.mxu1  ;;  %v4469_v17 = vpack.c.b16 %v1683_v4, %v1681_v1  ;;  %v4471_v18 = vpack.c.b16 %v1684_v5, %v1682_v3 }
 0x10f   :  { %v273_v13 = vadd.f32 %v272_v9, %v4274_v47  ;;  %v362_v27 = vadd.f32 %v361_v15, %v4276_v48 }
 0x110   :  { %v640_v26 = vmax.f32 %v449_v6, 0.0  ;;  %v641_v14 = vmax.f32 %v538_v12, 0.0 }
 0x111   :  { %v642_v28 = vmax.f32 %v273_v13, 0.0  ;;  %v643_v29 = vmax.f32 %v362_v27, 0.0 }
 0x112   :  { %v739_v31 = vpack.c.bf16 %v641_v14, %v640_v26 }
 0x113   :  { %v740_v32 = vpack.c.bf16 %v643_v29, %v642_v28  ;;  %v3917_v28 = vld [vmem:[#allocation2 + $0x164] sm:$0xf]  ;;  %v3661_v29 = vld [vmem:[#allocation2 + $0x168] sm:$0xf0] }
 0x114   :  { %v1685_v7 = vunpack.c.l.b16 %v739_v31  ;;  %v1686_v15 = vunpack.c.h.b16 %v739_v31 }
 0x115   :  { %v450_v34 = vpop.f32.mrf.mxu2  ;;  %v539_v39 = vpop.f32.mrf.mxu3  ;;  %v876_v44 = vunpack.c.l.b16 %v740_v32  ;;  %v877_v45 = vunpack.c.h.b16 %v740_v32  ;;  %v3659_v32 = vld [vmem:[#allocation2 + $0x160] sm:$0xf] }
 0x116   :  { %v451_v36 = vadd.f32 %v450_v34, %v4283_v56  ;;  %v275_v40 = vpop.f32.mrf.mxu0  ;;  %v540_v51 = vadd.f32 %v539_v39, %v4286_v57  ;;  %v364_v59 = vpop.f32.mrf.mxu1  ;;  %v3725_v39 = vld [vmem:[#allocation2 + $0x1e8] sm:$0xf0] }
 0x117   :  { %v276_v58 = vadd.f32 %v275_v40, %v4274_v47  ;;  %v365_v62 = vadd.f32 %v364_v59, %v4276_v48  ;;  %v4478_v1 = vpack.c.b16 %v876_v44, %v874_v33  ;;  %v4480_v3 = vpack.c.b16 %v877_v45, %v875_v35 }
 0x118   :  { %v644_v61 = vmax.f32 %v451_v36, 0.0  ;;  %v645_v0 = vmax.f32 %v540_v51, 0.0  ;;  %1142 = vmatmul.bf16.vlgmr.msrb.gmra.mxu0 %v4302_v37  ;;  %v3664_v35 = vor.u32 %v3917_v28, %v3661_v29  ;;  %v3933_v36 = vld [vmem:[#allocation2 + $0x1e4] sm:$0xf] }
 0x119   :  { %v646_v63 = vmax.f32 %v276_v58, 0.0  ;;  %v647_v4 = vmax.f32 %v365_v62, 0.0  ;;  %1231 = vmatmul.bf16.vlgmr.msrb.gmra.mxu1 %v4304_v38  ;;  %v3728_v51 = vor.u32 %v3933_v36, %v3725_v39 }
 0x11a   :  { %1320 = vmatmul.bf16.vlgmr.msrb.gmra.mxu2 %v4302_v37  ;;  %v741_v5 = vpack.c.bf16 %v645_v0, %v644_v61  ;;  %1409 = vmatmul.bf16.vlgmr.msrb.gmra.mxu3 %v4304_v38  ;;  %v3918_v38 = vld [vmem:[#allocation2 + $0x164] sm:$0xf0] }
 0x11b   :  { %v742_v6 = vpack.c.bf16 %v647_v4, %v646_v63  ;;  %v3660_v45 = vor.u32 %v3918_v38, %v3659_v32  ;;  %2124 = vmatpush.bf16.msra.mxu2 %v3664_v35  ;;  %2213 = vmatpush.bf16.msra.mxu3 %v3728_v51 }
 0x11c   :  { %v1687_v12 = vunpack.c.l.b16 %v741_v5  ;;  %v1688_v13 = vunpack.c.h.b16 %v741_v5 }
 0x11d   :  { %v453_v9 = vpop.f32.mrf.mxu2  ;;  %v542_v27 = vpop.f32.mrf.mxu3  ;;  %1946 = vmatpush.bf16.msra.mxu0 %v3660_v45  ;;  %v878_v4 = vunpack.c.l.b16 %v742_v6  ;;  %v879_v5 = vunpack.c.h.b16 %v742_v6 }
 0x11e   :  { %v454_v26 = vadd.f32 %v453_v9, %v4283_v56  ;;  %v277_v14 = vpop.f32.mrf.mxu0  ;;  %v543_v33 = vadd.f32 %v542_v27, %v4286_v57  ;;  %v366_v34 = vpop.f32.mrf.mxu1  ;;  %v4489_v40 = vpack.c.b16 %v1687_v12, %v1685_v7  ;;  %v4492_v61 = vpack.c.b16 %v1688_v13, %v1686_v15  ;;  %v3723_v7 = vld [vmem:[#allocation2 + $0x1e0] sm:$0xf]  ;;  %v3934_v12 = vld [vmem:[#allocation2 + $0x1e4] sm:$0xf0] }
 0x11f   :  { %v278_v37 = vadd.f32 %v277_v14, %v4274_v47  ;;  %v367_v31 = vadd.f32 %v366_v34, %v4276_v48  ;;  %v3724_v28 = vor.u32 %v3934_v12, %v3723_v7 }
 0x120   :  { %v648_v44 = vmax.f32 %v454_v26, 0.0  ;;  %v649_v58 = vmax.f32 %v543_v33, 0.0 }
 0x121   :  { %v650_v59 = vmax.f32 %v278_v37, 0.0  ;;  %v651_v62 = vmax.f32 %v367_v31, 0.0  ;;  %2035 = vmatpush.bf16.msra.mxu1 %v3724_v28 }
 0x122   :  { %v743_v0 = vpack.c.bf16 %v649_v58, %v648_v44 }
 0x123   :  { %v744_v63 = vpack.c.bf16 %v651_v62, %v650_v59 }
 0x124   :  { %v1689_v45 = vunpack.c.l.b16 %v743_v0  ;;  %v1690_v51 = vunpack.c.h.b16 %v743_v0 }
 0x125   :  { %v455_v9 = vpop.f32.mrf.mxu2  ;;  %v544_v27 = vpop.f32.mrf.mxu3  ;;  %v880_v29 = vunpack.c.l.b16 %v744_v63  ;;  %v881_v32 = vunpack.c.h.b16 %v744_v63 }
 0x126   :  { %v456_v26 = vadd.f32 %v455_v9, %v4283_v56  ;;  %v280_v14 = vpop.f32.mrf.mxu0  ;;  %v545_v13 = vadd.f32 %v544_v27, %v4286_v57  ;;  %v369_v33 = vpop.f32.mrf.mxu1 }
 0x127   :  { %v281_v15 = vadd.f32 %v280_v14, %v4274_v47  ;;  %v370_v34 = vadd.f32 %v369_v33, %v4276_v48  ;;  %v4498_v6 = vpack.c.b16 %v880_v29, %v878_v4  ;;  %v4500_v35 = vpack.c.b16 %v881_v32, %v879_v5 }
 0x128   :  { %v652_v37 = vmax.f32 %v456_v26, 0.0  ;;  %v653_v38 = vmax.f32 %v545_v13, 0.0  ;;  %1147 = vmatmul.bf16.gmra.mxu0 %v4328_v20 }
 0x129   :  { %v654_v36 = vmax.f32 %v281_v15, 0.0  ;;  %v655_v39 = vmax.f32 %v370_v34, 0.0  ;;  %1236 = vmatmul.bf16.gmra.mxu1 %v4330_v21 }
 0x12a   :  { %1325 = vmatmul.bf16.gmra.mxu2 %v4328_v20  ;;  %v745_v44 = vpack.c.bf16 %v653_v38, %v652_v37  ;;  %1414 = vmatmul.bf16.gmra.mxu3 %v4330_v21 }
 0x12b   :  { %v746_v31 = vpack.c.bf16 %v655_v39, %v654_v36 }
 0x12c   :  { %v1691_v59 = vunpack.c.l.b16 %v745_v44  ;;  %v1692_v62 = vunpack.c.h.b16 %v745_v44 }
 0x12d   :  { %v458_v58 = vpop.f32.mrf.mxu2  ;;  %v547_v4 = vpop.f32.mrf.mxu3  ;;  %v882_v13 = vunpack.c.l.b16 %v746_v31  ;;  %v883_v33 = vunpack.c.h.b16 %v746_v31 }
 0x12e   :  { %v459_v63 = vadd.f32 %v458_v58, %v4283_v56  ;;  %v282_v5 = vpop.f32.mrf.mxu0  ;;  %v548_v9 = vadd.f32 %v547_v4, %v4286_v57  ;;  %v371_v12 = vpop.f32.mrf.mxu1  ;;  %v4509_v26 = vpack.c.b16 %v1691_v59, %v1689_v45  ;;  %v4511_v20 = vpack.c.b16 %v1692_v62, %v1690_v51 }
 0x12f   :  { %v283_v7 = vadd.f32 %v282_v5, %v4274_v47  ;;  %v372_v27 = vadd.f32 %v371_v12, %v4276_v48 }
 0x130   :  { %v656_v21 = vmax.f32 %v459_v63, 0.0  ;;  %v657_v0 = vmax.f32 %v548_v9, 0.0 }
 0x131   :  { %v658_v14 = vmax.f32 %v283_v7, 0.0  ;;  %v659_v28 = vmax.f32 %v372_v27, 0.0 }
 0x132   :  { %v747_v29 = vpack.c.bf16 %v657_v0, %v656_v21 }
 0x133   :  { %v748_v32 = vpack.c.bf16 %v659_v28, %v658_v14 }
 0x134   :  { %v1693_v12 = vunpack.c.l.b16 %v747_v29  ;;  %v1694_v14 = vunpack.c.h.b16 %v747_v29 }
 0x135   :  { %v460_v15 = vpop.f32.mrf.mxu2  ;;  %v549_v34 = vpop.f32.mrf.mxu3  ;;  %v884_v36 = vunpack.c.l.b16 %v748_v32  ;;  %v885_v39 = vunpack.c.h.b16 %v748_v32 }
 0x136   :  { %v461_v37 = vadd.f32 %v460_v15, %v4283_v56  ;;  %v285_v38 = vpop.f32.mrf.mxu0  ;;  %v550_v44 = vadd.f32 %v549_v34, %v4286_v57  ;;  %v374_v51 = vpop.f32.mrf.mxu1  ;;  %v3915_v15 = vld [vmem:[#allocation2 + $0x154] sm:$0xf] }
 0x137   :  { %v286_v45 = vadd.f32 %v285_v38, %v4274_v47  ;;  %v375_v59 = vadd.f32 %v374_v51, %v4276_v48  ;;  %v4518_v62 = vpack.c.b16 %v884_v36, %v882_v13  ;;  %v4520_v63 = vpack.c.b16 %v885_v39, %v883_v33  ;;  %v3653_v33 = vld [vmem:[#allocation2 + $0x158] sm:$0xf0]  ;;  %v3931_v39 = vld [vmem:[#allocation2 + $0x1d4] sm:$0xf] }
 0x138   :  { %v660_v58 = vmax.f32 %v461_v37, 0.0  ;;  %v661_v4 = vmax.f32 %v550_v44, 0.0  ;;  %1152 = vmatmul.bf16.gmra.mxu0 %v4354_v19  ;;  %v3651_v37 = vld [vmem:[#allocation2 + $0x150] sm:$0xf]  ;;  %v3656_v36 = vor.u32 %v3915_v15, %v3653_v33  ;;  %v3717_v44 = vld [vmem:[#allocation2 + $0x1d8] sm:$0xf0] }
 0x139   :  { %v662_v31 = vmax.f32 %v286_v45, 0.0  ;;  %v663_v5 = vmax.f32 %v375_v59, 0.0  ;;  %1241 = vmatmul.bf16.gmra.mxu1 %v4356_v22  ;;  %v3720_v59 = vor.u32 %v3931_v39, %v3717_v44 }
 0x13a   :  { %1330 = vmatmul.bf16.gmra.mxu2 %v4354_v19  ;;  %v749_v9 = vpack.c.bf16 %v661_v4, %v660_v58  ;;  %1419 = vmatmul.bf16.gmra.mxu3 %v4356_v22  ;;  %v3916_v22 = vld [vmem:[#allocation2 + $0x154] sm:$0xf0] }
 0x13b   :  { %v750_v7 = vpack.c.bf16 %v663_v5, %v662_v31  ;;  %v3652_v58 = vor.u32 %v3916_v22, %v3651_v37  ;;  %2125 = vmatpush.bf16.msra.mxu2 %v3656_v36  ;;  %2214 = vmatpush.bf16.msra.mxu3 %v3720_v59 }
 0x13c   :  { %v1695_v27 = vunpack.c.l.b16 %v749_v9  ;;  %v1696_v0 = vunpack.c.h.b16 %v749_v9 }
 0x13d   :  { %v463_v21 = vpop.f32.mrf.mxu2  ;;  %v552_v32 = vpop.f32.mrf.mxu3  ;;  %1947 = vmatpush.bf16.msra.mxu0 %v3652_v58  ;;  %v887_v15 = vunpack.c.h.b16 %v750_v7 }
 0x13e   :  { %v464_v28 = vadd.f32 %v463_v21, %v4283_v56  ;;  %v287_v13 = vpop.f32.mrf.mxu0  ;;  %v553_v34 = vadd.f32 %v552_v32, %v4286_v57  ;;  %v376_v38 = vpop.f32.mrf.mxu1  ;;  %v4529_v45 = vpack.c.b16 %v1695_v27, %v1693_v12  ;;  %v4532_v5 = vpack.c.b16 %v1696_v0, %v1694_v14  ;;  %v3715_v12 = vld [vmem:[#allocation2 + $0x1d0] sm:$0xf]  ;;  %v3932_v27 = vld [vmem:[#allocation2 + $0x1d4] sm:$0xf0] }
 0x13f   :  { %v288_v19 = vadd.f32 %v287_v13, %v4274_v47  ;;  %v377_v29 = vadd.f32 %v376_v38, %v4276_v48  ;;  %v886_v13 = vunpack.c.l.b16 %v750_v7  ;;  %v3716_v22 = vor.u32 %v3932_v27, %v3715_v12 }
 0x140   :  { %5220 = vst [vmem:[#allocation12_spill] sm:$0xff] %v4529_v45  ;;  %v664_v51 = vmax.f32 %v464_v28, 0.0  ;;  %v665_v4 = vmax.f32 %v553_v34, 0.0 }
 0x141   :  { %v666_v31 = vmax.f32 %v288_v19, 0.0  ;;  %5221 = vst [vmem:[#allocation13_spill] sm:$0xff] %v4532_v5  ;;  %v667_v9 = vmax.f32 %v377_v29, 0.0  ;;  %2036 = vmatpush.bf16.msra.mxu1 %v3716_v22 }
 0x142   :  { %v751_v21 = vpack.c.bf16 %v665_v4, %v664_v51 }
 0x143   :  { %v752_v32 = vpack.c.bf16 %v667_v9, %v666_v31 }
 0x144   :  { %v1697_v9 = vunpack.c.l.b16 %v751_v21 }
 0x145   :  { %v465_v33 = vpop.f32.mrf.mxu2  ;;  %v554_v38 = vpop.f32.mrf.mxu3  ;;  %v888_v34 = vunpack.c.l.b16 %v752_v32  ;;  %v889_v19 = vunpack.c.h.b16 %v752_v32  ;;  %v1698_v32 = vunpack.c.h.b16 %v751_v21 }
 0x146   :  { %v466_v28 = vadd.f32 %v465_v33, %v4283_v56  ;;  %v290_v37 = vpop.f32.mrf.mxu0  ;;  %v555_v0 = vadd.f32 %v554_v38, %v4286_v57  ;;  %v379_v36 = vpop.f32.mrf.mxu1 }
 0x147   :  { %v291_v14 = vadd.f32 %v290_v37, %v4274_v47  ;;  %v380_v44 = vadd.f32 %v379_v36, %v4276_v48  ;;  %v4538_v7 = vpack.c.b16 %v888_v34, %v886_v13  ;;  %v4540_v51 = vpack.c.b16 %v889_v19, %v887_v15 }
 0x148   :  { %v668_v39 = vmax.f32 %v466_v28, 0.0  ;;  %v669_v29 = vmax.f32 %v555_v0, 0.0  ;;  %1157 = vmatmul.bf16.gmra.mxu0 %v4380_v10 }
 0x149   :  { %v670_v58 = vmax.f32 %v291_v14, 0.0  ;;  %v671_v59 = vmax.f32 %v380_v44, 0.0  ;;  %1246 = vmatmul.bf16.gmra.mxu1 %v4382_v11 }
 0x14a   :  { %1335 = vmatmul.bf16.gmra.mxu2 %v4380_v10  ;;  %v753_v4 = vpack.c.bf16 %v669_v29, %v668_v39  ;;  %1424 = vmatmul.bf16.gmra.mxu3 %v4382_v11 }
 0x14b   :  { %v754_v31 = vpack.c.bf16 %v671_v59, %v670_v58 }
 0x14c   :  { %v1699_v13 = vunpack.c.l.b16 %v753_v4  ;;  %v1700_v12 = vunpack.c.h.b16 %v753_v4 }
 0x14d   :  { %v468_v33 = vpop.f32.mrf.mxu2  ;;  %v557_v27 = vpop.f32.mrf.mxu3  ;;  %v890_v44 = vunpack.c.l.b16 %v754_v31  ;;  %v891_v58 = vunpack.c.h.b16 %v754_v31 }
 0x14e   :  { %v469_v15 = vadd.f32 %v468_v33, %v4283_v56  ;;  %v292_v28 = vpop.f32.mrf.mxu0  ;;  %v558_v38 = vadd.f32 %v557_v27, %v4286_v57  ;;  %v381_v22 = vpop.f32.mrf.mxu1  ;;  %v4549_v34 = vpack.c.b16 %v1699_v13, %v1697_v9  ;;  %v4551_v10 = vpack.c.b16 %v1700_v12, %v1698_v32 }
 0x14f   :  { %v293_v37 = vadd.f32 %v292_v28, %v4274_v47  ;;  %v382_v19 = vadd.f32 %v381_v22, %v4276_v48 }
 0x150   :  { %5222 = vst [vmem:[#allocation14_spill] sm:$0xff] %v4549_v34  ;;  %v672_v11 = vmax.f32 %v469_v15, 0.0  ;;  %v673_v21 = vmax.f32 %v558_v38, 0.0 }
 0x151   :  { %5223 = vst [vmem:[#allocation15_spill] sm:$0xff] %v4551_v10  ;;  %v674_v0 = vmax.f32 %v293_v37, 0.0  ;;  %v675_v14 = vmax.f32 %v382_v19, 0.0 }
 0x152   :  { %v755_v36 = vpack.c.bf16 %v673_v21, %v672_v11 }
 0x153   :  { %v756_v39 = vpack.c.bf16 %v675_v14, %v674_v0 }
 0x154   :  { %v1701_v0 = vunpack.c.l.b16 %v755_v36 }
 0x155   :  { %v470_v29 = vpop.f32.mrf.mxu2  ;;  %v559_v4 = vpop.f32.mrf.mxu3  ;;  %v892_v27 = vunpack.c.l.b16 %v756_v39  ;;  %v893_v9 = vunpack.c.h.b16 %v756_v39 }
 0x156   :  { %v471_v59 = vadd.f32 %v470_v29, %v4283_v56  ;;  %v295_v33 = vpop.f32.mrf.mxu0  ;;  %v560_v32 = vadd.f32 %v559_v4, %v4286_v57  ;;  %v384_v12 = vpop.f32.mrf.mxu1  ;;  %v1702_v29 = vunpack.c.h.b16 %v755_v36 }
 0x157   :  { %v296_v13 = vadd.f32 %v295_v33, %v4274_v47  ;;  %v385_v28 = vadd.f32 %v384_v12, %v4276_v48  ;;  %v4558_v38 = vpack.c.b16 %v892_v27, %v890_v44  ;;  %v4560_v37 = vpack.c.b16 %v893_v9, %v891_v58  ;;  %v3913_v33 = vld [vmem:[#allocation2 + $0x144] sm:$0xf]  ;;  %v3645_v27 = vld [vmem:[#allocation2 + $0x148] sm:$0xf0]  ;;  %v3643_v9 = vld [vmem:[#allocation2 + $0x140] sm:$0xf] }
 0x158   :  { %v676_v15 = vmax.f32 %v471_v59, 0.0  ;;  %v677_v22 = vmax.f32 %v560_v32, 0.0  ;;  %1162 = vmatmul.bf16.gmra.mxu0 %v4406_v16  ;;  %v3648_v12 = vor.u32 %v3913_v33, %v3645_v27 }
 0x159   :  { %v678_v31 = vmax.f32 %v296_v13, 0.0  ;;  %v679_v11 = vmax.f32 %v385_v28, 0.0  ;;  %1251 = vmatmul.bf16.gmra.mxu1 %v4408_v24  ;;  %v3709_v28 = vld [vmem:[#allocation2 + $0x1c8] sm:$0xf0] }
 0x15a   :  { %1340 = vmatmul.bf16.gmra.mxu2 %v4406_v16  ;;  %v757_v19 = vpack.c.bf16 %v677_v22, %v676_v15  ;;  %1429 = vmatmul.bf16.gmra.mxu3 %v4408_v24  ;;  %v3914_v24 = vld [vmem:[#allocation2 + $0x144] sm:$0xf0]  ;;  %v3929_v15 = vld [vmem:[#allocation2 + $0x1c4] sm:$0xf] }
 0x15b   :  { %v758_v21 = vpack.c.bf16 %v679_v11, %v678_v31  ;;  %v3644_v11 = vor.u32 %v3914_v24, %v3643_v9  ;;  %2126 = vmatpush.bf16.msra.mxu2 %v3648_v12 }
 0x15c   :  { %v1703_v39 = vunpack.c.l.b16 %v757_v19  ;;  %v1704_v44 = vunpack.c.h.b16 %v757_v19  ;;  %v3712_v19 = vor.u32 %v3929_v15, %v3709_v28 }
 0x15d   :  { %v473_v14 = vpop.f32.mrf.mxu2  ;;  %v562_v59 = vpop.f32.mrf.mxu3  ;;  %1948 = vmatpush.bf16.msra.mxu0 %v3644_v11  ;;  %v894_v27 = vunpack.c.l.b16 %v758_v21  ;;  %v895_v5 = vunpack.c.h.b16 %v758_v21 }
 0x15e   :  { %v474_v58 = vadd.f32 %v473_v14, %v4283_v56  ;;  %v297_v4 = vpop.f32.mrf.mxu0  ;;  %v563_v32 = vadd.f32 %v562_v59, %v4286_v57  ;;  %v386_v13 = vpop.f32.mrf.mxu1  ;;  %v4569_v22 = vpack.c.b16 %v1703_v39, %v1701_v0  ;;  %v4572_v34 = vpack.c.b16 %v1704_v44, %v1702_v29  ;;  %2215 = vmatpush.bf16.msra.mxu3 %v3712_v19  ;;  %v3707_v0 = vld [vmem:[#allocation2 + $0x1c0] sm:$0xf]  ;;  %v3930_v39 = vld [vmem:[#allocation2 + $0x1c4] sm:$0xf0] }
 0x15f   :  { %v298_v16 = vadd.f32 %v297_v4, %v4274_v47  ;;  %v387_v36 = vadd.f32 %v386_v13, %v4276_v48  ;;  %v3708_v24 = vor.u32 %v3930_v39, %v3707_v0 }
 0x160   :  { %v680_v31 = vmax.f32 %v474_v58, 0.0  ;;  %v681_v14 = vmax.f32 %v563_v32, 0.0 }
 0x161   :  { %v682_v10 = vmax.f32 %v298_v16, 0.0  ;;  %v683_v59 = vmax.f32 %v387_v36, 0.0  ;;  %2037 = vmatpush.bf16.msra.mxu1 %v3708_v24 }
 0x162   :  { %v759_v4 = vpack.c.bf16 %v681_v14, %v680_v31 }
 0x163   :  { %v760_v33 = vpack.c.bf16 %v683_v59, %v682_v10 }
 0x164   :  { %v1705_v14 = vunpack.c.l.b16 %v759_v4  ;;  %v1706_v59 = vunpack.c.h.b16 %v759_v4 }
 0x165   :  { %v475_v45 = vpop.f32.mrf.mxu2  ;;  %v564_v13 = vpop.f32.mrf.mxu3  ;;  %v896_v32 = vunpack.c.l.b16 %v760_v33  ;;  %v897_v16 = vunpack.c.h.b16 %v760_v33 }
 0x166   :  { %v476_v58 = vadd.f32 %v475_v45, %v4283_v56  ;;  %v300_v9 = vpop.f32.mrf.mxu0  ;;  %v565_v44 = vadd.f32 %v564_v13, %v4286_v57  ;;  %v389_v12 = vpop.f32.mrf.mxu1 }
 0x167   :  { %v301_v29 = vadd.f32 %v300_v9, %v4274_v47  ;;  %v390_v10 = vadd.f32 %v389_v12, %v4276_v48  ;;  %v4578_v21 = vpack.c.b16 %v896_v32, %v894_v27  ;;  %v4580_v28 = vpack.c.b16 %v897_v16, %v895_v5 }
 0x168   :  { %v684_v15 = vmax.f32 %v476_v58, 0.0  ;;  %v685_v31 = vmax.f32 %v565_v44, 0.0  ;;  %1167 = vmatmul.bf16.gmra.mxu0 %v4432_v23 }
 0x169   :  { %v686_v45 = vmax.f32 %v301_v29, 0.0  ;;  %v687_v36 = vmax.f32 %v390_v10, 0.0  ;;  %1256 = vmatmul.bf16.gmra.mxu1 %v4434_v25 }
 0x16a   :  { %1345 = vmatmul.bf16.gmra.mxu2 %v4432_v23  ;;  %v761_v11 = vpack.c.bf16 %v685_v31, %v684_v15  ;;  %1434 = vmatmul.bf16.gmra.mxu3 %v4434_v25 }
 0x16b   :  { %v762_v19 = vpack.c.bf16 %v687_v36, %v686_v45 }
 0x16c   :  { %v1707_v27 = vunpack.c.l.b16 %v761_v11  ;;  %v1708_v0 = vunpack.c.h.b16 %v761_v11 }
 0x16d   :  { %v478_v33 = vpop.f32.mrf.mxu2  ;;  %v567_v39 = vpop.f32.mrf.mxu3  ;;  %v898_v10 = vunpack.c.l.b16 %v762_v19  ;;  %v899_v45 = vunpack.c.h.b16 %v762_v19 }
 0x16e   :  { %v479_v5 = vadd.f32 %v478_v33, %v4283_v56  ;;  %v302_v58 = vpop.f32.mrf.mxu0  ;;  %v568_v13 = vadd.f32 %v567_v39, %v4286_v57  ;;  %v391_v24 = vpop.f32.mrf.mxu1  ;;  %v4589_v32 = vpack.c.b16 %v1707_v27, %v1705_v14  ;;  %v4591_v23 = vpack.c.b16 %v1708_v0, %v1706_v59 }
 0x16f   :  { %v303_v9 = vadd.f32 %v302_v58, %v4274_v47  ;;  %v392_v16 = vadd.f32 %v391_v24, %v4276_v48 }
 0x170   :  { %5224 = vst [vmem:[#allocation16_spill] sm:$0xff] %v4589_v32  ;;  %v688_v25 = vmax.f32 %v479_v5, 0.0  ;;  %v689_v4 = vmax.f32 %v568_v13, 0.0 }
 0x171   :  { %5225 = vst [vmem:[#allocation17_spill] sm:$0xff] %v4591_v23  ;;  %v690_v44 = vmax.f32 %v303_v9, 0.0  ;;  %v691_v29 = vmax.f32 %v392_v16, 0.0 }
 0x172   :  { %v763_v12 = vpack.c.bf16 %v689_v4, %v688_v25  ;;  %v3911_v4 = vld [vmem:[#allocation2 + $0x134] sm:$0xf] }
 0x173   :  { %v764_v15 = vpack.c.bf16 %v691_v29, %v690_v44  ;;  %v3637_v44 = vld [vmem:[#allocation2 + $0x138] sm:$0xf0]  ;;  %v3635_v29 = vld [vmem:[#allocation2 + $0x130] sm:$0xf] }
 0x175   :  { %v480_v31 = vpop.f32.mrf.mxu2  ;;  %v569_v11 = vpop.f32.mrf.mxu3  ;;  %v900_v39 = vunpack.c.l.b16 %v764_v15  ;;  %v901_v14 = vunpack.c.h.b16 %v764_v15 }
 0x176   :  { %v481_v36 = vadd.f32 %v480_v31, %v4283_v56  ;;  %v305_v33 = vpop.f32.mrf.mxu0  ;;  %v570_v59 = vadd.f32 %v569_v11, %v4286_v57  ;;  %v394_v0 = vpop.f32.mrf.mxu1  ;;  %v3912_v31 = vld [vmem:[#allocation2 + $0x134] sm:$0xf0]  ;;  %v1709_v11 = vunpack.c.l.b16 %v763_v12 }
 0x177   :  { %v306_v27 = vadd.f32 %v305_v33, %v4274_v47  ;;  %v395_v58 = vadd.f32 %v394_v0, %v4276_v48  ;;  %v4598_v13 = vpack.c.b16 %v900_v39, %v898_v10  ;;  %v4600_v9 = vpack.c.b16 %v901_v14, %v899_v45  ;;  %v3927_v45 = vld [vmem:[#allocation2 + $0x1b4] sm:$0xf] }
 0x178   :  { %v692_v5 = vmax.f32 %v481_v36, 0.0  ;;  %v693_v24 = vmax.f32 %v570_v59, 0.0  ;;  %1172 = vmatmul.bf16.gmra.mxu0 %v4458_v30  ;;  %v3640_v10 = vor.u32 %v3911_v4, %v3637_v44  ;;  %v3701_v36 = vld [vmem:[#allocation2 + $0x1b8] sm:$0xf0]  ;;  %v3636_v39 = vor.u32 %v3912_v31, %v3635_v29 }
 0x179   :  { %v694_v19 = vmax.f32 %v306_v27, 0.0  ;;  %v695_v25 = vmax.f32 %v395_v58, 0.0  ;;  %1261 = vmatmul.bf16.gmra.mxu1 %v4460_v52  ;;  %v3704_v14 = vor.u32 %v3927_v45, %v3701_v36  ;;  %v1710_v27 = vunpack.c.h.b16 %v763_v12 }
 0x17a   :  { %1350 = vmatmul.bf16.gmra.mxu2 %v4458_v30  ;;  %v765_v16 = vpack.c.bf16 %v693_v24, %v692_v5  ;;  %1439 = vmatmul.bf16.gmra.mxu3 %v4460_v52 }
 0x17b   :  { %v766_v15 = vpack.c.bf16 %v695_v25, %v694_v19  ;;  %2127 = vmatpush.bf16.msra.mxu2 %v3640_v10  ;;  %1949 = vmatpush.bf16.msra.mxu0 %v3636_v39 }
 0x17c   :  { %v1711_v59 = vunpack.c.l.b16 %v765_v16  ;;  %v1712_v52 = vunpack.c.h.b16 %v765_v16  ;;  %2216 = vmatpush.bf16.msra.mxu3 %v3704_v14  ;;  %v3699_v14 = vld [vmem:[#allocation2 + $0x1b0] sm:$0xf] }
 0x17d   :  { %v483_v33 = vpop.f32.mrf.mxu2  ;;  %v572_v30 = vpop.f32.mrf.mxu3  ;;  %v902_v16 = vunpack.c.l.b16 %v766_v15 }
 0x17e   :  { %v484_v0 = vadd.f32 %v483_v33, %v4283_v56  ;;  %v307_v5 = vpop.f32.mrf.mxu0  ;;  %v573_v58 = vadd.f32 %v572_v30, %v4286_v57  ;;  %v396_v19 = vpop.f32.mrf.mxu1  ;;  %v4609_v25 = vpack.c.b16 %v1711_v59, %v1709_v11  ;;  %v4612_v29 = vpack.c.b16 %v1712_v52, %v1710_v27  ;;  %v3928_v11 = vld [vmem:[#allocation2 + $0x1b4] sm:$0xf0] }
 0x17f   :  { %v308_v24 = vadd.f32 %v307_v5, %v4274_v47  ;;  %v397_v44 = vadd.f32 %v396_v19, %v4276_v48  ;;  %v903_v30 = vunpack.c.h.b16 %v766_v15 }
 0x180   :  { %5226 = vst [vmem:[#allocation18_spill] sm:$0xff] %v4609_v25  ;;  %v696_v4 = vmax.f32 %v484_v0, 0.0  ;;  %v697_v12 = vmax.f32 %v573_v58, 0.0  ;;  %v3700_v58 = vor.u32 %v3928_v11, %v3699_v14 }
 0x181   :  { %5227 = vst [vmem:[#allocation19_spill] sm:$0xff] %v4612_v29  ;;  %v698_v31 = vmax.f32 %v308_v24, 0.0  ;;  %v699_v45 = vmax.f32 %v397_v44, 0.0 }
 0x182   :  { %v767_v36 = vpack.c.bf16 %v697_v12, %v696_v4  ;;  %2038 = vmatpush.bf16.msra.mxu1 %v3700_v58 }
 0x183   :  { %v768_v10 = vpack.c.bf16 %v699_v45, %v698_v31 }
 0x185   :  { %v485_v33 = vpop.f32.mrf.mxu2  ;;  %v574_v23 = vpop.f32.mrf.mxu3  ;;  %v904_v59 = vunpack.c.l.b16 %v768_v10  ;;  %v905_v0 = vunpack.c.h.b16 %v768_v10  ;;  %v774_v10 = vld [vmem:[#allocation5] sm:$0xf] }
 0x186   :  { %v486_v5 = vadd.f32 %v485_v33, %v4283_v56  ;;  %v310_v39 = vpop.f32.mrf.mxu0  ;;  %v575_v19 = vadd.f32 %v574_v23, %v4286_v57  ;;  %v399_v52 = vpop.f32.mrf.mxu1 }
 0x187   :  { %v311_v27 = vadd.f32 %v310_v39, %v4274_v47  ;;  %v400_v4 = vadd.f32 %v399_v52, %v4276_v48  ;;  %v4618_v44 = vpack.c.b16 %v904_v59, %v902_v16  ;;  %v4620_v15 = vpack.c.b16 %v905_v0, %v903_v30 }
 0x188   :  { %v700_v24 = vmax.f32 %v486_v5, 0.0  ;;  %v701_v12 = vmax.f32 %v575_v19, 0.0  ;;  %1177 = vmatmul.bf16.gmra.mxu0 %v4478_v1  ;;  %v1713_v5 = vunpack.c.l.b16 %v767_v36  ;;  %v1714_v16 = vunpack.c.h.b16 %v767_v36 }
 0x189   :  { %v702_v31 = vmax.f32 %v311_v27, 0.0  ;;  %v703_v45 = vmax.f32 %v400_v4, 0.0  ;;  %1266 = vmatmul.bf16.gmra.mxu1 %v4480_v3  ;;  %v808_v19 = vperm.slane %v774_v10, 0 }
 0x18a   :  { %1355 = vmatmul.bf16.gmra.mxu2 %v4478_v1  ;;  %v769_v23 = vpack.c.bf16 %v701_v12, %v700_v24  ;;  %1444 = vmatmul.bf16.gmra.mxu3 %v4480_v3 }
 0x18b   :  { %v770_v33 = vpack.c.bf16 %v703_v45, %v702_v31 }
 0x18c   :  { %v1715_v30 = vunpack.c.l.b16 %v769_v23  ;;  %v1716_v14 = vunpack.c.h.b16 %v769_v23  ;;  %v4634_v23 = vperm.slane %v808_v19, 0 }
 0x18d   :  { %v488_v39 = vpop.f32.mrf.mxu2  ;;  %v577_v59 = vpop.f32.mrf.mxu3  ;;  %v906_v29 = vunpack.c.l.b16 %v770_v33  ;;  %v907_v32 = vunpack.c.h.b16 %v770_v33  ;;  %v3629_v33 = vld [vmem:[#allocation2 + $0x128] sm:$0xf0] }
 0x18e   :  { %v489_v11 = vadd.f32 %v488_v39, %v4283_v56  ;;  %v312_v0 = vpop.f32.mrf.mxu0  ;;  %v578_v27 = vadd.f32 %v577_v59, %v4286_v57  ;;  %v401_v1 = vpop.f32.mrf.mxu1  ;;  %v4629_v58 = vpack.c.b16 %v1715_v30, %v1713_v5  ;;  %v4631_v3 = vpack.c.b16 %v1716_v14, %v1714_v16 }
 0x18f   :  { %v313_v52 = vadd.f32 %v312_v0, %v4274_v47  ;;  %v402_v36 = vadd.f32 %v401_v1, %v4276_v48  ;;  %v809_v59 = vperm.slane %v774_v10, 2  ;;  %v3909_v10 = vld [vmem:[#allocation2 + $0x124] sm:$0xf] }
 0x190   :  { %v704_v24 = vmax.f32 %v489_v11, 0.0  ;;  %v705_v4 = vmax.f32 %v578_v27, 0.0 }
 0x191   :  { %v706_v12 = vmax.f32 %v313_v52, 0.0  ;;  %v707_v31 = vmax.f32 %v402_v36, 0.0 }
 0x192   :  { %v771_v45 = vpack.c.bf16 %v705_v4, %v704_v24  ;;  %v3632_v4 = vor.u32 %v3909_v10, %v3629_v33 }
 0x193   :  { %v772_v39 = vpack.c.bf16 %v707_v31, %v706_v12  ;;  %v3910_v12 = vld [vmem:[#allocation2 + $0x124] sm:$0xf0]  ;;  %v3925_v31 = vld [vmem:[#allocation2 + $0x1a4] sm:$0xf] }
 0x194   :  { %v1718_v36 = vunpack.c.h.b16 %v771_v45  ;;  %2128 = vmatpush.bf16.msra.mxu2 %v3632_v4 }
 0x195   :  { %v490_v25 = vpop.f32.mrf.mxu2  ;;  %v579_v5 = vpop.f32.mrf.mxu3  ;;  %v908_v16 = vunpack.c.l.b16 %v772_v39  ;;  %v909_v14 = vunpack.c.h.b16 %v772_v39  ;;  %v3693_v39 = vld [vmem:[#allocation2 + $0x1a8] sm:$0xf0] }
 0x196   :  { %v491_v47 = vadd.f32 %v490_v25, %v4283_v56  ;;  %v1143_v30 = vpop.f32.mrf.mxu0  ;;  %v580_v11 = vadd.f32 %v579_v5, %v4286_v57  ;;  %v1232_v0 = vpop.f32.mrf.mxu1  ;;  %v4646_v56 = vperm.slane %v809_v59, 0  ;;  %v1717_v57 = vunpack.c.l.b16 %v771_v45 }
 0x197   :  { %v1144_v48 = vadd.f32 %v1143_v30, %v4634_v23  ;;  %v4639_v52 = vpack.c.b16 %v908_v16, %v906_v29  ;;  %v4641_v19 = vpack.c.b16 %v909_v14, %v907_v32  ;;  %v3627_v29 = vld [vmem:[#allocation2 + $0x120] sm:$0xf]  ;;  %v3696_v14 = vor.u32 %v3925_v31, %v3693_v39  ;;  %v3926_v39 = vld [vmem:[#allocation2 + $0x1a4] sm:$0xf0] }
 0x198   :  { %v708_v27 = vmax.f32 %v491_v47, 0.0  ;;  %v709_v1 = vmax.f32 %v580_v11, 0.0  ;;  %1182 = vmatmul.bf16.gmra.mxu0 %v4498_v6  ;;  %v3628_v16 = vor.u32 %v3910_v12, %v3627_v29  ;;  %v3691_v31 = vld [vmem:[#allocation2 + $0x1a0] sm:$0xf] }
 0x199   :  { %v1233_v24 = vadd.f32 %v1232_v0, %v1144_v48  ;;  %1271 = vmatmul.bf16.gmra.mxu1 %v4500_v35  ;;  %2217 = vmatpush.bf16.msra.mxu3 %v3696_v14 }
 0x19a   :  { %1360 = vmatmul.bf16.gmra.mxu2 %v4498_v6  ;;  %v773_v25 = vpack.c.bf16 %v709_v1, %v708_v27  ;;  %1449 = vmatmul.bf16.gmra.mxu3 %v4500_v35 }
 0x19b   :  { %1950 = vmatpush.bf16.msra.mxu0 %v3628_v16  ;;  %v1490_v1 = vmax.f32 %v1233_v24, 0.0 }
 0x19c   :  { %v1719_v47 = vunpack.c.l.b16 %v773_v25  ;;  %v1720_v5 = vunpack.c.h.b16 %v773_v25 }
 0x19d   :  { %v1321_v32 = vpop.f32.mrf.mxu2  ;;  %v1410_v6 = vpop.f32.mrf.mxu3 }
 0x19e   :  { %v1322_v30 = vadd.f32 %v1321_v32, %v4646_v56  ;;  %v1145_v59 = vpop.f32.mrf.mxu0  ;;  %v1234_v11 = vpop.f32.mrf.mxu1  ;;  %v4651_v48 = vpack.c.b16 %v1719_v47, %v1717_v57  ;;  %v4653_v45 = vpack.c.b16 %v1720_v5, %v1718_v36  ;;  %v3692_v47 = vor.u32 %v3926_v39, %v3691_v31 }
 0x19f   :  { %v1146_v35 = vadd.f32 %v1145_v59, %v4634_v23 }
 0x1a0   :  { %v1411_v0 = vadd.f32 %v1410_v6, %v1322_v30  ;;  %2039 = vmatpush.bf16.msra.mxu1 %v3692_v47 }
 0x1a1   :  { %v1235_v27 = vadd.f32 %v1234_v11, %v1146_v35 }
 0x1a2   :  { %v1491_v25 = vmax.f32 %v1411_v0, 0.0 }
 0x1a3   :  { %v1492_v30 = vmax.f32 %v1235_v27, 0.0 }
 0x1a4   :  { %v1554_v10 = vpack.c.bf16 %v1491_v25, %v1490_v1 }
 0x1a5   :  { %v1323_v33 = vpop.f32.mrf.mxu2  ;;  %v1412_v29 = vpop.f32.mrf.mxu3 }
 0x1a6   :  { %v1324_v32 = vadd.f32 %v1323_v33, %v4646_v56  ;;  %v1148_v12 = vpop.f32.mrf.mxu0  ;;  %v1237_v57 = vpop.f32.mrf.mxu1  ;;  %v2429_v59 = vunpack.c.l.b16 %v1554_v10  ;;  %v2430_v14 = vunpack.c.h.b16 %v1554_v10 }
 0x1a7   :  { %v1149_v4 = vadd.f32 %v1148_v12, %v4634_v23 }
 0x1a8   :  { %v1413_v36 = vadd.f32 %v1412_v29, %v1324_v32  ;;  %1187 = vmatmul.bf16.gmra.mxu0 %v4518_v62 }
 0x1a9   :  { %v1238_v5 = vadd.f32 %v1237_v57, %v1149_v4  ;;  %1276 = vmatmul.bf16.gmra.mxu1 %v4520_v63 }
 0x1aa   :  { %v1493_v24 = vmax.f32 %v1413_v36, 0.0  ;;  %1365 = vmatmul.bf16.gmra.mxu2 %v4518_v62  ;;  %1454 = vmatmul.bf16.gmra.mxu3 %v4520_v63 }
 0x1ab   :  { %v1494_v63 = vmax.f32 %v1238_v5, 0.0 }
 0x1ac   :  { %v1555_v6 = vpack.c.bf16 %v1493_v24, %v1492_v30 }
 0x1ad   :  { %v1326_v16 = vpop.f32.mrf.mxu2  ;;  %v1415_v1 = vpop.f32.mrf.mxu3 }
 0x1ae   :  { %v2431_v35 = vunpack.c.l.b16 %v1555_v6  ;;  %v2432_v11 = vunpack.c.h.b16 %v1555_v6  ;;  %v1327_v0 = vadd.f32 %v1326_v16, %v4646_v56  ;;  %v1150_v25 = vpop.f32.mrf.mxu0  ;;  %v1239_v27 = vpop.f32.mrf.mxu1 }
 0x1af   :  { %v1151_v33 = vadd.f32 %v1150_v25, %v4634_v23 }
 0x1b0   :  { %v4663_v32 = vpack.c.b16 %v2431_v35, %v2429_v59  ;;  %v4665_v29 = vpack.c.b16 %v2432_v11, %v2430_v14  ;;  %v1416_v62 = vadd.f32 %v1415_v1, %v1327_v0  ;;  %v3907_v14 = vld [vmem:[#allocation2 + $0x114] sm:$0xf]  ;;  %v3621_v35 = vld [vmem:[#allocation2 + $0x118] sm:$0xf0]  ;;  %v3619_v11 = vld [vmem:[#allocation2 + $0x110] sm:$0xf] }
 0x1b1   :  { %v1240_v12 = vadd.f32 %v1239_v27, %v1151_v33  ;;  %v3624_v25 = vor.u32 %v3907_v14, %v3621_v35  ;;  %v3908_v33 = vld [vmem:[#allocation2 + $0x114] sm:$0xf0]  ;;  %v3923_v27 = vld [vmem:[#allocation2 + $0x194] sm:$0xf] }
 0x1b2   :  { %v1495_v31 = vmax.f32 %v1416_v62, 0.0  ;;  %v3685_v62 = vld [vmem:[#allocation2 + $0x198] sm:$0xf0] }
 0x1b3   :  { %v1496_v59 = vmax.f32 %v1240_v12, 0.0  ;;  %2129 = vmatpush.bf16.msra.mxu2 %v3624_v25 }
 0x1b4   :  { %v1556_v39 = vpack.c.bf16 %v1495_v31, %v1494_v63 }
 0x1b5   :  { %v1328_v4 = vpop.f32.mrf.mxu2  ;;  %v1417_v57 = vpop.f32.mrf.mxu3 }
 0x1b6   :  { %v1329_v10 = vadd.f32 %v1328_v4, %v4646_v56  ;;  %v1153_v47 = vpop.f32.mrf.mxu0  ;;  %v1242_v30 = vpop.f32.mrf.mxu1  ;;  %v2433_v0 = vunpack.c.l.b16 %v1556_v39  ;;  %v3620_v4 = vor.u32 %v3908_v33, %v3619_v11 }
 0x1b7   :  { %v1154_v36 = vadd.f32 %v1153_v47, %v4634_v23 }
 0x1b8   :  { %v1418_v24 = vadd.f32 %v1417_v57, %v1329_v10  ;;  %1192 = vmatmul.bf16.gmra.mxu0 %v4538_v7  ;;  %v3688_v10 = vor.u32 %v3923_v27, %v3685_v62  ;;  %v3683_v62 = vld [vmem:[#allocation2 + $0x190] sm:$0xf] }
 0x1b9   :  { %v1243_v6 = vadd.f32 %v1242_v30, %v1154_v36  ;;  %1281 = vmatmul.bf16.gmra.mxu1 %v4540_v51  ;;  %1951 = vmatpush.bf16.msra.mxu0 %v3620_v4 }
 0x1ba   :  { %v1497_v16 = vmax.f32 %v1418_v24, 0.0  ;;  %1370 = vmatmul.bf16.gmra.mxu2 %v4538_v7  ;;  %1459 = vmatmul.bf16.gmra.mxu3 %v4540_v51  ;;  %v2434_v7 = vunpack.c.h.b16 %v1556_v39 }
 0x1bb   :  { %2218 = vmatpush.bf16.msra.mxu3 %v3688_v10  ;;  %v1498_v14 = vmax.f32 %v1243_v6, 0.0 }
 0x1bc   :  { %v1557_v5 = vpack.c.bf16 %v1497_v16, %v1496_v59 }
 0x1bd   :  { %v1331_v1 = vpop.f32.mrf.mxu2  ;;  %v1420_v12 = vpop.f32.mrf.mxu3 }
 0x1be   :  { %v1332_v63 = vadd.f32 %v1331_v1, %v4646_v56  ;;  %v1155_v31 = vpop.f32.mrf.mxu0  ;;  %v2435_v57 = vunpack.c.l.b16 %v1557_v5  ;;  %v1244_v47 = vpop.f32.mrf.mxu1  ;;  %v2436_v36 = vunpack.c.h.b16 %v1557_v5 }
 0x1bf   :  { %v1156_v51 = vadd.f32 %v1155_v31, %v4634_v23  ;;  %v3924_v31 = vld [vmem:[#allocation2 + $0x194] sm:$0xf0] }
 0x1c0   :  { %v1421_v30 = vadd.f32 %v1420_v12, %v1332_v63  ;;  %v4675_v24 = vpack.c.b16 %v2435_v57, %v2433_v0  ;;  %v4677_v16 = vpack.c.b16 %v2436_v36, %v2434_v7  ;;  %v3684_v63 = vor.u32 %v3924_v31, %v3683_v62 }
 0x1c1   :  { %v1245_v59 = vadd.f32 %v1244_v47, %v1156_v51 }
 0x1c2   :  { %v1499_v35 = vmax.f32 %v1421_v30, 0.0  ;;  %2040 = vmatpush.bf16.msra.mxu1 %v3684_v63 }
 0x1c3   :  { %v1500_v4 = vmax.f32 %v1245_v59, 0.0 }
 0x1c4   :  { %v1558_v1 = vpack.c.bf16 %v1499_v35, %v1498_v14 }
 0x1c5   :  { %v1333_v11 = vpop.f32.mrf.mxu2  ;;  %v1422_v39 = vpop.f32.mrf.mxu3 }
 0x1c6   :  { %v1334_v33 = vadd.f32 %v1333_v11, %v4646_v56  ;;  %v1158_v27 = vpop.f32.mrf.mxu0  ;;  %v1247_v25 = vpop.f32.mrf.mxu1  ;;  %v2437_v57 = vunpack.c.l.b16 %v1558_v1  ;;  %v2438_v51 = vunpack.c.h.b16 %v1558_v1 }
 0x1c7   :  { %v1159_v5 = vadd.f32 %v1158_v27, %v4634_v23 }
 0x1c8   :  { %v1423_v12 = vadd.f32 %v1422_v39, %v1334_v33  ;;  %1197 = vmatmul.bf16.gmra.mxu0 %v4558_v38 }
 0x1c9   :  { %v1248_v0 = vadd.f32 %v1247_v25, %v1159_v5  ;;  %1286 = vmatmul.bf16.gmra.mxu1 %v4560_v37 }
 0x1ca   :  { %v1501_v6 = vmax.f32 %v1423_v12, 0.0  ;;  %1375 = vmatmul.bf16.gmra.mxu2 %v4558_v38  ;;  %1464 = vmatmul.bf16.gmra.mxu3 %v4560_v37 }
 0x1cb   :  { %v1502_v37 = vmax.f32 %v1248_v0, 0.0 }
 0x1cc   :  { %v1559_v10 = vpack.c.bf16 %v1501_v6, %v1500_v4 }
 0x1cd   :  { %v1336_v7 = vpop.f32.mrf.mxu2  ;;  %v1425_v36 = vpop.f32.mrf.mxu3 }
 0x1ce   :  { %v1337_v47 = vadd.f32 %v1336_v7, %v4646_v56  ;;  %v1160_v30 = vpop.f32.mrf.mxu0  ;;  %v2439_v14 = vunpack.c.l.b16 %v1559_v10  ;;  %v2440_v35 = vunpack.c.h.b16 %v1559_v10  ;;  %v1249_v59 = vpop.f32.mrf.mxu1 }
 0x1cf   :  { %v1161_v11 = vadd.f32 %v1160_v30, %v4634_v23 }
 0x1d0   :  { %v1426_v33 = vadd.f32 %v1425_v36, %v1337_v47  ;;  %v4687_v39 = vpack.c.b16 %v2439_v14, %v2437_v57  ;;  %v4689_v27 = vpack.c.b16 %v2440_v35, %v2438_v51  ;;  %v3905_v51 = vld [vmem:[#allocation2 + $0x104] sm:$0xf]  ;;  %v3613_v47 = vld [vmem:[#allocation2 + $0x108] sm:$0xf0]  ;;  %v3611_v36 = vld [vmem:[#allocation2 + $0x100] sm:$0xf] }
 0x1d1   :  { %v1250_v38 = vadd.f32 %v1249_v59, %v1161_v11  ;;  %v3616_v35 = vor.u32 %v3905_v51, %v3613_v47  ;;  %v3906_v11 = vld [vmem:[#allocation2 + $0x104] sm:$0xf0]  ;;  %v3921_v59 = vld [vmem:[#allocation2 + $0x184] sm:$0xf] }
 0x1d2   :  { %v1503_v62 = vmax.f32 %v1426_v33, 0.0  ;;  %v3677_v33 = vld [vmem:[#allocation2 + $0x188] sm:$0xf0] }
 0x1d3   :  { %v1504_v57 = vmax.f32 %v1250_v38, 0.0  ;;  %2130 = vmatpush.bf16.msra.mxu2 %v3616_v35 }
 0x1d4   :  { %v1560_v31 = vpack.c.bf16 %v1503_v62, %v1502_v37 }
 0x1d5   :  { %v1338_v5 = vpop.f32.mrf.mxu2  ;;  %v1427_v25 = vpop.f32.mrf.mxu3 }
 0x1d6   :  { %v1339_v1 = vadd.f32 %v1338_v5, %v4646_v56  ;;  %v1163_v63 = vpop.f32.mrf.mxu0  ;;  %v1252_v4 = vpop.f32.mrf.mxu1  ;;  %v2441_v30 = vunpack.c.l.b16 %v1560_v31  ;;  %v3612_v5 = vor.u32 %v3906_v11, %v3611_v36 }
 0x1d7   :  { %v1164_v12 = vadd.f32 %v1163_v63, %v4634_v23 }
 0x1d8   :  { %v1428_v6 = vadd.f32 %v1427_v25, %v1339_v1  ;;  %1202 = vmatmul.bf16.gmra.mxu0 %v4578_v21  ;;  %v3680_v1 = vor.u32 %v3921_v59, %v3677_v33  ;;  %v3675_v33 = vld [vmem:[#allocation2 + $0x180] sm:$0xf] }
 0x1d9   :  { %v1253_v10 = vadd.f32 %v1252_v4, %v1164_v12  ;;  %1291 = vmatmul.bf16.gmra.mxu1 %v4580_v28  ;;  %1952 = vmatpush.bf16.msra.mxu0 %v3612_v5 }
 0x1da   :  { %v1505_v7 = vmax.f32 %v1428_v6, 0.0  ;;  %1380 = vmatmul.bf16.gmra.mxu2 %v4578_v21  ;;  %1469 = vmatmul.bf16.gmra.mxu3 %v4580_v28  ;;  %v2442_v21 = vunpack.c.h.b16 %v1560_v31 }
 0x1db   :  { %2219 = vmatpush.bf16.msra.mxu3 %v3680_v1  ;;  %v1506_v51 = vmax.f32 %v1253_v10, 0.0 }
 0x1dc   :  { %v1561_v0 = vpack.c.bf16 %v1505_v7, %v1504_v57 }
 0x1dd   :  { %v1341_v14 = vpop.f32.mrf.mxu2  ;;  %v1430_v38 = vpop.f32.mrf.mxu3 }
 0x1de   :  { %v1342_v37 = vadd.f32 %v1341_v14, %v4646_v56  ;;  %v1165_v62 = vpop.f32.mrf.mxu0  ;;  %v2443_v25 = vunpack.c.l.b16 %v1561_v0  ;;  %v1254_v63 = vpop.f32.mrf.mxu1  ;;  %v2444_v12 = vunpack.c.h.b16 %v1561_v0 }
 0x1df   :  { %v1166_v28 = vadd.f32 %v1165_v62, %v4634_v23  ;;  %v3922_v62 = vld [vmem:[#allocation2 + $0x184] sm:$0xf0] }
 0x1e0   :  { %v1431_v4 = vadd.f32 %v1430_v38, %v1342_v37  ;;  %v4699_v6 = vpack.c.b16 %v2443_v25, %v2441_v30  ;;  %v4701_v7 = vpack.c.b16 %v2444_v12, %v2442_v21  ;;  %v3676_v37 = vor.u32 %v3922_v62, %v3675_v33 }
 0x1e1   :  { %v1255_v57 = vadd.f32 %v1254_v63, %v1166_v28 }
 0x1e2   :  { %v1507_v47 = vmax.f32 %v1431_v4, 0.0  ;;  %2041 = vmatpush.bf16.msra.mxu1 %v3676_v37 }
 0x1e3   :  { %v1508_v5 = vmax.f32 %v1255_v57, 0.0 }
 0x1e4   :  { %v1562_v14 = vpack.c.bf16 %v1507_v47, %v1506_v51 }
 0x1e5   :  { %v1343_v36 = vpop.f32.mrf.mxu2  ;;  %v1432_v31 = vpop.f32.mrf.mxu3 }
 0x1e6   :  { %v1344_v11 = vadd.f32 %v1343_v36, %v4646_v56  ;;  %v1168_v59 = vpop.f32.mrf.mxu0  ;;  %v1257_v35 = vpop.f32.mrf.mxu1  ;;  %v2445_v25 = vunpack.c.l.b16 %v1562_v14  ;;  %v2446_v28 = vunpack.c.h.b16 %v1562_v14 }
 0x1e7   :  { %v1169_v0 = vadd.f32 %v1168_v59, %v4634_v23 }
 0x1e8   :  { %v1433_v38 = vadd.f32 %v1432_v31, %v1344_v11  ;;  %1207 = vmatmul.bf16.gmra.mxu0 %v4598_v13 }
 0x1e9   :  { %v1258_v30 = vadd.f32 %v1257_v35, %v1169_v0  ;;  %1296 = vmatmul.bf16.gmra.mxu1 %v4600_v9 }
 0x1ea   :  { %v1509_v10 = vmax.f32 %v1433_v38, 0.0  ;;  %1385 = vmatmul.bf16.gmra.mxu2 %v4598_v13  ;;  %1474 = vmatmul.bf16.gmra.mxu3 %v4600_v9 }
 0x1eb   :  { %v1510_v9 = vmax.f32 %v1258_v30, 0.0 }
 0x1ec   :  { %v1563_v1 = vpack.c.bf16 %v1509_v10, %v1508_v5 }
 0x1ed   :  { %v1346_v21 = vpop.f32.mrf.mxu2  ;;  %v1435_v12 = vpop.f32.mrf.mxu3 }
 0x1ee   :  { %v1347_v63 = vadd.f32 %v1346_v21, %v4646_v56  ;;  %v1170_v4 = vpop.f32.mrf.mxu0  ;;  %v2447_v51 = vunpack.c.l.b16 %v1563_v1  ;;  %v2448_v47 = vunpack.c.h.b16 %v1563_v1  ;;  %v1259_v57 = vpop.f32.mrf.mxu1 }
 0x1ef   :  { %v1171_v36 = vadd.f32 %v1170_v4, %v4634_v23 }
 0x1f0   :  { %v1436_v11 = vadd.f32 %v1435_v12, %v1347_v63  ;;  %v4711_v31 = vpack.c.b16 %v2447_v51, %v2445_v25  ;;  %v4713_v59 = vpack.c.b16 %v2448_v47, %v2446_v28  ;;  %v3960_v28 = vld [vmem:[%s5209_s5 + $0xb8] sm:$0xff] }
 0x1f1   :  { %v1260_v13 = vadd.f32 %v1259_v57, %v1171_v36  ;;  %v3944_v63 = vld [vmem:[%s5209_s5 + $0x38] sm:$0xff]  ;;  %3155 = vmatpush.bf16.msrb.mxu2 %v3960_v28 }
 0x1f2   :  { %v1511_v33 = vmax.f32 %v1436_v11, 0.0  ;;  %v3968_v12 = vld [vmem:[%s5209_s5 + $0xf8] sm:$0xff]  ;;  %2977 = vmatpush.bf16.msrb.mxu0 %v3944_v63 }
 0x1f3   :  { %v1512_v25 = vmax.f32 %v1260_v13, 0.0  ;;  %3244 = vmatpush.bf16.msrb.mxu3 %v3968_v12 }
 0x1f4   :  { %v1564_v62 = vpack.c.bf16 %v1511_v33, %v1510_v9 }
 0x1f5   :  { %v1348_v0 = vpop.f32.mrf.mxu2  ;;  %v1437_v35 = vpop.f32.mrf.mxu3 }
 0x1f6   :  { %v1349_v14 = vadd.f32 %v1348_v0, %v4646_v56  ;;  %v1173_v37 = vpop.f32.mrf.mxu0  ;;  %v1262_v5 = vpop.f32.mrf.mxu1  ;;  %v2449_v4 = vunpack.c.l.b16 %v1564_v62  ;;  %v2450_v47 = vunpack.c.h.b16 %v1564_v62 }
 0x1f7   :  { %v1174_v38 = vadd.f32 %v1173_v37, %v4634_v23 }
 0x1f8   :  { %v1438_v10 = vadd.f32 %v1437_v35, %v1349_v14  ;;  %1212 = vmatmul.bf16.gmra.mxu0 %v4618_v44 }
 0x1f9   :  { %v1263_v1 = vadd.f32 %v1262_v5, %v1174_v38  ;;  %1301 = vmatmul.bf16.gmra.mxu1 %v4620_v15 }
 0x1fa   :  { %v1513_v21 = vmax.f32 %v1438_v10, 0.0  ;;  %1390 = vmatmul.bf16.gmra.mxu2 %v4618_v44  ;;  %1479 = vmatmul.bf16.gmra.mxu3 %v4620_v15 }
 0x1fb   :  { %v1514_v37 = vmax.f32 %v1263_v1, 0.0 }
 0x1fc   :  { %v1565_v30 = vpack.c.bf16 %v1513_v21, %v1512_v25 }
 0x1fd   :  { %v1351_v51 = vpop.f32.mrf.mxu2  ;;  %v1440_v36 = vpop.f32.mrf.mxu3 }
 0x1fe   :  { %v1352_v44 = vadd.f32 %v1351_v51, %v4646_v56  ;;  %v1175_v15 = vpop.f32.mrf.mxu0  ;;  %v2451_v57 = vunpack.c.l.b16 %v1565_v30  ;;  %v2452_v11 = vunpack.c.h.b16 %v1565_v30  ;;  %v1264_v9 = vpop.f32.mrf.mxu1  ;;  %v3952_v30 = vld [vmem:[%s5209_s5 + $0x78] sm:$0xff] }
 0x1ff   :  { %v1176_v13 = vadd.f32 %v1175_v15, %v4634_v23  ;;  %3066 = vmatpush.bf16.msrb.mxu1 %v3952_v30 }
 0x200   :  { %v1441_v33 = vadd.f32 %v1440_v36, %v1352_v44  ;;  %v4732_v0 = vpack.c.b16 %v2451_v57, %v2449_v4  ;;  %v4734_v14 = vpack.c.b16 %v2452_v11, %v2450_v47 }
 0x201   :  { %v1265_v35 = vadd.f32 %v1264_v9, %v1176_v13 }
 0x202   :  { %v1515_v62 = vmax.f32 %v1441_v33, 0.0 }
 0x203   :  { %v1516_v1 = vmax.f32 %v1265_v35, 0.0 }
 0x204   :  { %v1566_v38 = vpack.c.bf16 %v1515_v62, %v1514_v37 }
 0x205   :  { %v1353_v5 = vpop.f32.mrf.mxu2  ;;  %v1442_v25 = vpop.f32.mrf.mxu3 }
 0x206   :  { %v1354_v10 = vadd.f32 %v1353_v5, %v4646_v56  ;;  %v1178_v21 = vpop.f32.mrf.mxu0  ;;  %v1267_v63 = vpop.f32.mrf.mxu1  ;;  %v2453_v44 = vunpack.c.l.b16 %v1566_v38  ;;  %v2454_v15 = vunpack.c.h.b16 %v1566_v38 }
 0x207   :  { %v1179_v28 = vadd.f32 %v1178_v21, %v4634_v23 }
 0x208   :  { %v1443_v12 = vadd.f32 %v1442_v25, %v1354_v10  ;;  %1217 = vmatmul.bf16.gmra.mxu0 %v4639_v52 }
 0x209   :  { %v1268_v4 = vadd.f32 %v1267_v63, %v1179_v28  ;;  %1306 = vmatmul.bf16.gmra.mxu1 %v4641_v19 }
 0x20a   :  { %v1517_v51 = vmax.f32 %v1443_v12, 0.0  ;;  %1395 = vmatmul.bf16.gmra.mxu2 %v4639_v52  ;;  %1484 = vmatmul.bf16.gmra.mxu3 %v4641_v19 }
 0x20b   :  { %v1518_v19 = vmax.f32 %v1268_v4, 0.0 }
 0x20c   :  { %v1567_v47 = vpack.c.bf16 %v1517_v51, %v1516_v1 }
 0x20d   :  { %v1356_v36 = vpop.f32.mrf.mxu2  ;;  %v1445_v11 = vpop.f32.mrf.mxu3 }
 0x20e   :  { %v1357_v57 = vadd.f32 %v1356_v36, %v4646_v56  ;;  %v1180_v13 = vpop.f32.mrf.mxu0  ;;  %v2455_v9 = vunpack.c.l.b16 %v1567_v47  ;;  %v2456_v33 = vunpack.c.h.b16 %v1567_v47  ;;  %v1269_v35 = vpop.f32.mrf.mxu1 }
 0x20f   :  { %v1181_v37 = vadd.f32 %v1180_v13, %v4634_v23 }
 0x210   :  { %v1446_v62 = vadd.f32 %v1445_v11, %v1357_v57  ;;  %v4747_v5 = vpack.c.b16 %v2455_v9, %v2453_v44  ;;  %v4749_v10 = vpack.c.b16 %v2456_v33, %v2454_v15  ;;  %v3959_v15 = vld [vmem:[%s5209_s5 + $0xb0] sm:$0xff] }
 0x211   :  { %v1270_v52 = vadd.f32 %v1269_v35, %v1181_v37  ;;  %v3943_v57 = vld [vmem:[%s5209_s5 + $0x30] sm:$0xff]  ;;  %3156 = vmatpush.bf16.msrb.mxu2 %v3959_v15 }
 0x212   :  { %v1519_v25 = vmax.f32 %v1446_v62, 0.0  ;;  %v3967_v11 = vld [vmem:[%s5209_s5 + $0xf0] sm:$0xff]  ;;  %2978 = vmatpush.bf16.msrb.mxu0 %v3943_v57 }
 0x213   :  { %v1520_v44 = vmax.f32 %v1270_v52, 0.0  ;;  %3245 = vmatpush.bf16.msrb.mxu3 %v3967_v11 }
 0x214   :  { %v1568_v21 = vpack.c.bf16 %v1519_v25, %v1518_v19 }
 0x215   :  { %v1358_v30 = vpop.f32.mrf.mxu2  ;;  %v1447_v28 = vpop.f32.mrf.mxu3 }
 0x216   :  { %v1359_v38 = vadd.f32 %v1358_v30, %v4646_v56  ;;  %v1183_v63 = vpop.f32.mrf.mxu0  ;;  %v1272_v1 = vpop.f32.mrf.mxu1  ;;  %v2457_v13 = vunpack.c.l.b16 %v1568_v21  ;;  %v2458_v33 = vunpack.c.h.b16 %v1568_v21 }
 0x217   :  { %v1184_v12 = vadd.f32 %v1183_v63, %v4634_v23 }
 0x218   :  { %v1448_v51 = vadd.f32 %v1447_v28, %v1359_v38  ;;  %1953 = vmatmul.bf16.vlgmr.msra.gmra.mxu0 %v4311_v54 }
 0x219   :  { %v1273_v47 = vadd.f32 %v1272_v1, %v1184_v12  ;;  %2042 = vmatmul.bf16.vlgmr.msra.gmra.mxu1 %v4313_v55 }
 0x21a   :  { %v1521_v36 = vmax.f32 %v1448_v51, 0.0  ;;  %2131 = vmatmul.bf16.vlgmr.msra.gmra.mxu2 %v4311_v54  ;;  %2220 = vmatmul.bf16.vlgmr.msra.gmra.mxu3 %v4313_v55 }
 0x21b   :  { %v1522_v63 = vmax.f32 %v1273_v47, 0.0 }
 0x21c   :  { %v1569_v4 = vpack.c.bf16 %v1521_v36, %v1520_v44 }
 0x21d   :  { %v1361_v9 = vpop.f32.mrf.mxu2  ;;  %v1450_v37 = vpop.f32.mrf.mxu3 }
 0x21e   :  { %v1362_v54 = vadd.f32 %v1361_v9, %v4646_v56  ;;  %v1185_v55 = vpop.f32.mrf.mxu0  ;;  %v2459_v35 = vunpack.c.l.b16 %v1569_v4  ;;  %v2460_v62 = vunpack.c.h.b16 %v1569_v4  ;;  %v1274_v19 = vpop.f32.mrf.mxu1  ;;  %v3951_v4 = vld [vmem:[%s5209_s5 + $0x70] sm:$0xff] }
 0x21f   :  { %v1186_v52 = vadd.f32 %v1185_v55, %v4634_v23  ;;  %3067 = vmatpush.bf16.msrb.mxu1 %v3951_v4 }
 0x220   :  { %v1451_v25 = vadd.f32 %v1450_v37, %v1362_v54  ;;  %v4768_v30 = vpack.c.b16 %v2459_v35, %v2457_v13  ;;  %v4770_v38 = vpack.c.b16 %v2460_v62, %v2458_v33 }
 0x221   :  { %v1275_v28 = vadd.f32 %v1274_v19, %v1186_v52 }
 0x222   :  { %v1523_v21 = vmax.f32 %v1451_v25, 0.0 }
 0x223   :  { %v1524_v47 = vmax.f32 %v1275_v28, 0.0 }
 0x224   :  { %v1570_v12 = vpack.c.bf16 %v1523_v21, %v1522_v63 }
 0x225   :  { %v1363_v1 = vpop.f32.mrf.mxu2  ;;  %v1452_v44 = vpop.f32.mrf.mxu3 }
 0x226   :  { %v1364_v51 = vadd.f32 %v1363_v1, %v4646_v56  ;;  %v1188_v36 = vpop.f32.mrf.mxu0  ;;  %v1277_v57 = vpop.f32.mrf.mxu1  ;;  %v2461_v54 = vunpack.c.l.b16 %v1570_v12  ;;  %v2462_v55 = vunpack.c.h.b16 %v1570_v12 }
 0x227   :  { %v1189_v15 = vadd.f32 %v1188_v36, %v4634_v23 }
 0x228   :  { %v1453_v11 = vadd.f32 %v1452_v44, %v1364_v51  ;;  %1958 = vmatmul.bf16.gmra.mxu0 %v4339_v49 }
 0x229   :  { %v1278_v13 = vadd.f32 %v1277_v57, %v1189_v15  ;;  %2047 = vmatmul.bf16.gmra.mxu1 %v4342_v60 }
 0x22a   :  { %v1525_v9 = vmax.f32 %v1453_v11, 0.0  ;;  %2136 = vmatmul.bf16.gmra.mxu2 %v4339_v49  ;;  %2225 = vmatmul.bf16.gmra.mxu3 %v4342_v60 }
 0x22b   :  { %v1526_v60 = vmax.f32 %v1278_v13, 0.0 }
 0x22c   :  { %v1571_v33 = vpack.c.bf16 %v1525_v9, %v1524_v47 }
 0x22d   :  { %v1366_v37 = vpop.f32.mrf.mxu2  ;;  %v1455_v62 = vpop.f32.mrf.mxu3 }
 0x22e   :  { %v1367_v35 = vadd.f32 %v1366_v37, %v4646_v56  ;;  %v1190_v52 = vpop.f32.mrf.mxu0  ;;  %v2463_v19 = vunpack.c.l.b16 %v1571_v33  ;;  %v2464_v25 = vunpack.c.h.b16 %v1571_v33  ;;  %v1279_v28 = vpop.f32.mrf.mxu1 }
 0x22f   :  { %v1191_v63 = vadd.f32 %v1190_v52, %v4634_v23 }
 0x230   :  { %v1456_v21 = vadd.f32 %v1455_v62, %v1367_v35  ;;  %v4783_v1 = vpack.c.b16 %v2463_v19, %v2461_v54  ;;  %v4785_v51 = vpack.c.b16 %v2464_v25, %v2462_v55  ;;  %v3958_v55 = vld [vmem:[%s5209_s5 + $0xa8] sm:$0xff] }
 0x231   :  { %v1280_v49 = vadd.f32 %v1279_v28, %v1191_v63  ;;  %v3942_v35 = vld [vmem:[%s5209_s5 + $0x28] sm:$0xff]  ;;  %3157 = vmatpush.bf16.msrb.mxu2 %v3958_v55 }
 0x232   :  { %v1527_v44 = vmax.f32 %v1456_v21, 0.0  ;;  %v3966_v62 = vld [vmem:[%s5209_s5 + $0xe8] sm:$0xff]  ;;  %2979 = vmatpush.bf16.msrb.mxu0 %v3942_v35 }
 0x233   :  { %v1528_v54 = vmax.f32 %v1280_v49, 0.0  ;;  %3246 = vmatpush.bf16.msrb.mxu3 %v3966_v62 }
 0x234   :  { %v1572_v36 = vpack.c.bf16 %v1527_v44, %v1526_v60 }
 0x235   :  { %v1368_v4 = vpop.f32.mrf.mxu2  ;;  %v1457_v15 = vpop.f32.mrf.mxu3 }
 0x236   :  { %v1369_v12 = vadd.f32 %v1368_v4, %v4646_v56  ;;  %v1193_v57 = vpop.f32.mrf.mxu0  ;;  %v1282_v47 = vpop.f32.mrf.mxu1  ;;  %v2465_v52 = vunpack.c.l.b16 %v1572_v36  ;;  %v2466_v25 = vunpack.c.h.b16 %v1572_v36 }
 0x237   :  { %v1194_v11 = vadd.f32 %v1193_v57, %v4634_v23 }
 0x238   :  { %v1458_v9 = vadd.f32 %v1457_v15, %v1369_v12  ;;  %1963 = vmatmul.bf16.gmra.mxu0 %v4365_v41 }
 0x239   :  { %v1283_v33 = vadd.f32 %v1282_v47, %v1194_v11  ;;  %2052 = vmatmul.bf16.gmra.mxu1 %v4367_v42 }
 0x23a   :  { %v1529_v37 = vmax.f32 %v1458_v9, 0.0  ;;  %2141 = vmatmul.bf16.gmra.mxu2 %v4365_v41  ;;  %2230 = vmatmul.bf16.gmra.mxu3 %v4367_v42 }
 0x23b   :  { %v1530_v57 = vmax.f32 %v1283_v33, 0.0 }
 0x23c   :  { %v1573_v13 = vpack.c.bf16 %v1529_v37, %v1528_v54 }
 0x23d   :  { %v1371_v19 = vpop.f32.mrf.mxu2  ;;  %v1460_v63 = vpop.f32.mrf.mxu3 }
 0x23e   :  { %v1372_v41 = vadd.f32 %v1371_v19, %v4646_v56  ;;  %v1195_v42 = vpop.f32.mrf.mxu0  ;;  %v2467_v28 = vunpack.c.l.b16 %v1573_v13  ;;  %v2468_v21 = vunpack.c.h.b16 %v1573_v13  ;;  %v1284_v60 = vpop.f32.mrf.mxu1  ;;  %v3950_v13 = vld [vmem:[%s5209_s5 + $0x68] sm:$0xff] }
 0x23f   :  { %v1196_v49 = vadd.f32 %v1195_v42, %v4634_v23  ;;  %3068 = vmatpush.bf16.msrb.mxu1 %v3950_v13 }
 0x240   :  { %v1461_v44 = vadd.f32 %v1460_v63, %v1372_v41  ;;  %v4804_v4 = vpack.c.b16 %v2467_v28, %v2465_v52  ;;  %v4806_v12 = vpack.c.b16 %v2468_v21, %v2466_v25 }
 0x241   :  { %v1285_v15 = vadd.f32 %v1284_v60, %v1196_v49 }
 0x242   :  { %v1531_v36 = vmax.f32 %v1461_v44, 0.0 }
 0x243   :  { %v1532_v33 = vmax.f32 %v1285_v15, 0.0 }
 0x244   :  { %v1574_v11 = vpack.c.bf16 %v1531_v36, %v1530_v57 }
 0x245   :  { %v1373_v47 = vpop.f32.mrf.mxu2  ;;  %v1462_v54 = vpop.f32.mrf.mxu3 }
 0x246   :  { %v1374_v9 = vadd.f32 %v1373_v47, %v4646_v56  ;;  %v1198_v37 = vpop.f32.mrf.mxu0  ;;  %v1287_v35 = vpop.f32.mrf.mxu1  ;;  %v2469_v41 = vunpack.c.l.b16 %v1574_v11  ;;  %v2470_v42 = vunpack.c.h.b16 %v1574_v11 }
 0x247   :  { %v1199_v55 = vadd.f32 %v1198_v37, %v4634_v23 }
 0x248   :  { %v1463_v62 = vadd.f32 %v1462_v54, %v1374_v9  ;;  %1968 = vmatmul.bf16.gmra.mxu0 %v4391_v43 }
 0x249   :  { %v1288_v52 = vadd.f32 %v1287_v35, %v1199_v55  ;;  %2057 = vmatmul.bf16.gmra.mxu1 %v4394_v53 }
 0x24a   :  { %v1533_v19 = vmax.f32 %v1463_v62, 0.0  ;;  %2146 = vmatmul.bf16.gmra.mxu2 %v4391_v43  ;;  %2235 = vmatmul.bf16.gmra.mxu3 %v4394_v53 }
 0x24b   :  { %v1534_v53 = vmax.f32 %v1288_v52, 0.0 }
 0x24c   :  { %v1575_v25 = vpack.c.bf16 %v1533_v19, %v1532_v33 }
 0x24d   :  { %v1376_v63 = vpop.f32.mrf.mxu2  ;;  %v1465_v21 = vpop.f32.mrf.mxu3 }
 0x24e   :  { %v1377_v28 = vadd.f32 %v1376_v63, %v4646_v56  ;;  %v1200_v49 = vpop.f32.mrf.mxu0  ;;  %v2471_v60 = vunpack.c.l.b16 %v1575_v25  ;;  %v2472_v44 = vunpack.c.h.b16 %v1575_v25  ;;  %v1289_v15 = vpop.f32.mrf.mxu1 }
 0x24f   :  { %v1201_v57 = vadd.f32 %v1200_v49, %v4634_v23 }
 0x250   :  { %v1466_v36 = vadd.f32 %v1465_v21, %v1377_v28  ;;  %v4819_v47 = vpack.c.b16 %v2471_v60, %v2469_v41  ;;  %v4821_v9 = vpack.c.b16 %v2472_v44, %v2470_v42  ;;  %v3957_v42 = vld [vmem:[%s5209_s5 + $0xa0] sm:$0xff] }
 0x251   :  { %v1290_v43 = vadd.f32 %v1289_v15, %v1201_v57  ;;  %v3941_v28 = vld [vmem:[%s5209_s5 + $0x20] sm:$0xff]  ;;  %3158 = vmatpush.bf16.msrb.mxu2 %v3957_v42 }
 0x252   :  { %v1535_v54 = vmax.f32 %v1466_v36, 0.0  ;;  %v3965_v21 = vld [vmem:[%s5209_s5 + $0xe0] sm:$0xff]  ;;  %2980 = vmatpush.bf16.msrb.mxu0 %v3941_v28 }
 0x253   :  { %v1536_v41 = vmax.f32 %v1290_v43, 0.0  ;;  %3247 = vmatpush.bf16.msrb.mxu3 %v3965_v21 }
 0x254   :  { %v1576_v37 = vpack.c.bf16 %v1535_v54, %v1534_v53 }
 0x255   :  { %v1378_v13 = vpop.f32.mrf.mxu2  ;;  %v1467_v55 = vpop.f32.mrf.mxu3 }
 0x256   :  { %v1379_v11 = vadd.f32 %v1378_v13, %v4646_v56  ;;  %v1203_v35 = vpop.f32.mrf.mxu0  ;;  %v1292_v33 = vpop.f32.mrf.mxu1  ;;  %v2473_v49 = vunpack.c.l.b16 %v1576_v37  ;;  %v2474_v44 = vunpack.c.h.b16 %v1576_v37 }
 0x257   :  { %v1204_v62 = vadd.f32 %v1203_v35, %v4634_v23 }
 0x258   :  { %v1468_v19 = vadd.f32 %v1467_v55, %v1379_v11  ;;  %1973 = vmatmul.bf16.gmra.mxu0 %v4417_v46 }
 0x259   :  { %v1293_v25 = vadd.f32 %v1292_v33, %v1204_v62  ;;  %2062 = vmatmul.bf16.gmra.mxu1 %v4419_v50 }
 0x25a   :  { %v1537_v63 = vmax.f32 %v1468_v19, 0.0  ;;  %2151 = vmatmul.bf16.gmra.mxu2 %v4417_v46  ;;  %2240 = vmatmul.bf16.gmra.mxu3 %v4419_v50 }
 0x25b   :  { %v1538_v35 = vmax.f32 %v1293_v25, 0.0 }
 0x25c   :  { %v1577_v52 = vpack.c.bf16 %v1537_v63, %v1536_v41 }
 0x25d   :  { %v1381_v60 = vpop.f32.mrf.mxu2  ;;  %v1470_v57 = vpop.f32.mrf.mxu3 }
 0x25e   :  { %v1382_v46 = vadd.f32 %v1381_v60, %v4646_v56  ;;  %v1205_v50 = vpop.f32.mrf.mxu0  ;;  %v2475_v15 = vunpack.c.l.b16 %v1577_v52  ;;  %v2476_v36 = vunpack.c.h.b16 %v1577_v52  ;;  %v1294_v53 = vpop.f32.mrf.mxu1  ;;  %v3949_v52 = vld [vmem:[%s5209_s5 + $0x60] sm:$0xff] }
 0x25f   :  { %v1206_v43 = vadd.f32 %v1205_v50, %v4634_v23  ;;  %3069 = vmatpush.bf16.msrb.mxu1 %v3949_v52 }
 0x260   :  { %v1471_v54 = vadd.f32 %v1470_v57, %v1382_v46  ;;  %v4840_v13 = vpack.c.b16 %v2475_v15, %v2473_v49  ;;  %v4842_v11 = vpack.c.b16 %v2476_v36, %v2474_v44 }
 0x261   :  { %v1295_v55 = vadd.f32 %v1294_v53, %v1206_v43 }
 0x262   :  { %v1539_v37 = vmax.f32 %v1471_v54, 0.0 }
 0x263   :  { %v1540_v25 = vmax.f32 %v1295_v55, 0.0 }
 0x264   :  { %v1578_v62 = vpack.c.bf16 %v1539_v37, %v1538_v35 }
 0x265   :  { %v1383_v33 = vpop.f32.mrf.mxu2  ;;  %v1472_v41 = vpop.f32.mrf.mxu3 }
 0x266   :  { %v1384_v19 = vadd.f32 %v1383_v33, %v4646_v56  ;;  %v1208_v63 = vpop.f32.mrf.mxu0  ;;  %v1297_v28 = vpop.f32.mrf.mxu1  ;;  %v2477_v46 = vunpack.c.l.b16 %v1578_v62  ;;  %v2478_v50 = vunpack.c.h.b16 %v1578_v62 }
 0x267   :  { %v1209_v42 = vadd.f32 %v1208_v63, %v4634_v23 }
 0x268   :  { %v1473_v21 = vadd.f32 %v1472_v41, %v1384_v19  ;;  %1978 = vmatmul.bf16.gmra.mxu0 %v4443_v2 }
 0x269   :  { %v1298_v49 = vadd.f32 %v1297_v28, %v1209_v42  ;;  %2067 = vmatmul.bf16.gmra.mxu1 %v4446_v8 }
 0x26a   :  { %v1541_v60 = vmax.f32 %v1473_v21, 0.0  ;;  %2156 = vmatmul.bf16.gmra.mxu2 %v4443_v2  ;;  %2245 = vmatmul.bf16.gmra.mxu3 %v4446_v8 }
 0x26b   :  { %v1542_v8 = vmax.f32 %v1298_v49, 0.0 }
 0x26c   :  { %v1579_v44 = vpack.c.bf16 %v1541_v60, %v1540_v25 }
 0x26d   :  { %v1386_v57 = vpop.f32.mrf.mxu2  ;;  %v1475_v36 = vpop.f32.mrf.mxu3 }
 0x26e   :  { %v1387_v15 = vadd.f32 %v1386_v57, %v4646_v56  ;;  %v1210_v43 = vpop.f32.mrf.mxu0  ;;  %v2479_v53 = vunpack.c.l.b16 %v1579_v44  ;;  %v2480_v54 = vunpack.c.h.b16 %v1579_v44  ;;  %v1299_v55 = vpop.f32.mrf.mxu1 }
 0x26f   :  { %v1211_v35 = vadd.f32 %v1210_v43, %v4634_v23 }
 0x270   :  { %v1476_v37 = vadd.f32 %v1475_v36, %v1387_v15  ;;  %v4855_v33 = vpack.c.b16 %v2479_v53, %v2477_v46  ;;  %v4857_v19 = vpack.c.b16 %v2480_v54, %v2478_v50  ;;  %v3956_v50 = vld [vmem:[%s5209_s5 + $0x98] sm:$0xff] }
 0x271   :  { %v1300_v2 = vadd.f32 %v1299_v55, %v1211_v35  ;;  %v3940_v15 = vld [vmem:[%s5209_s5 + $0x18] sm:$0xff]  ;;  %3159 = vmatpush.bf16.msrb.mxu2 %v3956_v50 }
 0x272   :  { %v1543_v41 = vmax.f32 %v1476_v37, 0.0  ;;  %v3964_v36 = vld [vmem:[%s5209_s5 + $0xd8] sm:$0xff]  ;;  %2981 = vmatpush.bf16.msrb.mxu0 %v3940_v15 }
 0x273   :  { %v1544_v46 = vmax.f32 %v1300_v2, 0.0  ;;  %3248 = vmatpush.bf16.msrb.mxu3 %v3964_v36 }
 0x274   :  { %v1580_v63 = vpack.c.bf16 %v1543_v41, %v1542_v8 }
 0x275   :  { %v1388_v52 = vpop.f32.mrf.mxu2  ;;  %v1477_v42 = vpop.f32.mrf.mxu3 }
 0x276   :  { %v1389_v62 = vadd.f32 %v1388_v52, %v4646_v56  ;;  %v1213_v28 = vpop.f32.mrf.mxu0  ;;  %v1302_v25 = vpop.f32.mrf.mxu1  ;;  %v2481_v43 = vunpack.c.l.b16 %v1580_v63  ;;  %v2482_v54 = vunpack.c.h.b16 %v1580_v63 }
 0x277   :  { %v1214_v21 = vadd.f32 %v1213_v28, %v4634_v23 }
 0x278   :  { %v1478_v60 = vadd.f32 %v1477_v42, %v1389_v62  ;;  %1983 = vmatmul.bf16.gmra.mxu0 %v4469_v17 }
 0x279   :  { %v1303_v44 = vadd.f32 %v1302_v25, %v1214_v21  ;;  %2072 = vmatmul.bf16.gmra.mxu1 %v4471_v18 }
 0x27a   :  { %v1545_v57 = vmax.f32 %v1478_v60, 0.0  ;;  %2161 = vmatmul.bf16.gmra.mxu2 %v4469_v17  ;;  %2250 = vmatmul.bf16.gmra.mxu3 %v4471_v18 }
 0x27b   :  { %v1546_v28 = vmax.f32 %v1303_v44, 0.0 }
 0x27c   :  { %v1581_v49 = vpack.c.bf16 %v1545_v57, %v1544_v46 }
 0x27d   :  { %v1391_v53 = vpop.f32.mrf.mxu2  ;;  %v1480_v35 = vpop.f32.mrf.mxu3 }
 0x27e   :  { %v1392_v17 = vadd.f32 %v1391_v53, %v4646_v56  ;;  %v1215_v18 = vpop.f32.mrf.mxu0  ;;  %v2483_v55 = vunpack.c.l.b16 %v1581_v49  ;;  %v2484_v37 = vunpack.c.h.b16 %v1581_v49  ;;  %v1304_v8 = vpop.f32.mrf.mxu1  ;;  %v3948_v49 = vld [vmem:[%s5209_s5 + $0x58] sm:$0xff] }
 0x27f   :  { %v1216_v2 = vadd.f32 %v1215_v18, %v4634_v23  ;;  %3070 = vmatpush.bf16.msrb.mxu1 %v3948_v49 }
 0x280   :  { %v1481_v41 = vadd.f32 %v1480_v35, %v1392_v17  ;;  %v4876_v52 = vpack.c.b16 %v2483_v55, %v2481_v43  ;;  %v4878_v62 = vpack.c.b16 %v2484_v37, %v2482_v54 }
 0x281   :  { %v1305_v42 = vadd.f32 %v1304_v8, %v1216_v2 }
 0x282   :  { %5228 = vst [vmem:[#allocation20_spill] sm:$0xff] %v4876_v52  ;;  %v1547_v63 = vmax.f32 %v1481_v41, 0.0 }
 0x283   :  { %5229 = vst [vmem:[#allocation21_spill] sm:$0xff] %v4878_v62  ;;  %v1548_v44 = vmax.f32 %v1305_v42, 0.0 }
 0x284   :  { %v1582_v21 = vpack.c.bf16 %v1547_v63, %v1546_v28  ;;  %v3976_v63 = vld [vmem:[#allocation5] sm:$0xf] }
 0x285   :  { %v1393_v25 = vpop.f32.mrf.mxu2  ;;  %v1482_v46 = vpop.f32.mrf.mxu3 }
 0x286   :  { %v1394_v60 = vadd.f32 %v1393_v25, %v4646_v56  ;;  %v1218_v57 = vpop.f32.mrf.mxu0  ;;  %v1307_v15 = vpop.f32.mrf.mxu1  ;;  %v2485_v17 = vunpack.c.l.b16 %v1582_v21  ;;  %v2486_v18 = vunpack.c.h.b16 %v1582_v21  ;;  %v1619_v25 = vperm.slane %v3976_v63, 1 }
 0x287   :  { %v1219_v50 = vadd.f32 %v1218_v57, %v4634_v23 }
 0x288   :  { %v1483_v36 = vadd.f32 %v1482_v46, %v1394_v60  ;;  %1988 = vmatmul.bf16.gmra.mxu0 %v4489_v40  ;;  %v4895_v21 = vperm.slane %v1619_v25, 1 }
 0x289   :  { %v1308_v43 = vadd.f32 %v1307_v15, %v1219_v50  ;;  %2077 = vmatmul.bf16.gmra.mxu1 %v4492_v61 }
 0x28a   :  { %v1549_v53 = vmax.f32 %v1483_v36, 0.0  ;;  %2166 = vmatmul.bf16.gmra.mxu2 %v4489_v40  ;;  %2255 = vmatmul.bf16.gmra.mxu3 %v4492_v61 }
 0x28b   :  { %v1550_v57 = vmax.f32 %v1308_v43, 0.0 }
 0x28c   :  { %v1583_v54 = vpack.c.bf16 %v1549_v53, %v1548_v44 }
 0x28d   :  { %v1396_v35 = vpop.f32.mrf.mxu2  ;;  %v1485_v37 = vpop.f32.mrf.mxu3 }
 0x28e   :  { %v1397_v55 = vadd.f32 %v1396_v35, %v4646_v56  ;;  %v1220_v2 = vpop.f32.mrf.mxu0  ;;  %v2487_v8 = vunpack.c.l.b16 %v1583_v54  ;;  %v2488_v41 = vunpack.c.h.b16 %v1583_v54  ;;  %v1309_v42 = vpop.f32.mrf.mxu1 }
 0x28f   :  { %v1221_v28 = vadd.f32 %v1220_v2, %v4634_v23  ;;  %v1620_v23 = vperm.slane %v3976_v63, 3  ;;  %v3955_v2 = vld [vmem:[%s5209_s5 + $0x90] sm:$0xff] }
 0x290   :  { %v1486_v60 = vadd.f32 %v1485_v37, %v1397_v55  ;;  %v4891_v46 = vpack.c.b16 %v2487_v8, %v2485_v17  ;;  %v4893_v40 = vpack.c.b16 %v2488_v41, %v2486_v18  ;;  %v3939_v8 = vld [vmem:[%s5209_s5 + $0x10] sm:$0xff]  ;;  %3160 = vmatpush.bf16.msrb.mxu2 %v3955_v2 }
 0x291   :  { %v1310_v61 = vadd.f32 %v1309_v42, %v1221_v28  ;;  %v4902_v43 = vperm.slane %v1620_v23, 1  ;;  %v3963_v41 = vld [vmem:[%s5209_s5 + $0xd0] sm:$0xff]  ;;  %2982 = vmatpush.bf16.msrb.mxu0 %v3939_v8 }
 0x292   :  { %5230 = vst [vmem:[#allocation22_spill] sm:$0xff] %v4891_v46  ;;  %v1551_v49 = vmax.f32 %v1486_v60, 0.0  ;;  %3249 = vmatpush.bf16.msrb.mxu3 %v3963_v41 }
 0x293   :  { %5231 = vst [vmem:[#allocation23_spill] sm:$0xff] %v4893_v40  ;;  %v1552_v18 = vmax.f32 %v1310_v61, 0.0  ;;  %v5238_v40 = vld [vmem:[#allocation16_spill] sm:$0xff] }
 0x294   :  { %v1584_v50 = vpack.c.bf16 %v1551_v49, %v1550_v57 }
 0x295   :  { %v1398_v15 = vpop.f32.mrf.mxu2  ;;  %v1487_v44 = vpop.f32.mrf.mxu3 }
 0x296   :  { %v1399_v36 = vadd.f32 %v1398_v15, %v4646_v56  ;;  %v1954_v53 = vpop.f32.mrf.mxu0  ;;  %v2043_v35 = vpop.f32.mrf.mxu1  ;;  %v2489_v28 = vunpack.c.l.b16 %v1584_v50 }
 0x297   :  { %v1955_v54 = vadd.f32 %v1954_v53, %v4895_v21 }
 0x298   :  { %v1488_v55 = vadd.f32 %v1487_v44, %v1399_v36  ;;  %1993 = vmatmul.bf16.gmra.mxu0 %v4509_v26 }
 0x299   :  { %v2044_v17 = vadd.f32 %v2043_v35, %v1955_v54  ;;  %2082 = vmatmul.bf16.gmra.mxu1 %v4511_v20 }
 0x29a   :  { %v1553_v37 = vmax.f32 %v1488_v55, 0.0  ;;  %2171 = vmatmul.bf16.gmra.mxu2 %v4509_v26  ;;  %2260 = vmatmul.bf16.gmra.mxu3 %v4511_v20  ;;  %v2490_v26 = vunpack.c.h.b16 %v1584_v50 }
 0x29b   :  { %v2301_v23 = vmax.f32 %v2044_v17, 0.0 }
 0x29c   :  { %v1585_v56 = vpack.c.bf16 %v1553_v37, %v1552_v18 }
 0x29d   :  { %v2132_v42 = vpop.f32.mrf.mxu2  ;;  %v2221_v25 = vpop.f32.mrf.mxu3 }
 0x29e   :  { %v2133_v63 = vadd.f32 %v2132_v42, %v4902_v43  ;;  %v1956_v20 = vpop.f32.mrf.mxu0  ;;  %v2491_v60 = vunpack.c.l.b16 %v1585_v56  ;;  %v2492_v61 = vunpack.c.h.b16 %v1585_v56  ;;  %v2045_v49 = vpop.f32.mrf.mxu1  ;;  %v3947_v56 = vld [vmem:[%s5209_s5 + $0x50] sm:$0xff]  ;;  %v5234_v42 = vld [vmem:[#allocation12_spill] sm:$0xff] }
 0x29f   :  { %v1957_v57 = vadd.f32 %v1956_v20, %v4895_v21  ;;  %3071 = vmatpush.bf16.msrb.mxu1 %v3947_v56 }
 0x2a0   :  { %v2222_v15 = vadd.f32 %v2221_v25, %v2133_v63  ;;  %v4916_v36 = vpack.c.b16 %v2491_v60, %v2489_v28  ;;  %v4918_v44 = vpack.c.b16 %v2492_v61, %v2490_v26  ;;  %v5235_v63 = vld [vmem:[#allocation13_spill] sm:$0xff] }
 0x2a1   :  { %v2046_v53 = vadd.f32 %v2045_v49, %v1957_v57 }
 0x2a2   :  { %5232 = vst [vmem:[#allocation24_spill] sm:$0xff] %v4916_v36  ;;  %v2302_v50 = vmax.f32 %v2222_v15, 0.0 }
 0x2a3   :  { %5233 = vst [vmem:[#allocation25_spill] sm:$0xff] %v4918_v44  ;;  %v2303_v17 = vmax.f32 %v2046_v53, 0.0  ;;  %v5236_v44 = vld [vmem:[#allocation14_spill] sm:$0xff] }
 0x2a4   :  { %v2365_v54 = vpack.c.bf16 %v2302_v50, %v2301_v23 }
 0x2a5   :  { %v2134_v35 = vpop.f32.mrf.mxu2  ;;  %v2223_v18 = vpop.f32.mrf.mxu3 }
 0x2a6   :  { %v2135_v55 = vadd.f32 %v2134_v35, %v4902_v43  ;;  %v1959_v37 = vpop.f32.mrf.mxu0  ;;  %v2048_v8 = vpop.f32.mrf.mxu1  ;;  %v2589_v20 = vunpack.c.l.b16 %v2365_v54  ;;  %v2590_v61 = vunpack.c.h.b16 %v2365_v54 }
 0x2a7   :  { %v1960_v2 = vadd.f32 %v1959_v37, %v4895_v21 }
 0x2a8   :  { %v2224_v41 = vadd.f32 %v2223_v18, %v2135_v55  ;;  %1998 = vmatmul.bf16.gmra.mxu0 %v5234_v42 }
 0x2a9   :  { %v2049_v28 = vadd.f32 %v2048_v8, %v1960_v2  ;;  %2087 = vmatmul.bf16.gmra.mxu1 %v5235_v63 }
 0x2aa   :  { %v2304_v26 = vmax.f32 %v2224_v41, 0.0  ;;  %2176 = vmatmul.bf16.gmra.mxu2 %v5234_v42  ;;  %2265 = vmatmul.bf16.gmra.mxu3 %v5235_v63 }
 0x2ab   :  { %v2305_v2 = vmax.f32 %v2049_v28, 0.0 }
 0x2ac   :  { %v2366_v25 = vpack.c.bf16 %v2304_v26, %v2303_v17 }
 0x2ad   :  { %v2137_v60 = vpop.f32.mrf.mxu2  ;;  %v2226_v23 = vpop.f32.mrf.mxu3 }
 0x2ae   :  { %v2591_v57 = vunpack.c.l.b16 %v2366_v25  ;;  %v2592_v49 = vunpack.c.h.b16 %v2366_v25  ;;  %v2138_v15 = vadd.f32 %v2137_v60, %v4902_v43  ;;  %v1961_v50 = vpop.f32.mrf.mxu0  ;;  %v2050_v53 = vpop.f32.mrf.mxu1 }
 0x2af   :  { %v1962_v35 = vadd.f32 %v1961_v50, %v4895_v21 }
 0x2b0   :  { %v4931_v55 = vpack.c.b16 %v2591_v57, %v2589_v20  ;;  %v4933_v18 = vpack.c.b16 %v2592_v49, %v2590_v61  ;;  %v2227_v37 = vadd.f32 %v2226_v23, %v2138_v15  ;;  %v5237_v57 = vld [vmem:[#allocation15_spill] sm:$0xff]  ;;  %v3954_v49 = vld [vmem:[%s5209_s5 + $0x88] sm:$0xff] }
 0x2b1   :  { %v2051_v56 = vadd.f32 %v2050_v53, %v1962_v35  ;;  %v3938_v15 = vld [vmem:[%s5209_s5 + $0x8] sm:$0xff]  ;;  %3161 = vmatpush.bf16.msrb.mxu2 %v3954_v49 }
 0x2b2   :  { %v2306_v8 = vmax.f32 %v2227_v37, 0.0  ;;  %v3962_v23 = vld [vmem:[%s5209_s5 + $0xc8] sm:$0xff]  ;;  %2983 = vmatpush.bf16.msrb.mxu0 %v3938_v15 }
 0x2b3   :  { %v2307_v20 = vmax.f32 %v2051_v56, 0.0  ;;  %3250 = vmatpush.bf16.msrb.mxu3 %v3962_v23 }
 0x2b4   :  { %v2367_v41 = vpack.c.bf16 %v2306_v8, %v2305_v2 }
 0x2b5   :  { %v2139_v42 = vpop.f32.mrf.mxu2  ;;  %v2228_v17 = vpop.f32.mrf.mxu3 }
 0x2b6   :  { %v2140_v54 = vadd.f32 %v2139_v42, %v4902_v43  ;;  %v1964_v26 = vpop.f32.mrf.mxu0  ;;  %v2053_v25 = vpop.f32.mrf.mxu1  ;;  %v2593_v35 = vunpack.c.l.b16 %v2367_v41  ;;  %v2594_v37 = vunpack.c.h.b16 %v2367_v41 }
 0x2b7   :  { %v1965_v63 = vadd.f32 %v1964_v26, %v4895_v21 }
 0x2b8   :  { %v2229_v60 = vadd.f32 %v2228_v17, %v2140_v54  ;;  %2003 = vmatmul.bf16.gmra.mxu0 %v5236_v44 }
 0x2b9   :  { %v2054_v50 = vadd.f32 %v2053_v25, %v1965_v63  ;;  %2092 = vmatmul.bf16.gmra.mxu1 %v5237_v57 }
 0x2ba   :  { %v2308_v61 = vmax.f32 %v2229_v60, 0.0  ;;  %2181 = vmatmul.bf16.gmra.mxu2 %v5236_v44  ;;  %2270 = vmatmul.bf16.gmra.mxu3 %v5237_v57 }
 0x2bc   :  { %v2368_v28 = vpack.c.bf16 %v2308_v61, %v2307_v20  ;;  %v2309_v20 = vmax.f32 %v2054_v50, 0.0 }
 0x2bd   :  { %v2142_v53 = vpop.f32.mrf.mxu2  ;;  %v2231_v56 = vpop.f32.mrf.mxu3 }
 0x2be   :  { %v2143_v44 = vadd.f32 %v2142_v53, %v4902_v43  ;;  %v1966_v2 = vpop.f32.mrf.mxu0  ;;  %v2595_v8 = vunpack.c.l.b16 %v2368_v28  ;;  %v2596_v42 = vunpack.c.h.b16 %v2368_v28  ;;  %v2055_v17 = vpop.f32.mrf.mxu1  ;;  %v3946_v28 = vld [vmem:[%s5209_s5 + $0x48] sm:$0xff] }
 0x2bf   :  { %v1967_v54 = vadd.f32 %v1966_v2, %v4895_v21  ;;  %3072 = vmatpush.bf16.msrb.mxu1 %v3946_v28 }
 0x2c0   :  { %v2232_v26 = vadd.f32 %v2231_v56, %v2143_v44  ;;  %v4952_v63 = vpack.c.b16 %v2595_v8, %v2593_v35  ;;  %v4954_v25 = vpack.c.b16 %v2596_v42, %v2594_v37 }
 0x2c1   :  { %v2056_v60 = vadd.f32 %v2055_v17, %v1967_v54 }
 0x2c2   :  { %v2310_v41 = vmax.f32 %v2232_v26, 0.0 }
 0x2c3   :  { %v2311_v50 = vmax.f32 %v2056_v60, 0.0 }
 0x2c4   :  { %v2369_v61 = vpack.c.bf16 %v2310_v41, %v2309_v20 }
 0x2c5   :  { %v2144_v57 = vpop.f32.mrf.mxu2  ;;  %v2233_v49 = vpop.f32.mrf.mxu3 }
 0x2c6   :  { %v2145_v53 = vadd.f32 %v2144_v57, %v4902_v43  ;;  %v1969_v15 = vpop.f32.mrf.mxu0  ;;  %v2058_v44 = vpop.f32.mrf.mxu1  ;;  %v2597_v8 = vunpack.c.l.b16 %v2369_v61  ;;  %v2598_v54 = vunpack.c.h.b16 %v2369_v61 }
 0x2c7   :  { %v1970_v23 = vadd.f32 %v1969_v15, %v4895_v21 }
 0x2c8   :  { %v2234_v35 = vadd.f32 %v2233_v49, %v2145_v53  ;;  %2008 = vmatmul.bf16.gmra.mxu0 %v4569_v22 }
 0x2c9   :  { %v2059_v37 = vadd.f32 %v2058_v44, %v1970_v23  ;;  %2097 = vmatmul.bf16.gmra.mxu1 %v4572_v34 }
 0x2ca   :  { %v2312_v56 = vmax.f32 %v2234_v35, 0.0  ;;  %2186 = vmatmul.bf16.gmra.mxu2 %v4569_v22  ;;  %2275 = vmatmul.bf16.gmra.mxu3 %v4572_v34 }
 0x2cb   :  { %v2313_v34 = vmax.f32 %v2059_v37, 0.0 }
 0x2cc   :  { %v2370_v2 = vpack.c.bf16 %v2312_v56, %v2311_v50 }
 0x2cd   :  { %v2147_v42 = vpop.f32.mrf.mxu2  ;;  %v2236_v26 = vpop.f32.mrf.mxu3 }
 0x2ce   :  { %v2148_v17 = vadd.f32 %v2147_v42, %v4902_v43  ;;  %v1971_v20 = vpop.f32.mrf.mxu0  ;;  %v2599_v41 = vunpack.c.l.b16 %v2370_v2  ;;  %v2600_v57 = vunpack.c.h.b16 %v2370_v2  ;;  %v2060_v60 = vpop.f32.mrf.mxu1 }
 0x2cf   :  { %v1972_v53 = vadd.f32 %v1971_v20, %v4895_v21 }
 0x2d0   :  { %v2237_v49 = vadd.f32 %v2236_v26, %v2148_v17  ;;  %v4967_v15 = vpack.c.b16 %v2599_v41, %v2597_v8  ;;  %v4969_v28 = vpack.c.b16 %v2600_v57, %v2598_v54  ;;  %v5239_v54 = vld [vmem:[#allocation17_spill] sm:$0xff]  ;;  %v3953_v26 = vld [vmem:[%s5209_s5 + $0x80] sm:$0xff] }
 0x2d1   :  { %v2061_v22 = vadd.f32 %v2060_v60, %v1972_v53  ;;  %v3937_v41 = vld [vmem:[%s5209_s5] sm:$0xff]  ;;  %3162 = vmatpush.bf16.msrb.mxu2 %v3953_v26 }
 0x2d2   :  { %v2314_v23 = vmax.f32 %v2237_v49, 0.0  ;;  %v3961_v57 = vld [vmem:[%s5209_s5 + $0xc0] sm:$0xff]  ;;  %2984 = vmatpush.bf16.msrb.mxu0 %v3937_v41 }
 0x2d3   :  { %v2315_v8 = vmax.f32 %v2061_v22, 0.0  ;;  %3251 = vmatpush.bf16.msrb.mxu3 %v3961_v57 }
 0x2d4   :  { %v2371_v44 = vpack.c.bf16 %v2314_v23, %v2313_v34 }
 0x2d5   :  { %v2149_v35 = vpop.f32.mrf.mxu2  ;;  %v2238_v50 = vpop.f32.mrf.mxu3 }
 0x2d6   :  { %v2150_v61 = vadd.f32 %v2149_v35, %v4902_v43  ;;  %v1974_v56 = vpop.f32.mrf.mxu0  ;;  %v2063_v2 = vpop.f32.mrf.mxu1  ;;  %v2602_v60 = vunpack.c.h.b16 %v2371_v44 }
 0x2d7   :  { %v1975_v42 = vadd.f32 %v1974_v56, %v4895_v21 }
 0x2d8   :  { %v2239_v36 = vadd.f32 %v2238_v50, %v2150_v61  ;;  %2013 = vmatmul.bf16.gmra.mxu0 %v5238_v40 }
 0x2d9   :  { %v2064_v20 = vadd.f32 %v2063_v2, %v1975_v42  ;;  %2102 = vmatmul.bf16.gmra.mxu1 %v5239_v54 }
 0x2da   :  { %v2316_v17 = vmax.f32 %v2239_v36, 0.0  ;;  %2191 = vmatmul.bf16.gmra.mxu2 %v5238_v40  ;;  %2280 = vmatmul.bf16.gmra.mxu3 %v5239_v54  ;;  %v2601_v36 = vunpack.c.l.b16 %v2371_v44 }
 0x2dc   :  { %v2372_v37 = vpack.c.bf16 %v2316_v17, %v2315_v8  ;;  %v2317_v8 = vmax.f32 %v2064_v20, 0.0 }
 0x2dd   :  { %v2152_v53 = vpop.f32.mrf.mxu2  ;;  %v2241_v49 = vpop.f32.mrf.mxu3 }
 0x2de   :  { %v2153_v40 = vadd.f32 %v2152_v53, %v4902_v43  ;;  %v1976_v22 = vpop.f32.mrf.mxu0  ;;  %v2603_v34 = vunpack.c.l.b16 %v2372_v37  ;;  %v2604_v23 = vunpack.c.h.b16 %v2372_v37  ;;  %v2065_v61 = vpop.f32.mrf.mxu1  ;;  %v3945_v37 = vld [vmem:[%s5209_s5 + $0x40] sm:$0xff]  ;;  %s4084_s5 = smov [#allocation8]  }
 0x2df   :  { %v1977_v35 = vadd.f32 %v1976_v22, %v4895_v21  ;;  %3073 = vmatpush.bf16.msrb.mxu1 %v3945_v37  ;;  %s3369_s6 = sshll.u32 %s4084_s5, 4  ;;  %s3370_s6 = int_to_ptr.vmem [resolvable:$true] %s3369_s6 }
 0x2e0   :  { %v2242_v50 = vadd.f32 %v2241_v49, %v2153_v40  ;;  %v4988_v56 = vpack.c.b16 %v2603_v34, %v2601_v36  ;;  %v4990_v42 = vpack.c.b16 %v2604_v23, %v2602_v60  ;;  %v5240_v49 = vld [vmem:[#allocation18_spill] sm:$0xff]  ;;  %v5241_v34 = vld [vmem:[#allocation19_spill] sm:$0xff] }
 0x2e1   :  { %v2066_v2 = vadd.f32 %v2065_v61, %v1977_v35 }
 0x2e2   :  { %v2318_v44 = vmax.f32 %v2242_v50, 0.0 }
 0x2e3   :  { %v2319_v20 = vmax.f32 %v2066_v2, 0.0 }
 0x2e4   :  { %v2373_v17 = vpack.c.bf16 %v2318_v44, %v2317_v8 }
 0x2e5   :  { %v2154_v54 = vpop.f32.mrf.mxu2  ;;  %v2243_v26 = vpop.f32.mrf.mxu3 }
 0x2e6   :  { %v2155_v53 = vadd.f32 %v2154_v54, %v4902_v43  ;;  %v1979_v41 = vpop.f32.mrf.mxu0  ;;  %v2068_v40 = vpop.f32.mrf.mxu1  ;;  %v2605_v35 = vunpack.c.l.b16 %v2373_v17  ;;  %v2606_v50 = vunpack.c.h.b16 %v2373_v17 }
 0x2e7   :  { %v1980_v57 = vadd.f32 %v1979_v41, %v4895_v21 }
 0x2e8   :  { %v2244_v36 = vadd.f32 %v2243_v26, %v2155_v53  ;;  %2018 = vmatmul.bf16.gmra.mxu0 %v5240_v49 }
 0x2e9   :  { %v2069_v60 = vadd.f32 %v2068_v40, %v1980_v57  ;;  %2107 = vmatmul.bf16.gmra.mxu1 %v5241_v34 }
 0x2ea   :  { %v2320_v22 = vmax.f32 %v2244_v36, 0.0  ;;  %2196 = vmatmul.bf16.gmra.mxu2 %v5240_v49  ;;  %2285 = vmatmul.bf16.gmra.mxu3 %v5241_v34 }
 0x2eb   :  { %v2321_v49 = vmax.f32 %v2069_v60, 0.0 }
 0x2ec   :  { %v2374_v23 = vpack.c.bf16 %v2320_v22, %v2319_v20 }
 0x2ed   :  { %v2157_v61 = vpop.f32.mrf.mxu2  ;;  %v2246_v44 = vpop.f32.mrf.mxu3 }
 0x2ee   :  { %v2158_v8 = vadd.f32 %v2157_v61, %v4902_v43  ;;  %v1981_v54 = vpop.f32.mrf.mxu0  ;;  %v2607_v53 = vunpack.c.l.b16 %v2374_v23  ;;  %v2608_v26 = vunpack.c.h.b16 %v2374_v23  ;;  %v2070_v2 = vpop.f32.mrf.mxu1 }
 0x2ef   :  { %v1982_v41 = vadd.f32 %v1981_v54, %v4895_v21 }
 0x2f0   :  { %v2247_v37 = vadd.f32 %v2246_v44, %v2158_v8  ;;  %v5003_v57 = vpack.c.b16 %v2607_v53, %v2605_v35  ;;  %v5005_v40 = vpack.c.b16 %v2608_v26, %v2606_v50 }
 0x2f1   :  { %v2071_v36 = vadd.f32 %v2070_v2, %v1982_v41 }
 0x2f2   :  { %v2322_v20 = vmax.f32 %v2247_v37, 0.0 }
 0x2f3   :  { %v2323_v35 = vmax.f32 %v2071_v36, 0.0 }
 0x2f4   :  { %v2375_v22 = vpack.c.bf16 %v2322_v20, %v2321_v49 }
 0x2f5   :  { %v2159_v34 = vpop.f32.mrf.mxu2  ;;  %v2248_v61 = vpop.f32.mrf.mxu3 }
 0x2f6   :  { %v2160_v17 = vadd.f32 %v2159_v34, %v4902_v43  ;;  %v1984_v46 = vpop.f32.mrf.mxu0  ;;  %v2073_v23 = vpop.f32.mrf.mxu1  ;;  %v2609_v50 = vunpack.c.l.b16 %v2375_v22  ;;  %v2610_v53 = vunpack.c.h.b16 %v2375_v22 }
 0x2f7   :  { %v1985_v62 = vadd.f32 %v1984_v46, %v4895_v21 }
 0x2f8   :  { %v2249_v52 = vadd.f32 %v2248_v61, %v2160_v17  ;;  %2023 = vmatmul.bf16.gmra.mxu0 %v4629_v58 }
 0x2f9   :  { %v2074_v54 = vadd.f32 %v2073_v23, %v1985_v62  ;;  %2112 = vmatmul.bf16.gmra.mxu1 %v4631_v3 }
 0x2fa   :  { %v2324_v8 = vmax.f32 %v2249_v52, 0.0  ;;  %2201 = vmatmul.bf16.gmra.mxu2 %v4629_v58  ;;  %2290 = vmatmul.bf16.gmra.mxu3 %v4631_v3 }
 0x2fb   :  { %v2325_v3 = vmax.f32 %v2074_v54, 0.0 }
 0x2fc   :  { %v2376_v60 = vpack.c.bf16 %v2324_v8, %v2323_v35 }
 0x2fd   :  { %v2162_v44 = vpop.f32.mrf.mxu2  ;;  %v2251_v46 = vpop.f32.mrf.mxu3 }
 0x2fe   :  { %v2163_v26 = vadd.f32 %v2162_v44, %v4902_v43  ;;  %v1986_v41 = vpop.f32.mrf.mxu0  ;;  %v2611_v2 = vunpack.c.l.b16 %v2376_v60  ;;  %v2612_v62 = vunpack.c.h.b16 %v2376_v60  ;;  %v2075_v36 = vpop.f32.mrf.mxu1 }
 0x2ff   :  { %v1987_v37 = vadd.f32 %v1986_v41, %v4895_v21 }
 0x300   :  { %v2252_v52 = vadd.f32 %v2251_v46, %v2163_v26  ;;  %v5015_v49 = vpack.c.b16 %v2611_v2, %v2609_v50  ;;  %v5017_v20 = vpack.c.b16 %v2612_v62, %v2610_v53 }
 0x301   :  { %v2076_v58 = vadd.f32 %v2075_v36, %v1987_v37 }
 0x302   :  { %v2326_v34 = vmax.f32 %v2252_v52, 0.0 }
 0x303   :  { %v2327_v50 = vmax.f32 %v2076_v58, 0.0 }
 0x304   :  { %v2377_v17 = vpack.c.bf16 %v2326_v34, %v2325_v3 }
 0x305   :  { %v2164_v61 = vpop.f32.mrf.mxu2  ;;  %v2253_v23 = vpop.f32.mrf.mxu3 }
 0x306   :  { %v2165_v22 = vadd.f32 %v2164_v61, %v4902_v43  ;;  %v1989_v35 = vpop.f32.mrf.mxu0  ;;  %v2078_v60 = vpop.f32.mrf.mxu1  ;;  %v2613_v53 = vunpack.c.l.b16 %v2377_v17  ;;  %v2614_v2 = vunpack.c.h.b16 %v2377_v17 }
 0x307   :  { %v1990_v8 = vadd.f32 %v1989_v35, %v4895_v21 }
 0x308   :  { %v2254_v44 = vadd.f32 %v2253_v23, %v2165_v22  ;;  %2028 = vmatmul.bf16.gmra.mxu0 %v4651_v48 }
 0x309   :  { %v2079_v41 = vadd.f32 %v2078_v60, %v1990_v8  ;;  %2117 = vmatmul.bf16.gmra.mxu1 %v4653_v45 }
 0x30a   :  { %v2328_v26 = vmax.f32 %v2254_v44, 0.0  ;;  %2206 = vmatmul.bf16.gmra.mxu2 %v4651_v48  ;;  %2295 = vmatmul.bf16.gmra.mxu3 %v4653_v45 }
 0x30b   :  { %v2329_v45 = vmax.f32 %v2079_v41, 0.0 }
 0x30c   :  { %v2378_v54 = vpack.c.bf16 %v2328_v26, %v2327_v50 }
 0x30d   :  { %v2167_v46 = vpop.f32.mrf.mxu2  ;;  %v2256_v37 = vpop.f32.mrf.mxu3 }
 0x30e   :  { %v2168_v62 = vadd.f32 %v2167_v46, %v4902_v43  ;;  %v1991_v36 = vpop.f32.mrf.mxu0  ;;  %v2615_v52 = vunpack.c.l.b16 %v2378_v54  ;;  %v2616_v3 = vunpack.c.h.b16 %v2378_v54  ;;  %v2080_v58 = vpop.f32.mrf.mxu1 }
 0x30f   :  { %v1992_v34 = vadd.f32 %v1991_v36, %v4895_v21 }
 0x310   :  { %v2257_v61 = vadd.f32 %v2256_v37, %v2168_v62  ;;  %v5027_v22 = vpack.c.b16 %v2615_v52, %v2613_v53  ;;  %v5029_v23 = vpack.c.b16 %v2616_v3, %v2614_v2 }
 0x311   :  { %v2081_v48 = vadd.f32 %v2080_v58, %v1992_v34 }
 0x312   :  { %v2330_v35 = vmax.f32 %v2257_v61, 0.0 }
 0x313   :  { %v2331_v53 = vmax.f32 %v2081_v48, 0.0 }
 0x314   :  { %v2379_v8 = vpack.c.bf16 %v2330_v35, %v2329_v45 }
 0x315   :  { %v2169_v60 = vpop.f32.mrf.mxu2  ;;  %v2258_v44 = vpop.f32.mrf.mxu3 }
 0x316   :  { %v2170_v17 = vadd.f32 %v2169_v60, %v4902_v43  ;;  %v1994_v50 = vpop.f32.mrf.mxu0  ;;  %v2083_v54 = vpop.f32.mrf.mxu1  ;;  %v2617_v2 = vunpack.c.l.b16 %v2379_v8  ;;  %v2618_v52 = vunpack.c.h.b16 %v2379_v8 }
 0x317   :  { %v1995_v26 = vadd.f32 %v1994_v50, %v4895_v21 }
 0x318   :  { %v2259_v46 = vadd.f32 %v2258_v44, %v2170_v17  ;;  %2985 = vmatmul.bf16.vlgmr.msrb.gmra.mxu0 %v4663_v32 }
 0x319   :  { %v2084_v36 = vadd.f32 %v2083_v54, %v1995_v26  ;;  %3074 = vmatmul.bf16.vlgmr.msrb.gmra.mxu1 %v4665_v29 }
 0x31a   :  { %v2332_v62 = vmax.f32 %v2259_v46, 0.0  ;;  %3163 = vmatmul.bf16.vlgmr.msrb.gmra.mxu2 %v4931_v55  ;;  %3252 = vmatmul.bf16.vlgmr.msrb.gmra.mxu3 %v4933_v18 }
 0x31b   :  { %v2333_v18 = vmax.f32 %v2084_v36, 0.0 }
 0x31c   :  { %v2380_v41 = vpack.c.bf16 %v2332_v62, %v2331_v53 }
 0x31d   :  { %v2172_v37 = vpop.f32.mrf.mxu2  ;;  %v2261_v34 = vpop.f32.mrf.mxu3 }
 0x31e   :  { %v2173_v3 = vadd.f32 %v2172_v37, %v4902_v43  ;;  %v1996_v58 = vpop.f32.mrf.mxu0  ;;  %v2619_v61 = vunpack.c.l.b16 %v2380_v41  ;;  %v2620_v45 = vunpack.c.h.b16 %v2380_v41  ;;  %v2085_v48 = vpop.f32.mrf.mxu1 }
 0x31f   :  { %v1997_v32 = vadd.f32 %v1996_v58, %v4895_v21 }
 0x320   :  { %v2262_v35 = vadd.f32 %v2261_v34, %v2173_v3  ;;  %v5039_v60 = vpack.c.b16 %v2619_v61, %v2617_v2  ;;  %v5041_v29 = vpack.c.b16 %v2620_v45, %v2618_v52 }
 0x321   :  { %v2086_v55 = vadd.f32 %v2085_v48, %v1997_v32 }
 0x322   :  { %v2334_v17 = vmax.f32 %v2262_v35, 0.0 }
 0x323   :  { %v2335_v2 = vmax.f32 %v2086_v55, 0.0 }
 0x324   :  { %v2381_v44 = vpack.c.bf16 %v2334_v17, %v2333_v18 }
 0x325   :  { %v2174_v50 = vpop.f32.mrf.mxu2  ;;  %v2263_v26 = vpop.f32.mrf.mxu3 }
 0x326   :  { %v2175_v8 = vadd.f32 %v2174_v50, %v4902_v43  ;;  %v1999_v54 = vpop.f32.mrf.mxu0  ;;  %v2088_v53 = vpop.f32.mrf.mxu1  ;;  %v2621_v52 = vunpack.c.l.b16 %v2381_v44  ;;  %v2622_v34 = vunpack.c.h.b16 %v2381_v44 }
 0x327   :  { %v2000_v46 = vadd.f32 %v1999_v54, %v4895_v21 }
 0x328   :  { %v2264_v62 = vadd.f32 %v2263_v26, %v2175_v8  ;;  %2990 = vmatmul.bf16.gmra.mxu0 %v4675_v24 }
 0x329   :  { %v2089_v41 = vadd.f32 %v2088_v53, %v2000_v46  ;;  %3079 = vmatmul.bf16.gmra.mxu1 %v4677_v16 }
 0x32a   :  { %v2336_v37 = vmax.f32 %v2264_v62, 0.0  ;;  %3168 = vmatmul.bf16.gmra.mxu2 %v4952_v63  ;;  %3257 = vmatmul.bf16.gmra.mxu3 %v4954_v25 }
 0x32b   :  { %v2337_v25 = vmax.f32 %v2089_v41, 0.0 }
 0x32c   :  { %v2382_v36 = vpack.c.bf16 %v2336_v37, %v2335_v2 }
 0x32d   :  { %v2177_v3 = vpop.f32.mrf.mxu2  ;;  %v2266_v61 = vpop.f32.mrf.mxu3 }
 0x32e   :  { %v2178_v58 = vadd.f32 %v2177_v3, %v4902_v43  ;;  %v2001_v45 = vpop.f32.mrf.mxu0  ;;  %v2623_v32 = vunpack.c.l.b16 %v2382_v36  ;;  %v2624_v48 = vunpack.c.h.b16 %v2382_v36  ;;  %v2090_v35 = vpop.f32.mrf.mxu1 }
 0x32f   :  { %v2002_v24 = vadd.f32 %v2001_v45, %v4895_v21 }
 0x330   :  { %v2267_v55 = vadd.f32 %v2266_v61, %v2178_v58  ;;  %v5051_v18 = vpack.c.b16 %v2623_v32, %v2621_v52  ;;  %v5053_v16 = vpack.c.b16 %v2624_v48, %v2622_v34 }
 0x331   :  { %v2091_v63 = vadd.f32 %v2090_v35, %v2002_v24 }
 0x332   :  { %v2338_v17 = vmax.f32 %v2267_v55, 0.0 }
 0x333   :  { %v2339_v37 = vmax.f32 %v2091_v63, 0.0 }
 0x334   :  { %v2383_v50 = vpack.c.bf16 %v2338_v17, %v2337_v25 }
 0x335   :  { %v2179_v8 = vpop.f32.mrf.mxu2  ;;  %v2268_v26 = vpop.f32.mrf.mxu3 }
 0x336   :  { %v2180_v44 = vadd.f32 %v2179_v8, %v4902_v43  ;;  %v2004_v54 = vpop.f32.mrf.mxu0  ;;  %v2093_v53 = vpop.f32.mrf.mxu1  ;;  %v2625_v52 = vunpack.c.l.b16 %v2383_v50  ;;  %v2626_v34 = vunpack.c.h.b16 %v2383_v50 }
 0x337   :  { %v2005_v46 = vadd.f32 %v2004_v54, %v4895_v21 }
 0x338   :  { %v2269_v62 = vadd.f32 %v2268_v26, %v2180_v44  ;;  %2995 = vmatmul.bf16.gmra.mxu0 %v4687_v39 }
 0x339   :  { %v2094_v2 = vadd.f32 %v2093_v53, %v2005_v46  ;;  %3084 = vmatmul.bf16.gmra.mxu1 %v4689_v27 }
 0x33a   :  { %v2340_v36 = vmax.f32 %v2269_v62, 0.0  ;;  %3173 = vmatmul.bf16.gmra.mxu2 %v4967_v15  ;;  %3262 = vmatmul.bf16.gmra.mxu3 %v4969_v28 }
 0x33b   :  { %v2341_v28 = vmax.f32 %v2094_v2, 0.0 }
 0x33c   :  { %v2384_v41 = vpack.c.bf16 %v2340_v36, %v2339_v37 }
 0x33d   :  { %v2182_v3 = vpop.f32.mrf.mxu2  ;;  %v2271_v61 = vpop.f32.mrf.mxu3 }
 0x33e   :  { %v2183_v58 = vadd.f32 %v2182_v3, %v4902_v43  ;;  %v2006_v45 = vpop.f32.mrf.mxu0  ;;  %v2627_v32 = vunpack.c.l.b16 %v2384_v41  ;;  %v2628_v48 = vunpack.c.h.b16 %v2384_v41  ;;  %v2095_v24 = vpop.f32.mrf.mxu1 }
 0x33f   :  { %v2007_v39 = vadd.f32 %v2006_v45, %v4895_v21 }
 0x340   :  { %v2272_v35 = vadd.f32 %v2271_v61, %v2183_v58  ;;  %v5063_v55 = vpack.c.b16 %v2627_v32, %v2625_v52  ;;  %v5065_v27 = vpack.c.b16 %v2628_v48, %v2626_v34 }
 0x341   :  { %v2096_v15 = vadd.f32 %v2095_v24, %v2007_v39 }
 0x342   :  { %v2342_v63 = vmax.f32 %v2272_v35, 0.0 }
 0x343   :  { %v2343_v62 = vmax.f32 %v2096_v15, 0.0 }
 0x344   :  { %v2385_v25 = vpack.c.bf16 %v2342_v63, %v2341_v28 }
 0x345   :  { %v2184_v17 = vpop.f32.mrf.mxu2  ;;  %v2273_v8 = vpop.f32.mrf.mxu3 }
 0x346   :  { %v2185_v50 = vadd.f32 %v2184_v17, %v4902_v43  ;;  %v2009_v44 = vpop.f32.mrf.mxu0  ;;  %v2098_v54 = vpop.f32.mrf.mxu1  ;;  %v2629_v36 = vunpack.c.l.b16 %v2385_v25  ;;  %v2630_v52 = vunpack.c.h.b16 %v2385_v25 }
 0x347   :  { %v2010_v26 = vadd.f32 %v2009_v44, %v4895_v21 }
 0x348   :  { %v2274_v46 = vadd.f32 %v2273_v8, %v2185_v50  ;;  %3000 = vmatmul.bf16.gmra.mxu0 %v4699_v6 }
 0x349   :  { %v2099_v53 = vadd.f32 %v2098_v54, %v2010_v26  ;;  %3089 = vmatmul.bf16.gmra.mxu1 %v4701_v7 }
 0x34a   :  { %v2344_v37 = vmax.f32 %v2274_v46, 0.0  ;;  %3178 = vmatmul.bf16.gmra.mxu2 %v4988_v56  ;;  %3267 = vmatmul.bf16.gmra.mxu3 %v4990_v42 }
 0x34b   :  { %v2345_v42 = vmax.f32 %v2099_v53, 0.0 }
 0x34c   :  { %v2386_v2 = vpack.c.bf16 %v2344_v37, %v2343_v62 }
 0x34d   :  { %v2187_v41 = vpop.f32.mrf.mxu2  ;;  %v2276_v34 = vpop.f32.mrf.mxu3 }
 0x34e   :  { %v2188_v3 = vadd.f32 %v2187_v41, %v4902_v43  ;;  %v2011_v58 = vpop.f32.mrf.mxu0  ;;  %v2631_v61 = vunpack.c.l.b16 %v2386_v2  ;;  %v2632_v45 = vunpack.c.h.b16 %v2386_v2  ;;  %v2100_v32 = vpop.f32.mrf.mxu1 }
 0x34f   :  { %v2012_v6 = vadd.f32 %v2011_v58, %v4895_v21 }
 0x350   :  { %v2277_v48 = vadd.f32 %v2276_v34, %v2188_v3  ;;  %v5075_v39 = vpack.c.b16 %v2631_v61, %v2629_v36  ;;  %v5077_v7 = vpack.c.b16 %v2632_v45, %v2630_v52 }
 0x351   :  { %v2101_v56 = vadd.f32 %v2100_v32, %v2012_v6 }
 0x352   :  { %v2346_v24 = vmax.f32 %v2277_v48, 0.0 }
 0x353   :  { %v2347_v26 = vmax.f32 %v2101_v56, 0.0 }
 0x354   :  { %v2387_v35 = vpack.c.bf16 %v2346_v24, %v2345_v42 }
 0x355   :  { %v2189_v15 = vpop.f32.mrf.mxu2  ;;  %v2278_v63 = vpop.f32.mrf.mxu3 }
 0x356   :  { %v2190_v28 = vadd.f32 %v2189_v15, %v4902_v43  ;;  %v2014_v25 = vpop.f32.mrf.mxu0  ;;  %v2103_v50 = vpop.f32.mrf.mxu1  ;;  %v2633_v53 = vunpack.c.l.b16 %v2387_v35  ;;  %v2634_v37 = vunpack.c.h.b16 %v2387_v35 }
 0x357   :  { %v2015_v17 = vadd.f32 %v2014_v25, %v4895_v21 }
 0x358   :  { %v2279_v8 = vadd.f32 %v2278_v63, %v2190_v28  ;;  %3005 = vmatmul.bf16.gmra.mxu0 %v4711_v31 }
 0x359   :  { %v2104_v44 = vadd.f32 %v2103_v50, %v2015_v17  ;;  %3094 = vmatmul.bf16.gmra.mxu1 %v4713_v59 }
 0x35a   :  { %v2348_v54 = vmax.f32 %v2279_v8, 0.0  ;;  %3183 = vmatmul.bf16.gmra.mxu2 %v5003_v57  ;;  %3272 = vmatmul.bf16.gmra.mxu3 %v5005_v40 }
 0x35b   :  { %v2349_v40 = vmax.f32 %v2104_v44, 0.0 }
 0x35c   :  { %v2388_v46 = vpack.c.bf16 %v2348_v54, %v2347_v26 }
 0x35d   :  { %v2192_v62 = vpop.f32.mrf.mxu2  ;;  %v2281_v36 = vpop.f32.mrf.mxu3 }
 0x35e   :  { %v2193_v2 = vadd.f32 %v2192_v62, %v4902_v43  ;;  %v2016_v41 = vpop.f32.mrf.mxu0  ;;  %v2635_v52 = vunpack.c.l.b16 %v2388_v46  ;;  %v2636_v3 = vunpack.c.h.b16 %v2388_v46  ;;  %v2105_v34 = vpop.f32.mrf.mxu1 }
 0x35f   :  { %v2017_v31 = vadd.f32 %v2016_v41, %v4895_v21 }
 0x360   :  { %v2282_v58 = vadd.f32 %v2281_v36, %v2193_v2  ;;  %v5087_v61 = vpack.c.b16 %v2635_v52, %v2633_v53  ;;  %v5089_v59 = vpack.c.b16 %v2636_v3, %v2634_v37 }
 0x361   :  { %v2106_v57 = vadd.f32 %v2105_v34, %v2017_v31 }
 0x362   :  { %v2350_v45 = vmax.f32 %v2282_v58, 0.0 }
 0x363   :  { %v2351_v63 = vmax.f32 %v2106_v57, 0.0 }
 0x364   :  { %v2389_v6 = vpack.c.bf16 %v2350_v45, %v2349_v40 }
 0x365   :  { %v2194_v32 = vpop.f32.mrf.mxu2  ;;  %v2283_v56 = vpop.f32.mrf.mxu3 }
 0x366   :  { %v2195_v48 = vadd.f32 %v2194_v32, %v4902_v43  ;;  %v2019_v42 = vpop.f32.mrf.mxu0  ;;  %v2108_v35 = vpop.f32.mrf.mxu1  ;;  %v2637_v50 = vunpack.c.l.b16 %v2389_v6  ;;  %v2638_v44 = vunpack.c.h.b16 %v2389_v6 }
 0x367   :  { %v2020_v24 = vadd.f32 %v2019_v42, %v4895_v21 }
 0x368   :  { %v2284_v15 = vadd.f32 %v2283_v56, %v2195_v48  ;;  %3010 = vmatmul.bf16.gmra.mxu0 %v4732_v0 }
 0x369   :  { %v2109_v28 = vadd.f32 %v2108_v35, %v2020_v24  ;;  %3099 = vmatmul.bf16.gmra.mxu1 %v4734_v14 }
 0x36a   :  { %v2352_v25 = vmax.f32 %v2284_v15, 0.0  ;;  %3188 = vmatmul.bf16.gmra.mxu2 %v5015_v49  ;;  %3277 = vmatmul.bf16.gmra.mxu3 %v5017_v20 }
 0x36b   :  { %v2353_v20 = vmax.f32 %v2109_v28, 0.0 }
 0x36c   :  { %v2390_v17 = vpack.c.bf16 %v2352_v25, %v2351_v63 }
 0x36d   :  { %v2197_v8 = vpop.f32.mrf.mxu2  ;;  %v2286_v54 = vpop.f32.mrf.mxu3 }
 0x36e   :  { %v2198_v26 = vadd.f32 %v2197_v8, %v4902_v43  ;;  %v2021_v46 = vpop.f32.mrf.mxu0  ;;  %v2639_v53 = vunpack.c.l.b16 %v2390_v17  ;;  %v2640_v62 = vunpack.c.h.b16 %v2390_v17  ;;  %v2110_v37 = vpop.f32.mrf.mxu1 }
 0x36f   :  { %v2022_v0 = vadd.f32 %v2021_v46, %v4895_v21 }
 0x370   :  { %v2287_v2 = vadd.f32 %v2286_v54, %v2198_v26  ;;  %v5099_v36 = vpack.c.b16 %v2639_v53, %v2637_v50  ;;  %v5101_v14 = vpack.c.b16 %v2640_v62, %v2638_v44 }
 0x371   :  { %v2111_v49 = vadd.f32 %v2110_v37, %v2022_v0 }
 0x372   :  { %v2354_v41 = vmax.f32 %v2287_v2, 0.0 }
 0x373   :  { %v2355_v32 = vmax.f32 %v2111_v49, 0.0 }
 0x374   :  { %v2391_v52 = vpack.c.bf16 %v2354_v41, %v2353_v20 }
 0x375   :  { %v2199_v3 = vpop.f32.mrf.mxu2  ;;  %v2288_v34 = vpop.f32.mrf.mxu3 }
 0x376   :  { %v2200_v31 = vadd.f32 %v2199_v3, %v4902_v43  ;;  %v2024_v58 = vpop.f32.mrf.mxu0  ;;  %v2113_v40 = vpop.f32.mrf.mxu1  ;;  %v2641_v42 = vunpack.c.l.b16 %v2391_v52  ;;  %v2642_v35 = vunpack.c.h.b16 %v2391_v52 }
 0x377   :  { %v2025_v57 = vadd.f32 %v2024_v58, %v4895_v21 }
 0x378   :  { %v2289_v45 = vadd.f32 %v2288_v34, %v2200_v31  ;;  %3015 = vmatmul.bf16.gmra.mxu0 %v4747_v5 }
 0x379   :  { %v2114_v6 = vadd.f32 %v2113_v40, %v2025_v57  ;;  %3104 = vmatmul.bf16.gmra.mxu1 %v4749_v10 }
 0x37a   :  { %v2356_v48 = vmax.f32 %v2289_v45, 0.0  ;;  %3193 = vmatmul.bf16.gmra.mxu2 %v5027_v22  ;;  %3282 = vmatmul.bf16.gmra.mxu3 %v5029_v23 }
 0x37b   :  { %v2357_v23 = vmax.f32 %v2114_v6, 0.0 }
 0x37c   :  { %v2392_v56 = vpack.c.bf16 %v2356_v48, %v2355_v32 }
 0x37d   :  { %v2202_v24 = vpop.f32.mrf.mxu2  ;;  %v2291_v28 = vpop.f32.mrf.mxu3 }
 0x37e   :  { %v2203_v15 = vadd.f32 %v2202_v24, %v4902_v43  ;;  %v2026_v63 = vpop.f32.mrf.mxu0  ;;  %v2643_v25 = vunpack.c.l.b16 %v2392_v56  ;;  %v2644_v17 = vunpack.c.h.b16 %v2392_v56  ;;  %v2115_v50 = vpop.f32.mrf.mxu1 }
 0x37f   :  { %v2027_v5 = vadd.f32 %v2026_v63, %v4895_v21 }
 0x380   :  { %v2292_v8 = vadd.f32 %v2291_v28, %v2203_v15  ;;  %v5111_v44 = vpack.c.b16 %v2643_v25, %v2641_v42  ;;  %v5113_v10 = vpack.c.b16 %v2644_v17, %v2642_v35  ;;  %v5127_v15 = vld [vmem:[#allocation7] ss:$0 sm:$0xff] }
 0x381   :  { %v2116_v22 = vadd.f32 %v2115_v50, %v2027_v5 }
 0x382   :  { %v2358_v26 = vmax.f32 %v2292_v8, 0.0 }
 0x383   :  { %v2359_v41 = vmax.f32 %v2116_v22, 0.0 }
 0x384   :  { %v2393_v54 = vpack.c.bf16 %v2358_v26, %v2357_v23 }
 0x385   :  { %v2204_v46 = vpop.f32.mrf.mxu2  ;;  %v2293_v62 = vpop.f32.mrf.mxu3 }
 0x386   :  { %v2205_v53 = vadd.f32 %v2204_v46, %v4902_v43  ;;  %v2029_v0 = vpop.f32.mrf.mxu0  ;;  %v2118_v2 = vpop.f32.mrf.mxu1  ;;  %v2645_v31 = vunpack.c.l.b16 %v2393_v54  ;;  %v2646_v58 = vunpack.c.h.b16 %v2393_v54 }
 0x387   :  { %v2030_v37 = vadd.f32 %v2029_v0, %v4895_v21 }
 0x388   :  { %v2294_v49 = vadd.f32 %v2293_v62, %v2205_v53  ;;  %3020 = vmatmul.bf16.gmra.mxu0 %v4768_v30 }
 0x389   :  { %v2119_v20 = vadd.f32 %v2118_v2, %v2030_v37  ;;  %3109 = vmatmul.bf16.gmra.mxu1 %v4770_v38 }
 0x38a   :  { %v2360_v52 = vmax.f32 %v2294_v49, 0.0  ;;  %3198 = vmatmul.bf16.gmra.mxu2 %v5039_v60  ;;  %3287 = vmatmul.bf16.gmra.mxu3 %v5041_v29 }
 0x38b   :  { %v2361_v29 = vmax.f32 %v2119_v20, 0.0 }
 0x38c   :  { %v2394_v3 = vpack.c.bf16 %v2360_v52, %v2359_v41 }
 0x38d   :  { %v2207_v34 = vpop.f32.mrf.mxu2  ;;  %v2296_v40 = vpop.f32.mrf.mxu3 }
 0x38e   :  { %v2208_v57 = vadd.f32 %v2207_v34, %v4902_v43  ;;  %v2031_v45 = vpop.f32.mrf.mxu0  ;;  %v2647_v6 = vunpack.c.l.b16 %v2394_v3  ;;  %v2648_v32 = vunpack.c.h.b16 %v2394_v3  ;;  %v2120_v48 = vpop.f32.mrf.mxu1 }
 0x38f   :  { %v2032_v30 = vadd.f32 %v2031_v45, %v4895_v21 }
 0x390   :  { %v2297_v56 = vadd.f32 %v2296_v40, %v2208_v57  ;;  %v5123_v42 = vpack.c.b16 %v2647_v6, %v2645_v31  ;;  %v5125_v38 = vpack.c.b16 %v2648_v32, %v2646_v58 }
 0x391   :  { %v2121_v60 = vadd.f32 %v2120_v48, %v2032_v30 }
 0x392   :  { %v2362_v24 = vmax.f32 %v2297_v56, 0.0 }
 0x393   :  { %v2363_v8 = vmax.f32 %v2121_v60, 0.0 }
 0x394   :  { %v2395_v35 = vpack.c.bf16 %v2362_v24, %v2361_v29 }
 0x395   :  { %v2209_v28 = vpop.f32.mrf.mxu2  ;;  %v2298_v25 = vpop.f32.mrf.mxu3 }
 0x396   :  { %v2210_v63 = vadd.f32 %v2209_v28, %v4902_v43  ;;  %v2986_v17 = vpop.f32.mrf.mxu0  ;;  %v3075_v5 = vpop.f32.mrf.mxu1  ;;  %v2649_v54 = vunpack.c.l.b16 %v2395_v35  ;;  %v2650_v46 = vunpack.c.h.b16 %v2395_v35 }
 0x397   :  { %v2987_v21 = vadd.f32 %v5127_v15, %v2986_v17 }
 0x398   :  { %v2299_v50 = vadd.f32 %v2298_v25, %v2210_v63  ;;  %3025 = vmatmul.bf16.gmra.mxu0 %v4783_v1 }
 0x399   :  { %3114 = vmatmul.bf16.gmra.mxu1 %v4785_v51  ;;  %v3076_v26 = vadd.f32 %v3075_v5, %v2987_v21 }
 0x39a   :  { %v2364_v22 = vmax.f32 %v2299_v50, 0.0  ;;  %3203 = vmatmul.bf16.gmra.mxu2 %v5051_v18  ;;  %3292 = vmatmul.bf16.gmra.mxu3 %v5053_v16 }
 0x39c   :  { %v2396_v23 = vpack.c.bf16 %v2364_v22, %v2363_v8 }
 0x39d   :  { %v3164_v43 = vpop.f32.mrf.mxu2  ;;  %v3253_v62 = vpop.f32.mrf.mxu3 }
 0x39e   :  { %v3165_v53 = vadd.f32 %v3164_v43, %v3076_v26  ;;  %v2988_v0 = vpop.f32.mrf.mxu0  ;;  %v2651_v37 = vunpack.c.l.b16 %v2396_v23  ;;  %v2652_v2 = vunpack.c.h.b16 %v2396_v23  ;;  %v3077_v49 = vpop.f32.mrf.mxu1 }
 0x39f   :  { %v2989_v20 = vadd.f32 %v5127_v15, %v2988_v0 }
 0x3a0   :  { %v3254_v1 = vadd.f32 %v3253_v62, %v3165_v53  ;;  %v5136_v41 = vpack.c.b16 %v2651_v37, %v2649_v54  ;;  %v5138_v51 = vpack.c.b16 %v2652_v2, %v2650_v46 }
 0x3a1   :  { %v3078_v18 = vadd.f32 %v3077_v49, %v2989_v20 }
 0x3a2   :  { %3333 = vst [vmem:[#allocation8] sm:$0xff] %v3254_v1 }
 0x3a5   :  { %v3166_v16 = vpop.f32.mrf.mxu2  ;;  %v3255_v3 = vpop.f32.mrf.mxu3 }
 0x3a6   :  { %v3167_v52 = vadd.f32 %v3166_v16, %v3078_v18  ;;  %v2991_v31 = vpop.f32.mrf.mxu0  ;;  %v3080_v34 = vpop.f32.mrf.mxu1 }
 0x3a7   :  { %v2992_v57 = vadd.f32 %v5127_v15, %v2991_v31 }
 0x3a8   :  { %v3256_v58 = vadd.f32 %v3255_v3, %v3167_v52  ;;  %3030 = vmatmul.bf16.gmra.mxu0 %v4804_v4 }
 0x3a9   :  { %3119 = vmatmul.bf16.gmra.mxu1 %v4806_v12  ;;  %v3081_v40 = vadd.f32 %v3080_v34, %v2992_v57 }
 0x3aa   :  { %3334 = vst [vmem:[#allocation8 + $0x8] sm:$0xff] %v3256_v58  ;;  %3208 = vmatmul.bf16.gmra.mxu2 %v5063_v55  ;;  %3297 = vmatmul.bf16.gmra.mxu3 %v5065_v27 }
 0x3ad   :  { %v3169_v45 = vpop.f32.mrf.mxu2  ;;  %v3258_v32 = vpop.f32.mrf.mxu3 }
 0x3ae   :  { %v3170_v6 = vadd.f32 %v3169_v45, %v3081_v40  ;;  %v2993_v30 = vpop.f32.mrf.mxu0  ;;  %v3082_v48 = vpop.f32.mrf.mxu1 }
 0x3af   :  { %v2994_v60 = vadd.f32 %v5127_v15, %v2993_v30 }
 0x3b0   :  { %v3259_v56 = vadd.f32 %v3258_v32, %v3170_v6 }
 0x3b1   :  { %v3083_v29 = vadd.f32 %v3082_v48, %v2994_v60 }
 0x3b2   :  { %3335 = vst [vmem:[#allocation8 + $0x10] sm:$0xff] %v3259_v56 }
 0x3b5   :  { %v3171_v24 = vpop.f32.mrf.mxu2  ;;  %v3260_v35 = vpop.f32.mrf.mxu3 }
 0x3b6   :  { %v3172_v4 = vadd.f32 %v3171_v24, %v3083_v29  ;;  %v2996_v28 = vpop.f32.mrf.mxu0  ;;  %v3085_v12 = vpop.f32.mrf.mxu1  ;;  %v5243_v29 = vld [vmem:[#allocation21_spill] sm:$0xff] }
 0x3b7   :  { %v2997_v55 = vadd.f32 %v5127_v15, %v2996_v28 }
 0x3b8   :  { %v3261_v63 = vadd.f32 %v3260_v35, %v3172_v4  ;;  %3035 = vmatmul.bf16.gmra.mxu0 %v4819_v47 }
 0x3b9   :  { %3124 = vmatmul.bf16.gmra.mxu1 %v4821_v9  ;;  %v3086_v27 = vadd.f32 %v3085_v12, %v2997_v55 }
 0x3ba   :  { %3336 = vst [vmem:[#allocation8 + $0x18] sm:$0xff] %v3261_v63  ;;  %3213 = vmatmul.bf16.gmra.mxu2 %v5075_v39  ;;  %3302 = vmatmul.bf16.gmra.mxu3 %v5077_v7 }
 0x3bd   :  { %v3174_v25 = vpop.f32.mrf.mxu2  ;;  %v3263_v5 = vpop.f32.mrf.mxu3 }
 0x3be   :  { %v3175_v17 = vadd.f32 %v3174_v25, %v3086_v27  ;;  %v2998_v50 = vpop.f32.mrf.mxu0  ;;  %v3087_v21 = vpop.f32.mrf.mxu1 }
 0x3bf   :  { %v2999_v22 = vadd.f32 %v5127_v15, %v2998_v50 }
 0x3c0   :  { %v3264_v8 = vadd.f32 %v3263_v5, %v3175_v17 }
 0x3c1   :  { %v3088_v23 = vadd.f32 %v3087_v21, %v2999_v22 }
 0x3c2   :  { %3337 = vst [vmem:[#allocation8 + $0x20] sm:$0xff] %v3264_v8 }
 0x3c5   :  { %v3176_v26 = vpop.f32.mrf.mxu2  ;;  %v3265_v54 = vpop.f32.mrf.mxu3 }
 0x3c6   :  { %v3177_v47 = vadd.f32 %v3176_v26, %v3088_v23  ;;  %v3001_v43 = vpop.f32.mrf.mxu0  ;;  %v3090_v9 = vpop.f32.mrf.mxu1  ;;  %v5245_v23 = vld [vmem:[#allocation23_spill] sm:$0xff] }
 0x3c7   :  { %v3002_v39 = vadd.f32 %v5127_v15, %v3001_v43 }
 0x3c8   :  { %v3266_v46 = vadd.f32 %v3265_v54, %v3177_v47  ;;  %3040 = vmatmul.bf16.gmra.mxu0 %v4840_v13 }
 0x3c9   :  { %3129 = vmatmul.bf16.gmra.mxu1 %v4842_v11  ;;  %v3091_v7 = vadd.f32 %v3090_v9, %v3002_v39 }
 0x3ca   :  { %3338 = vst [vmem:[#allocation8 + $0x28] sm:$0xff] %v3266_v46  ;;  %3218 = vmatmul.bf16.gmra.mxu2 %v5087_v61  ;;  %3307 = vmatmul.bf16.gmra.mxu3 %v5089_v59 }
 0x3cd   :  { %v3179_v53 = vpop.f32.mrf.mxu2  ;;  %v3268_v0 = vpop.f32.mrf.mxu3 }
 0x3ce   :  { %v3180_v62 = vadd.f32 %v3179_v53, %v3091_v7  ;;  %v3003_v37 = vpop.f32.mrf.mxu0  ;;  %v3092_v2 = vpop.f32.mrf.mxu1 }
 0x3cf   :  { %v3004_v1 = vadd.f32 %v5127_v15, %v3003_v37 }
 0x3d0   :  { %v3269_v49 = vadd.f32 %v3268_v0, %v3180_v62 }
 0x3d1   :  { %v3093_v20 = vadd.f32 %v3092_v2, %v3004_v1 }
 0x3d2   :  { %3339 = vst [vmem:[#allocation8 + $0x30] sm:$0xff] %v3269_v49 }
 0x3d5   :  { %v3181_v18 = vpop.f32.mrf.mxu2  ;;  %v3270_v16 = vpop.f32.mrf.mxu3 }
 0x3d6   :  { %v3182_v13 = vadd.f32 %v3181_v18, %v3093_v20  ;;  %v3006_v52 = vpop.f32.mrf.mxu0  ;;  %v3095_v11 = vpop.f32.mrf.mxu1  ;;  %v5247_v20 = vld [vmem:[#allocation25_spill] sm:$0xff] }
 0x3d7   :  { %v3007_v61 = vadd.f32 %v5127_v15, %v3006_v52 }
 0x3d8   :  { %v3271_v3 = vadd.f32 %v3270_v16, %v3182_v13  ;;  %3045 = vmatmul.bf16.gmra.mxu0 %v4855_v33 }
 0x3d9   :  { %3134 = vmatmul.bf16.gmra.mxu1 %v4857_v19  ;;  %v3096_v59 = vadd.f32 %v3095_v11, %v3007_v61 }
 0x3da   :  { %3340 = vst [vmem:[#allocation8 + $0x38] sm:$0xff] %v3271_v3  ;;  %3223 = vmatmul.bf16.gmra.mxu2 %v5099_v36  ;;  %3312 = vmatmul.bf16.gmra.mxu3 %v5101_v14  ;;  %v5242_v14 = vld [vmem:[#allocation20_spill] sm:$0xff] }
 0x3dd   :  { %v3184_v31 = vpop.f32.mrf.mxu2  ;;  %v3273_v58 = vpop.f32.mrf.mxu3 }
 0x3de   :  { %v3185_v34 = vadd.f32 %v3184_v31, %v3096_v59  ;;  %v3008_v57 = vpop.f32.mrf.mxu0  ;;  %v3097_v40 = vpop.f32.mrf.mxu1 }
 0x3df   :  { %v3009_v6 = vadd.f32 %v5127_v15, %v3008_v57 }
 0x3e0   :  { %v3274_v45 = vadd.f32 %v3273_v58, %v3185_v34 }
 0x3e1   :  { %v3098_v32 = vadd.f32 %v3097_v40, %v3009_v6 }
 0x3e2   :  { %3341 = vst [vmem:[#allocation8 + $0x40] sm:$0xff] %v3274_v45 }
 0x3e5   :  { %v3186_v30 = vpop.f32.mrf.mxu2  ;;  %v3275_v48 = vpop.f32.mrf.mxu3 }
 0x3e6   :  { %v3187_v33 = vadd.f32 %v3186_v30, %v3098_v32  ;;  %v3011_v56 = vpop.f32.mrf.mxu0  ;;  %v3100_v19 = vpop.f32.mrf.mxu1 }
 0x3e7   :  { %v3012_v36 = vadd.f32 %v5127_v15, %v3011_v56 }
 0x3e8   :  { %v3276_v60 = vadd.f32 %v3275_v48, %v3187_v33  ;;  %3050 = vmatmul.bf16.gmra.mxu0 %v5242_v14 }
 0x3e9   :  { %3139 = vmatmul.bf16.gmra.mxu1 %v5243_v29  ;;  %v3101_v24 = vadd.f32 %v3100_v19, %v3012_v36 }
 0x3ea   :  { %3342 = vst [vmem:[#allocation8 + $0x48] sm:$0xff] %v3276_v60  ;;  %3228 = vmatmul.bf16.gmra.mxu2 %v5111_v44  ;;  %3317 = vmatmul.bf16.gmra.mxu3 %v5113_v10  ;;  %v5244_v10 = vld [vmem:[#allocation22_spill] sm:$0xff] }
 0x3ed   :  { %v3189_v4 = vpop.f32.mrf.mxu2  ;;  %v3278_v28 = vpop.f32.mrf.mxu3 }
 0x3ee   :  { %v3190_v35 = vadd.f32 %v3189_v4, %v3101_v24  ;;  %v3013_v12 = vpop.f32.mrf.mxu0  ;;  %v3102_v63 = vpop.f32.mrf.mxu1 }
 0x3ef   :  { %v3014_v27 = vadd.f32 %v5127_v15, %v3013_v12 }
 0x3f0   :  { %v3279_v55 = vadd.f32 %v3278_v28, %v3190_v35 }
 0x3f1   :  { %v3103_v25 = vadd.f32 %v3102_v63, %v3014_v27 }
 0x3f2   :  { %3343 = vst [vmem:[#allocation8 + $0x50] sm:$0xff] %v3279_v55 }
 0x3f5   :  { %v3191_v17 = vpop.f32.mrf.mxu2  ;;  %v3280_v50 = vpop.f32.mrf.mxu3 }
 0x3f6   :  { %v3192_v5 = vadd.f32 %v3191_v17, %v3103_v25  ;;  %v3016_v21 = vpop.f32.mrf.mxu0  ;;  %v3105_v8 = vpop.f32.mrf.mxu1 }
 0x3f7   :  { %v3017_v44 = vadd.f32 %v5127_v15, %v3016_v21 }
 0x3f8   :  { %v3281_v22 = vadd.f32 %v3280_v50, %v3192_v5  ;;  %3055 = vmatmul.bf16.gmra.mxu0 %v5244_v10 }
 0x3f9   :  { %3144 = vmatmul.bf16.gmra.mxu1 %v5245_v23  ;;  %v3106_v26 = vadd.f32 %v3105_v8, %v3017_v44 }
 0x3fa   :  { %3344 = vst [vmem:[#allocation8 + $0x58] sm:$0xff] %v3281_v22  ;;  %3233 = vmatmul.bf16.gmra.mxu2 %v5123_v42  ;;  %3322 = vmatmul.bf16.gmra.mxu3 %v5125_v38  ;;  %v5246_v38 = vld [vmem:[#allocation24_spill] sm:$0xff] }
 0x3fd   :  { %v3194_v47 = vpop.f32.mrf.mxu2  ;;  %v3283_v43 = vpop.f32.mrf.mxu3 }
 0x3fe   :  { %v3195_v54 = vadd.f32 %v3194_v47, %v3106_v26  ;;  %v3018_v9 = vpop.f32.mrf.mxu0  ;;  %v3107_v46 = vpop.f32.mrf.mxu1 }
 0x3ff   :  { %v3019_v7 = vadd.f32 %v5127_v15, %v3018_v9 }
 0x400   :  { %v3284_v39 = vadd.f32 %v3283_v43, %v3195_v54 }
 0x401   :  { %v3108_v53 = vadd.f32 %v3107_v46, %v3019_v7 }
 0x402   :  { %3345 = vst [vmem:[#allocation8 + $0x60] sm:$0xff] %v3284_v39 }
 0x405   :  { %v3196_v62 = vpop.f32.mrf.mxu2  ;;  %v3285_v37 = vpop.f32.mrf.mxu3 }
 0x406   :  { %v3197_v0 = vadd.f32 %v3196_v62, %v3108_v53  ;;  %v3021_v2 = vpop.f32.mrf.mxu0  ;;  %v3110_v49 = vpop.f32.mrf.mxu1 }
 0x407   :  { %v3022_v42 = vadd.f32 %v5127_v15, %v3021_v2 }
 0x408   :  { %v3286_v1 = vadd.f32 %v3285_v37, %v3197_v0  ;;  %3060 = vmatmul.bf16.gmra.mxu0 %v5246_v38 }
 0x409   :  { %3149 = vmatmul.bf16.gmra.mxu1 %v5247_v20  ;;  %v3111_v18 = vadd.f32 %v3110_v49, %v3022_v42 }
 0x40a   :  { %3346 = vst [vmem:[#allocation8 + $0x68] sm:$0xff] %v3286_v1  ;;  %3238 = vmatmul.bf16.gmra.mxu2 %v5136_v41  ;;  %3327 = vmatmul.bf16.gmra.mxu3 %v5138_v51 }
 0x40d   :  { %v3199_v13 = vpop.f32.mrf.mxu2  ;;  %v3288_v52 = vpop.f32.mrf.mxu3 }
 0x40e   :  { %v3200_v16 = vadd.f32 %v3199_v13, %v3111_v18  ;;  %v3023_v11 = vpop.f32.mrf.mxu0  ;;  %v3112_v3 = vpop.f32.mrf.mxu1 }
 0x40f   :  { %v3024_v59 = vadd.f32 %v5127_v15, %v3023_v11 }
 0x410   :  { %v3289_v61 = vadd.f32 %v3288_v52, %v3200_v16 }
 0x411   :  { %v3113_v31 = vadd.f32 %v3112_v3, %v3024_v59 }
 0x412   :  { %3347 = vst [vmem:[#allocation8 + $0x70] sm:$0xff] %v3289_v61 }
 0x415   :  { %v3201_v34 = vpop.f32.mrf.mxu2  ;;  %v3290_v57 = vpop.f32.mrf.mxu3 }
 0x416   :  { %v3202_v58 = vadd.f32 %v3201_v34, %v3113_v31  ;;  %v3026_v40 = vpop.f32.mrf.mxu0  ;;  %v3115_v45 = vpop.f32.mrf.mxu1 }
 0x417   :  { %v3027_v41 = vadd.f32 %v5127_v15, %v3026_v40 }
 0x418   :  { %v3291_v6 = vadd.f32 %v3290_v57, %v3202_v58 }
 0x419   :  { %v3116_v51 = vadd.f32 %v3115_v45, %v3027_v41 }
 0x41a   :  { %3348 = vst [vmem:[#allocation8 + $0x78] sm:$0xff] %v3291_v6 }
 0x41d   :  { %v3204_v32 = vpop.f32.mrf.mxu2  ;;  %v3293_v33 = vpop.f32.mrf.mxu3 }
 0x41e   :  { %v3205_v30 = vadd.f32 %v3204_v32, %v3116_v51  ;;  %v3028_v48 = vpop.f32.mrf.mxu0  ;;  %v3117_v56 = vpop.f32.mrf.mxu1 }
 0x41f   :  { %v3029_v60 = vadd.f32 %v5127_v15, %v3028_v48 }
 0x420   :  { %v3294_v19 = vadd.f32 %v3293_v33, %v3205_v30 }
 0x421   :  { %v3118_v36 = vadd.f32 %v3117_v56, %v3029_v60 }
 0x422   :  { %3349 = vst [vmem:[#allocation8 + $0x80] sm:$0xff] %v3294_v19 }
 0x425   :  { %v3206_v14 = vpop.f32.mrf.mxu2  ;;  %v3295_v24 = vpop.f32.mrf.mxu3 }
 0x426   :  { %v3207_v29 = vadd.f32 %v3206_v14, %v3118_v36  ;;  %v3031_v4 = vpop.f32.mrf.mxu0  ;;  %v3120_v35 = vpop.f32.mrf.mxu1 }
 0x427   :  { %v3032_v12 = vadd.f32 %v5127_v15, %v3031_v4 }
 0x428   :  { %v3296_v28 = vadd.f32 %v3295_v24, %v3207_v29 }
 0x429   :  { %v3121_v63 = vadd.f32 %v3120_v35, %v3032_v12 }
 0x42a   :  { %3350 = vst [vmem:[#allocation8 + $0x88] sm:$0xff] %v3296_v28 }
 0x42d   :  { %v3209_v55 = vpop.f32.mrf.mxu2  ;;  %v3298_v25 = vpop.f32.mrf.mxu3 }
 0x42e   :  { %v3210_v27 = vadd.f32 %v3209_v55, %v3121_v63  ;;  %v3033_v17 = vpop.f32.mrf.mxu0  ;;  %v3122_v5 = vpop.f32.mrf.mxu1 }
 0x42f   :  { %v3034_v21 = vadd.f32 %v5127_v15, %v3033_v17 }
 0x430   :  { %v3299_v50 = vadd.f32 %v3298_v25, %v3210_v27 }
 0x431   :  { %v3123_v8 = vadd.f32 %v3122_v5, %v3034_v21 }
 0x432   :  { %3351 = vst [vmem:[#allocation8 + $0x90] sm:$0xff] %v3299_v50 }
 0x435   :  { %v3211_v22 = vpop.f32.mrf.mxu2  ;;  %v3300_v10 = vpop.f32.mrf.mxu3 }
 0x436   :  { %v3212_v44 = vadd.f32 %v3211_v22, %v3123_v8  ;;  %v3036_v23 = vpop.f32.mrf.mxu0  ;;  %v3125_v26 = vpop.f32.mrf.mxu1 }
 0x437   :  { %v3037_v54 = vadd.f32 %v5127_v15, %v3036_v23 }
 0x438   :  { %v3301_v47 = vadd.f32 %v3300_v10, %v3212_v44 }
 0x439   :  { %v3126_v43 = vadd.f32 %v3125_v26, %v3037_v54 }
 0x43a   :  { %3352 = vst [vmem:[#allocation8 + $0x98] sm:$0xff] %v3301_v47 }
 0x43d   :  { %v3214_v9 = vpop.f32.mrf.mxu2  ;;  %v3303_v39 = vpop.f32.mrf.mxu3 }
 0x43e   :  { %v3215_v46 = vadd.f32 %v3214_v9, %v3126_v43  ;;  %v3038_v7 = vpop.f32.mrf.mxu0  ;;  %v3127_v53 = vpop.f32.mrf.mxu1 }
 0x43f   :  { %v3039_v0 = vadd.f32 %v5127_v15, %v3038_v7 }
 0x440   :  { %v3304_v62 = vadd.f32 %v3303_v39, %v3215_v46 }
 0x441   :  { %v3128_v37 = vadd.f32 %v3127_v53, %v3039_v0 }
 0x442   :  { %3353 = vst [vmem:[#allocation8 + $0xa0] sm:$0xff] %v3304_v62 }
 0x445   :  { %v3216_v2 = vpop.f32.mrf.mxu2  ;;  %v3305_v1 = vpop.f32.mrf.mxu3 }
 0x446   :  { %v3217_v49 = vadd.f32 %v3216_v2, %v3128_v37  ;;  %v3041_v42 = vpop.f32.mrf.mxu0  ;;  %v3130_v38 = vpop.f32.mrf.mxu1 }
 0x447   :  { %v3042_v18 = vadd.f32 %v5127_v15, %v3041_v42 }
 0x448   :  { %v3306_v20 = vadd.f32 %v3305_v1, %v3217_v49 }
 0x449   :  { %v3131_v13 = vadd.f32 %v3130_v38, %v3042_v18 }
 0x44a   :  { %3354 = vst [vmem:[#allocation8 + $0xa8] sm:$0xff] %v3306_v20 }
 0x44d   :  { %v3219_v16 = vpop.f32.mrf.mxu2  ;;  %v3308_v11 = vpop.f32.mrf.mxu3 }
 0x44e   :  { %v3220_v52 = vadd.f32 %v3219_v16, %v3131_v13  ;;  %v3043_v3 = vpop.f32.mrf.mxu0  ;;  %v3132_v61 = vpop.f32.mrf.mxu1 }
 0x44f   :  { %v3044_v31 = vadd.f32 %v5127_v15, %v3043_v3 }
 0x450   :  { %v3309_v59 = vadd.f32 %v3308_v11, %v3220_v52 }
 0x451   :  { %v3133_v34 = vadd.f32 %v3132_v61, %v3044_v31 }
 0x452   :  { %3355 = vst [vmem:[#allocation8 + $0xb0] sm:$0xff] %v3309_v59 }
 0x455   :  { %v3221_v58 = vpop.f32.mrf.mxu2  ;;  %v3310_v40 = vpop.f32.mrf.mxu3 }
 0x456   :  { %v3222_v57 = vadd.f32 %v3221_v58, %v3133_v34  ;;  %v3046_v45 = vpop.f32.mrf.mxu0  ;;  %v3135_v6 = vpop.f32.mrf.mxu1 }
 0x457   :  { %v3047_v51 = vadd.f32 %v5127_v15, %v3046_v45 }
 0x458   :  { %v3311_v41 = vadd.f32 %v3310_v40, %v3222_v57 }
 0x459   :  { %v3136_v32 = vadd.f32 %v3135_v6, %v3047_v51 }
 0x45a   :  { %3356 = vst [vmem:[#allocation8 + $0xb8] sm:$0xff] %v3311_v41 }
 0x45d   :  { %v3224_v30 = vpop.f32.mrf.mxu2  ;;  %v3313_v48 = vpop.f32.mrf.mxu3 }
 0x45e   :  { %v3225_v33 = vadd.f32 %v3224_v30, %v3136_v32  ;;  %v3048_v56 = vpop.f32.mrf.mxu0  ;;  %v3137_v19 = vpop.f32.mrf.mxu1 }
 0x45f   :  { %v3049_v36 = vadd.f32 %v5127_v15, %v3048_v56 }
 0x460   :  { %v3314_v60 = vadd.f32 %v3313_v48, %v3225_v33 }
 0x461   :  { %v3138_v14 = vadd.f32 %v3137_v19, %v3049_v36 }
 0x462   :  { %3357 = vst [vmem:[#allocation8 + $0xc0] sm:$0xff] %v3314_v60 }
 0x465   :  { %v3226_v29 = vpop.f32.mrf.mxu2  ;;  %v3315_v4 = vpop.f32.mrf.mxu3 }
 0x466   :  { %v3227_v24 = vadd.f32 %v3226_v29, %v3138_v14  ;;  %v3051_v35 = vpop.f32.mrf.mxu0  ;;  %v3140_v28 = vpop.f32.mrf.mxu1 }
 0x467   :  { %v3052_v63 = vadd.f32 %v5127_v15, %v3051_v35 }
 0x468   :  { %v3316_v12 = vadd.f32 %v3315_v4, %v3227_v24 }
 0x469   :  { %v3141_v55 = vadd.f32 %v3140_v28, %v3052_v63 }
 0x46a   :  { %3358 = vst [vmem:[#allocation8 + $0xc8] sm:$0xff] %v3316_v12 }
 0x46d   :  { %v3229_v27 = vpop.f32.mrf.mxu2  ;;  %v3318_v17 = vpop.f32.mrf.mxu3 }
 0x46e   :  { %v3230_v25 = vadd.f32 %v3229_v27, %v3141_v55  ;;  %v3053_v5 = vpop.f32.mrf.mxu0  ;;  %v3142_v50 = vpop.f32.mrf.mxu1 }
 0x46f   :  { %v3054_v8 = vadd.f32 %v5127_v15, %v3053_v5 }
 0x470   :  { %v3319_v21 = vadd.f32 %v3318_v17, %v3230_v25 }
 0x471   :  { %v3143_v22 = vadd.f32 %v3142_v50, %v3054_v8 }
 0x472   :  { %3359 = vst [vmem:[#allocation8 + $0xd0] sm:$0xff] %v3319_v21 }
 0x475   :  { %v3231_v44 = vpop.f32.mrf.mxu2  ;;  %v3320_v23 = vpop.f32.mrf.mxu3 }
 0x476   :  { %v3232_v10 = vadd.f32 %v3231_v44, %v3143_v22  ;;  %v3056_v26 = vpop.f32.mrf.mxu0  ;;  %v3145_v47 = vpop.f32.mrf.mxu1 }
 0x477   :  { %v3057_v43 = vadd.f32 %v5127_v15, %v3056_v26 }
 0x478   :  { %v3321_v54 = vadd.f32 %v3320_v23, %v3232_v10 }
 0x479   :  { %v3146_v9 = vadd.f32 %v3145_v47, %v3057_v43 }
 0x47a   :  { %3360 = vst [vmem:[#allocation8 + $0xd8] sm:$0xff] %v3321_v54 }
 0x47d   :  { %v3234_v46 = vpop.f32.mrf.mxu2  ;;  %v3323_v7 = vpop.f32.mrf.mxu3 }
 0x47e   :  { %v3235_v39 = vadd.f32 %v3234_v46, %v3146_v9  ;;  %v3058_v53 = vpop.f32.mrf.mxu0  ;;  %v3147_v62 = vpop.f32.mrf.mxu1 }
 0x47f   :  { %v3059_v37 = vadd.f32 %v5127_v15, %v3058_v53 }
 0x480   :  { %v3324_v0 = vadd.f32 %v3323_v7, %v3235_v39 }
 0x481   :  { %v3148_v2 = vadd.f32 %v3147_v62, %v3059_v37 }
 0x482   :  { %3361 = vst [vmem:[#allocation8 + $0xe0] sm:$0xff] %v3324_v0 }
 0x485   :  { %v3236_v49 = vpop.f32.mrf.mxu2  ;;  %v3325_v42 = vpop.f32.mrf.mxu3 }
 0x486   :  { %v3237_v1 = vadd.f32 %v3236_v49, %v3148_v2  ;;  %v3061_v38 = vpop.f32.mrf.mxu0  ;;  %v3150_v13 = vpop.f32.mrf.mxu1 }
 0x487   :  { %v3062_v18 = vadd.f32 %v5127_v15, %v3061_v38 }
 0x488   :  { %v3326_v20 = vadd.f32 %v3325_v42, %v3237_v1 }
 0x489   :  { %v3151_v16 = vadd.f32 %v3150_v13, %v3062_v18 }
 0x48a   :  { %3362 = vst [vmem:[#allocation8 + $0xe8] sm:$0xff] %v3326_v20 }
 0x48d   :  { %v3239_v52 = vpop.f32.mrf.mxu2  ;;  %v3328_v3 = vpop.f32.mrf.mxu3 }
 0x48e   :  { %v3240_v11 = vadd.f32 %v3239_v52, %v3151_v16  ;;  %v3063_v61 = vpop.f32.mrf.mxu0  ;;  %v3152_v34 = vpop.f32.mrf.mxu1 }
 0x48f   :  { %v3064_v31 = vadd.f32 %v5127_v15, %v3063_v61 }
 0x490   :  { %v3329_v59 = vadd.f32 %v3328_v3, %v3240_v11 }
 0x491   :  { %v3153_v58 = vadd.f32 %v3152_v34, %v3064_v31 }
 0x492   :  { %3363 = vst [vmem:[#allocation8 + $0xf0] sm:$0xff] %v3329_v59 }
 0x495   :  { %v3241_v57 = vpop.f32.mrf.mxu2  ;;  %v3330_v45 = vpop.f32.mrf.mxu3 }
 0x496   :  { %v3242_v40 = vadd.f32 %v3241_v57, %v3153_v58 }
 0x498   :  { %v3331_v6 = vadd.f32 %v3330_v45, %v3242_v40 }
 0x49a   :  { %3364 = vst [vmem:[#allocation8 + $0xf8] sm:$0xff] %v3331_v6 }
 0x49b   :  { %3377 = dma.vmem_to_hbm [thread:$0]  %s3370_s6, 4096, %s3372_s24, [#allocation4], %s4081_s11, %s4081_s11, %s4082_s12  }
 0x49c   :  { %4077 = dma.done.wait [#allocation4], 4096  }
 0x49d   :  { %4078 = vsyncadd [#allocation4], 4294963200 }
 0x49e   :  { %3382 = vsyncpa [#allocation3], 1 }
 0x49f   :  { %3383 = vsyncpa [#allocation6], 1 }
 0x4a0   :  { %3384 = vsyncpa [#allocation4], 1 }

</bundles_post_ra>
